<compile_context>
chip_gen: v7x
topology: tpu7x:2x2x1
jax: 0.10.0
libtpu: 0.0.40
codegen_flags: <defaults>
</compile_context>

<pallas_src>
import jax
import jax.numpy as jnp
from jax.experimental import pallas as pl
from jax.experimental.pallas import tpu as pltpu


# ----------------------------------------------------------------------------
# Fused kernel: conv1+pool -> conv2+pool -> flatten -> fc1+ReLU -> fc2
# One batch element per grid step (batch axis is "parallel" for v7x megacore).
# ----------------------------------------------------------------------------
def _fused_forward_kernel(x_ref, w1_ref, b1_ref, w2_ref, b2_ref,
                          fw1_ref, fb1_ref, fw2_ref, fb2_ref, o_ref):
    f32 = jnp.float32
    x = x_ref[0]                                           # (H, W, 3) NHWC

    def conv3x3_relu_pool(inp, w_r, b_r):
        h, w, cin = inp.shape
        cout = w_r.shape[1]
        # pad=1 on both spatial dims, built in-register (no HBM pad round trip)
        zc = jnp.zeros((h, 1, cin), f32)
        zr = jnp.zeros((1, w + 2, cin), f32)
        xp = jnp.concatenate([zc, inp, zc], axis=1)        # (h, w+2, cin)
        xp = jnp.concatenate([zr, xp, zr], axis=0)         # (h+2, w+2, cin)
        # im2col: 9 shifted taps concatenated on the lane axis -> ONE MXU matmul
        taps = jnp.concatenate(
            [xp[dy:dy + h, dx:dx + w, :].reshape(h * w, cin)
             for dy in range(3) for dx in range(3)], axis=1)   # (h*w, 9*cin)
        acc = jnp.dot(taps, w_r[...], preferred_element_type=f32)
        a = jnp.maximum(acc + b_r[...], 0.0)               # bias + ReLU
        # 2x2 max-pool, stride 2
        a = a.reshape(h, w, cout)
        a = a.reshape(h // 2, 2, w, cout).max(axis=1)      # pool rows
        a = a.reshape(h // 2, w // 2, 2, cout).max(axis=2)  # pool cols
        return a                                           # (h//2, w//2, cout)

    p1 = conv3x3_relu_pool(x, w1_ref, b1_ref)              # (H/2, W/2, 16)
    p2 = conv3x3_relu_pool(p1, w2_ref, b2_ref)             # (H/4, W/4, 4)

    # NHWC flatten into one lane-dense (1, F) row.  fc1's rows were permuted
    # host-side, so this is equivalent to PyTorch's NCHW x.view(N, -1) @ fc1.
    hp, wp, _ = p2.shape
    feat = jnp.concatenate(
        [p2[i][j:j + 1, :] for i in range(hp) for j in range(wp)], axis=1)

    h1 = jnp.dot(feat, fw1_ref[...], preferred_element_type=f32)
    h1 = jnp.maximum(h1 + fb1_ref[...], 0.0)
    # TODO(synk): F.dropout(p=0.3) is identity in eval mode; training-mode RNG dropout not implemented.
    out = jnp.dot(h1, fw2_ref[...], preferred_element_type=f32) + fb2_ref[...]
    o_ref[0] = out.astype(o_ref.dtype)                     # (1, output_dim)


# ----------------------------------------------------------------------------
# Wrapper: single pallas_call for the whole forward pass
# ----------------------------------------------------------------------------
@jax.jit
def convolutional_model_forward(x_nchw, kparams):
    w1, b1, w2, b2, fw1, fb1, fw2, fb2 = kparams
    n, cin, hh, ww = x_nchw.shape
    odim = fw2.shape[1]
    x = jnp.transpose(x_nchw, (0, 2, 3, 1))   # only remaining wrapper relayout (NCHW->NHWC, ~KBs)

    out = pl.pallas_call(
        _fused_forward_kernel,
        out_shape=jax.ShapeDtypeStruct((n, 1, odim), jnp.float32),
        grid=(n,),
        in_specs=[
            pl.BlockSpec((1, hh, ww, cin), lambda i: (i, 0, 0, 0)),
            pl.BlockSpec(w1.shape, lambda i: (0, 0)),
            pl.BlockSpec(b1.shape, lambda i: (0, 0)),
            pl.BlockSpec(w2.shape, lambda i: (0, 0)),
            pl.BlockSpec(b2.shape, lambda i: (0, 0)),
            pl.BlockSpec(fw1.shape, lambda i: (0, 0)),
            pl.BlockSpec(fb1.shape, lambda i: (0, 0)),
            pl.BlockSpec(fw2.shape, lambda i: (0, 0)),
            pl.BlockSpec(fb2.shape, lambda i: (0, 0)),
        ],
        out_specs=pl.BlockSpec((1, 1, odim), lambda i: (i, 0, 0)),
        compiler_params=pltpu.CompilerParams(
            dimension_semantics=("parallel",)),   # v7x: split batch over the 2 TensorCores
    )(x, w1, b1, w2, b2, fw1, fb1, fw2, fb2)
    return out.reshape(n, odim)


# ----------------------------------------------------------------------------
# Host-side parameter preparation (done once, not per forward pass)
# ----------------------------------------------------------------------------
def prepare_params(pt_params, input_size):
    """Convert PyTorch-layout params into the layouts the fused kernel consumes."""
    w1, b1, w2, b2, fc1_w, fc1_b, fc2_w, fc2_b = pt_params

    def conv_im2col(w):      # (Cout, Cin, 3, 3) -> (9*Cin, Cout), row = (dy, dx, ci)
        cout = w.shape[0]
        return jnp.transpose(w, (2, 3, 1, 0)).reshape(-1, cout)

    c2 = w2.shape[0]
    hp = wp = input_size // 4
    hid = fc1_w.shape[0]
    # Absorb PyTorch's NCHW flatten: reorder fc1 rows from (c, i, j) to (i, j, c).
    fw1 = (fc1_w.T.reshape(c2, hp, wp, hid)
           .transpose(1, 2, 0, 3).reshape(c2 * hp * wp, hid))
    return (conv_im2col(w1), b1.reshape(1, -1),
            conv_im2col(w2), b2.reshape(1, -1),
            fw1, fc1_b.reshape(1, -1),
            fc2_w.T, fc2_b.reshape(1, -1))


# ----------------------------------------------------------------------------
# Deterministic synthetic parameters in PyTorch-equivalent shapes
# ----------------------------------------------------------------------------
def init_params(key, input_size, hidden_dim, output_dim):
    ks = jax.random.split(key, 8)

    def u(k, shape, fan_in):
        bound = 1.0 / jnp.sqrt(float(fan_in))
        return jax.random.uniform(k, shape, jnp.float32, -bound, bound)

    w1 = u(ks[0], (16, 3, 3, 3), 3 * 9)
    b1 = u(ks[1], (16,), 3 * 9)
    w2 = u(ks[2], (4, 16, 3, 3), 16 * 9)
    b2 = u(ks[3], (4,), 16 * 9)
    first_dim = (input_size // 4) * (input_size // 4) * 4
    fc1_w = u(ks[4], (hidden_dim, first_dim), first_dim)
    fc1_b = u(ks[5], (hidden_dim,), first_dim)
    fc2_w = u(ks[6], (output_dim, hidden_dim), hidden_dim)
    fc2_b = u(ks[7], (output_dim,), hidden_dim)
    return (w1, b1, w2, b2, fc1_w, fc1_b, fc2_w, fc2_b)


# ----------------------------------------------------------------------------
# Pure-JAX reference with PyTorch semantics (for the correctness check)
# ----------------------------------------------------------------------------
def reference_forward(x_nchw, pt_params):
    w1, b1, w2, b2, fc1_w, fc1_b, fc2_w, fc2_b = pt_params

    def conv(x, w, b):
        y = jax.lax.conv_general_dilated(
            x, w, (1, 1), "SAME", dimension_numbers=("NCHW", "OIHW", "NCHW"))
        return jax.nn.relu(y + b.reshape(1, -1, 1, 1))

    def pool(x):
        return jax.lax.reduce_window(x, -jnp.inf, jax.lax.max,
                                     (1, 1, 2, 2), (1, 1, 2, 2), "VALID")

    y = pool(conv(x_nchw, w1, b1))
    y = pool(conv(y, w2, b2))
    y = y.reshape(y.shape[0], -1)                 # PyTorch NCHW flatten
    y = jax.nn.relu(y @ fc1_w.T + fc1_b)
    # dropout(p=0.3) is identity in eval mode
    return y @ fc2_w.T + fc2_b


if __name__ == "__main__":
    # Small shapes consistent with the module: batch=2, 3 input channels,
    # spatial=16 (so first_dim = (16//4)^2 * 4 = 64), hidden=32, output=3.
    batch, in_ch, input_size = 2, 3, 16
    hidden_dim, output_dim = 32, 3

    key = jax.random.PRNGKey(0)
    k_x, k_p = jax.random.split(key)
    x = jax.random.normal(k_x, (batch, in_ch, input_size, input_size), jnp.float32)
    pt_params = init_params(k_p, input_size, hidden_dim, output_dim)
    kparams = prepare_params(pt_params, input_size)

    out = convolutional_model_forward(x, kparams)
    out = jax.block_until_ready(out)
    assert out.shape == (batch, output_dim), out.shape

    ref = jax.block_until_ready(reference_forward(x, pt_params))
    max_err = float(jnp.max(jnp.abs(out - ref)))
    assert jnp.allclose(out, ref, atol=1e-3, rtol=1e-3), (
        "mismatch vs reference: max abs diff = %f" % max_err)

    print("KERNEL_OK")
</pallas_src>

<mosaic_0001>
module attributes {stable_mosaic.version = 11 : i64} {
  func.func @_fused_forward_kernel(%arg0: i32, %arg1: memref<1x16x16x3xf32, #tpu.memory_space<vmem>>, %arg2: memref<27x16xf32, #tpu.memory_space<vmem>>, %arg3: memref<1x16xf32, #tpu.memory_space<vmem>>, %arg4: memref<144x4xf32, #tpu.memory_space<vmem>>, %arg5: memref<1x4xf32, #tpu.memory_space<vmem>>, %arg6: memref<64x32xf32, #tpu.memory_space<vmem>>, %arg7: memref<1x32xf32, #tpu.memory_space<vmem>>, %arg8: memref<32x3xf32, #tpu.memory_space<vmem>>, %arg9: memref<1x3xf32, #tpu.memory_space<vmem>>, %arg10: memref<1x1x3xf32, #tpu.memory_space<vmem>>) attributes {dimension_semantics = [#tpu.dimension_semantics<parallel>], iteration_bounds = array<i64: 2>, scalar_prefetch = 0 : i64, scratch_operands = 0 : i64, tpu.core_type = #tpu.core_type<tc>, window_params = [{transform_indices = @transform_0, window_bounds = array<i64: 1, 16, 16, 3>}, {pipeline_mode = #tpu.pipeline_mode<synchronous>, transform_indices = @transform_1, window_bounds = array<i64: 27, 16>}, {pipeline_mode = #tpu.pipeline_mode<synchronous>, transform_indices = @transform_2, window_bounds = array<i64: 1, 16>}, {pipeline_mode = #tpu.pipeline_mode<synchronous>, transform_indices = @transform_3, window_bounds = array<i64: 144, 4>}, {pipeline_mode = #tpu.pipeline_mode<synchronous>, transform_indices = @transform_4, window_bounds = array<i64: 1, 4>}, {pipeline_mode = #tpu.pipeline_mode<synchronous>, transform_indices = @transform_5, window_bounds = array<i64: 64, 32>}, {pipeline_mode = #tpu.pipeline_mode<synchronous>, transform_indices = @transform_6, window_bounds = array<i64: 1, 32>}, {pipeline_mode = #tpu.pipeline_mode<synchronous>, transform_indices = @transform_7, window_bounds = array<i64: 32, 3>}, {pipeline_mode = #tpu.pipeline_mode<synchronous>, transform_indices = @transform_8, window_bounds = array<i64: 1, 3>}, {transform_indices = @transform_9, window_bounds = array<i64: 1, 1, 3>}]} {
    %c0 = arith.constant 0 : index
    %c0_0 = arith.constant 0 : index
    %c0_1 = arith.constant 0 : index
    %c0_2 = arith.constant 0 : index
    %0 = vector.load %arg1[%c0, %c0_0, %c0_1, %c0_2] : memref<1x16x16x3xf32, #tpu.memory_space<vmem>>, vector<1x16x16x3xf32>
    %1 = vector.shape_cast %0 : vector<1x16x16x3xf32> to vector<16x16x3xf32>
    %cst = arith.constant 0.000000e+00 : f32
    %2 = vector.broadcast %cst : f32 to vector<16x1x3xf32>
    %cst_3 = arith.constant 0.000000e+00 : f32
    %3 = vector.broadcast %cst_3 : f32 to vector<1x18x3xf32>
    %4 = tpu.concatenate %2, %1, %2 in 1 : vector<16x1x3xf32>, vector<16x16x3xf32>, vector<16x1x3xf32> -> vector<16x18x3xf32>
    %5 = tpu.concatenate %3, %4, %3 in 0 : vector<1x18x3xf32>, vector<16x18x3xf32>, vector<1x18x3xf32> -> vector<18x18x3xf32>
    %6 = vector.extract_strided_slice %5 {offsets = [0, 0, 0], sizes = [16, 16, 3], strides = [1, 1, 1]} : vector<18x18x3xf32> to vector<16x16x3xf32>
    %7 = vector.shape_cast %6 : vector<16x16x3xf32> to vector<256x3xf32>
    %8 = vector.extract_strided_slice %5 {offsets = [0, 1, 0], sizes = [16, 16, 3], strides = [1, 1, 1]} : vector<18x18x3xf32> to vector<16x16x3xf32>
    %9 = vector.shape_cast %8 : vector<16x16x3xf32> to vector<256x3xf32>
    %10 = vector.extract_strided_slice %5 {offsets = [0, 2, 0], sizes = [16, 16, 3], strides = [1, 1, 1]} : vector<18x18x3xf32> to vector<16x16x3xf32>
    %11 = vector.shape_cast %10 : vector<16x16x3xf32> to vector<256x3xf32>
    %12 = vector.extract_strided_slice %5 {offsets = [1, 0, 0], sizes = [16, 16, 3], strides = [1, 1, 1]} : vector<18x18x3xf32> to vector<16x16x3xf32>
    %13 = vector.shape_cast %12 : vector<16x16x3xf32> to vector<256x3xf32>
    %14 = vector.extract_strided_slice %5 {offsets = [1, 1, 0], sizes = [16, 16, 3], strides = [1, 1, 1]} : vector<18x18x3xf32> to vector<16x16x3xf32>
    %15 = vector.shape_cast %14 : vector<16x16x3xf32> to vector<256x3xf32>
    %16 = vector.extract_strided_slice %5 {offsets = [1, 2, 0], sizes = [16, 16, 3], strides = [1, 1, 1]} : vector<18x18x3xf32> to vector<16x16x3xf32>
    %17 = vector.shape_cast %16 : vector<16x16x3xf32> to vector<256x3xf32>
    %18 = vector.extract_strided_slice %5 {offsets = [2, 0, 0], sizes = [16, 16, 3], strides = [1, 1, 1]} : vector<18x18x3xf32> to vector<16x16x3xf32>
    %19 = vector.shape_cast %18 : vector<16x16x3xf32> to vector<256x3xf32>
    %20 = vector.extract_strided_slice %5 {offsets = [2, 1, 0], sizes = [16, 16, 3], strides = [1, 1, 1]} : vector<18x18x3xf32> to vector<16x16x3xf32>
    %21 = vector.shape_cast %20 : vector<16x16x3xf32> to vector<256x3xf32>
    %22 = vector.extract_strided_slice %5 {offsets = [2, 2, 0], sizes = [16, 16, 3], strides = [1, 1, 1]} : vector<18x18x3xf32> to vector<16x16x3xf32>
    %23 = vector.shape_cast %22 : vector<16x16x3xf32> to vector<256x3xf32>
    %24 = tpu.concatenate %7, %9, %11, %13, %15, %17, %19, %21, %23 in 1 : vector<256x3xf32>, vector<256x3xf32>, vector<256x3xf32>, vector<256x3xf32>, vector<256x3xf32>, vector<256x3xf32>, vector<256x3xf32>, vector<256x3xf32>, vector<256x3xf32> -> vector<256x27xf32>
    %c0_4 = arith.constant 0 : index
    %c0_5 = arith.constant 0 : index
    %25 = vector.load %arg2[%c0_4, %c0_5] : memref<27x16xf32, #tpu.memory_space<vmem>>, vector<27x16xf32>
    %cst_6 = arith.constant dense<0.000000e+00> : vector<256x16xf32>
    %26 = tpu.matmul %24, %25, %cst_6 {dimension_numbers = #tpu.dot_dimension_numbers<[1], [0], [0], [1], [0, 0, 1, 1], [], []>} : vector<256x27xf32>, vector<27x16xf32>, vector<256x16xf32> -> vector<256x16xf32>
    %c0_7 = arith.constant 0 : index
    %c0_8 = arith.constant 0 : index
    %27 = vector.load %arg3[%c0_7, %c0_8] : memref<1x16xf32, #tpu.memory_space<vmem>>, vector<1x16xf32>
    %28 = vector.broadcast %27 : vector<1x16xf32> to vector<256x16xf32>
    %29 = arith.addf %26, %28 : vector<256x16xf32>
    %cst_9 = arith.constant 0.000000e+00 : f32
    %30 = vector.broadcast %cst_9 : f32 to vector<256x16xf32>
    %31 = arith.maximumf %29, %30 : vector<256x16xf32>
    %32 = vector.shape_cast %31 : vector<256x16xf32> to vector<16x16x16xf32>
    %33 = vector.shape_cast %32 : vector<16x16x16xf32> to vector<8x2x16x16xf32>
    %cst_10 = arith.constant dense<0xFF800000> : vector<8x16x16xf32>
    %34 = vector.multi_reduction <maximumf>, %33, %cst_10 [1] : vector<8x2x16x16xf32> to vector<8x16x16xf32>
    %35 = vector.shape_cast %34 : vector<8x16x16xf32> to vector<8x8x2x16xf32>
    %cst_11 = arith.constant dense<0xFF800000> : vector<8x8x16xf32>
    %36 = vector.multi_reduction <maximumf>, %35, %cst_11 [2] : vector<8x8x2x16xf32> to vector<8x8x16xf32>
    %cst_12 = arith.constant 0.000000e+00 : f32
    %37 = vector.broadcast %cst_12 : f32 to vector<8x1x16xf32>
    %cst_13 = arith.constant 0.000000e+00 : f32
    %38 = vector.broadcast %cst_13 : f32 to vector<1x10x16xf32>
    %39 = tpu.concatenate %37, %36, %37 in 1 : vector<8x1x16xf32>, vector<8x8x16xf32>, vector<8x1x16xf32> -> vector<8x10x16xf32>
    %40 = tpu.concatenate %38, %39, %38 in 0 : vector<1x10x16xf32>, vector<8x10x16xf32>, vector<1x10x16xf32> -> vector<10x10x16xf32>
    %41 = vector.extract_strided_slice %40 {offsets = [0, 0, 0], sizes = [8, 8, 16], strides = [1, 1, 1]} : vector<10x10x16xf32> to vector<8x8x16xf32>
    %42 = vector.shape_cast %41 : vector<8x8x16xf32> to vector<64x16xf32>
    %43 = vector.extract_strided_slice %40 {offsets = [0, 1, 0], sizes = [8, 8, 16], strides = [1, 1, 1]} : vector<10x10x16xf32> to vector<8x8x16xf32>
    %44 = vector.shape_cast %43 : vector<8x8x16xf32> to vector<64x16xf32>
    %45 = vector.extract_strided_slice %40 {offsets = [0, 2, 0], sizes = [8, 8, 16], strides = [1, 1, 1]} : vector<10x10x16xf32> to vector<8x8x16xf32>
    %46 = vector.shape_cast %45 : vector<8x8x16xf32> to vector<64x16xf32>
    %47 = vector.extract_strided_slice %40 {offsets = [1, 0, 0], sizes = [8, 8, 16], strides = [1, 1, 1]} : vector<10x10x16xf32> to vector<8x8x16xf32>
    %48 = vector.shape_cast %47 : vector<8x8x16xf32> to vector<64x16xf32>
    %49 = vector.extract_strided_slice %40 {offsets = [1, 1, 0], sizes = [8, 8, 16], strides = [1, 1, 1]} : vector<10x10x16xf32> to vector<8x8x16xf32>
    %50 = vector.shape_cast %49 : vector<8x8x16xf32> to vector<64x16xf32>
    %51 = vector.extract_strided_slice %40 {offsets = [1, 2, 0], sizes = [8, 8, 16], strides = [1, 1, 1]} : vector<10x10x16xf32> to vector<8x8x16xf32>
    %52 = vector.shape_cast %51 : vector<8x8x16xf32> to vector<64x16xf32>
    %53 = vector.extract_strided_slice %40 {offsets = [2, 0, 0], sizes = [8, 8, 16], strides = [1, 1, 1]} : vector<10x10x16xf32> to vector<8x8x16xf32>
    %54 = vector.shape_cast %53 : vector<8x8x16xf32> to vector<64x16xf32>
    %55 = vector.extract_strided_slice %40 {offsets = [2, 1, 0], sizes = [8, 8, 16], strides = [1, 1, 1]} : vector<10x10x16xf32> to vector<8x8x16xf32>
    %56 = vector.shape_cast %55 : vector<8x8x16xf32> to vector<64x16xf32>
    %57 = vector.extract_strided_slice %40 {offsets = [2, 2, 0], sizes = [8, 8, 16], strides = [1, 1, 1]} : vector<10x10x16xf32> to vector<8x8x16xf32>
    %58 = vector.shape_cast %57 : vector<8x8x16xf32> to vector<64x16xf32>
    %59 = tpu.concatenate %42, %44, %46, %48, %50, %52, %54, %56, %58 in 1 : vector<64x16xf32>, vector<64x16xf32>, vector<64x16xf32>, vector<64x16xf32>, vector<64x16xf32>, vector<64x16xf32>, vector<64x16xf32>, vector<64x16xf32>, vector<64x16xf32> -> vector<64x144xf32>
    %c0_14 = arith.constant 0 : index
    %c0_15 = arith.constant 0 : index
    %60 = vector.load %arg4[%c0_14, %c0_15] : memref<144x4xf32, #tpu.memory_space<vmem>>, vector<144x4xf32>
    %cst_16 = arith.constant dense<0.000000e+00> : vector<64x4xf32>
    %61 = tpu.matmul %59, %60, %cst_16 {dimension_numbers = #tpu.dot_dimension_numbers<[1], [0], [0], [1], [0, 0, 1, 1], [], []>} : vector<64x144xf32>, vector<144x4xf32>, vector<64x4xf32> -> vector<64x4xf32>
    %c0_17 = arith.constant 0 : index
    %c0_18 = arith.constant 0 : index
    %62 = vector.load %arg5[%c0_17, %c0_18] : memref<1x4xf32, #tpu.memory_space<vmem>>, vector<1x4xf32>
    %63 = vector.broadcast %62 : vector<1x4xf32> to vector<64x4xf32>
    %64 = arith.addf %61, %63 : vector<64x4xf32>
    %cst_19 = arith.constant 0.000000e+00 : f32
    %65 = vector.broadcast %cst_19 : f32 to vector<64x4xf32>
    %66 = arith.maximumf %64, %65 : vector<64x4xf32>
    %67 = vector.shape_cast %66 : vector<64x4xf32> to vector<8x8x4xf32>
    %68 = vector.shape_cast %67 : vector<8x8x4xf32> to vector<4x2x8x4xf32>
    %cst_20 = arith.constant dense<0xFF800000> : vector<4x8x4xf32>
    %69 = vector.multi_reduction <maximumf>, %68, %cst_20 [1] : vector<4x2x8x4xf32> to vector<4x8x4xf32>
    %70 = vector.shape_cast %69 : vector<4x8x4xf32> to vector<4x4x2x4xf32>
    %cst_21 = arith.constant dense<0xFF800000> : vector<4x4x4xf32>
    %71 = vector.multi_reduction <maximumf>, %70, %cst_21 [2] : vector<4x4x2x4xf32> to vector<4x4x4xf32>
    %72 = vector.extract_strided_slice %71 {offsets = [0, 0, 0], sizes = [1, 4, 4], strides = [1, 1, 1]} : vector<4x4x4xf32> to vector<1x4x4xf32>
    %73 = vector.shape_cast %72 : vector<1x4x4xf32> to vector<4x4xf32>
    %74 = vector.extract_strided_slice %73 {offsets = [0, 0], sizes = [1, 4], strides = [1, 1]} : vector<4x4xf32> to vector<1x4xf32>
    %75 = vector.extract_strided_slice %71 {offsets = [0, 0, 0], sizes = [1, 4, 4], strides = [1, 1, 1]} : vector<4x4x4xf32> to vector<1x4x4xf32>
    %76 = vector.shape_cast %75 : vector<1x4x4xf32> to vector<4x4xf32>
    %77 = vector.extract_strided_slice %76 {offsets = [1, 0], sizes = [1, 4], strides = [1, 1]} : vector<4x4xf32> to vector<1x4xf32>
    %78 = vector.extract_strided_slice %71 {offsets = [0, 0, 0], sizes = [1, 4, 4], strides = [1, 1, 1]} : vector<4x4x4xf32> to vector<1x4x4xf32>
    %79 = vector.shape_cast %78 : vector<1x4x4xf32> to vector<4x4xf32>
    %80 = vector.extract_strided_slice %79 {offsets = [2, 0], sizes = [1, 4], strides = [1, 1]} : vector<4x4xf32> to vector<1x4xf32>
    %81 = vector.extract_strided_slice %71 {offsets = [0, 0, 0], sizes = [1, 4, 4], strides = [1, 1, 1]} : vector<4x4x4xf32> to vector<1x4x4xf32>
    %82 = vector.shape_cast %81 : vector<1x4x4xf32> to vector<4x4xf32>
    %83 = vector.extract_strided_slice %82 {offsets = [3, 0], sizes = [1, 4], strides = [1, 1]} : vector<4x4xf32> to vector<1x4xf32>
    %84 = vector.extract_strided_slice %71 {offsets = [1, 0, 0], sizes = [1, 4, 4], strides = [1, 1, 1]} : vector<4x4x4xf32> to vector<1x4x4xf32>
    %85 = vector.shape_cast %84 : vector<1x4x4xf32> to vector<4x4xf32>
    %86 = vector.extract_strided_slice %85 {offsets = [0, 0], sizes = [1, 4], strides = [1, 1]} : vector<4x4xf32> to vector<1x4xf32>
    %87 = vector.extract_strided_slice %71 {offsets = [1, 0, 0], sizes = [1, 4, 4], strides = [1, 1, 1]} : vector<4x4x4xf32> to vector<1x4x4xf32>
    %88 = vector.shape_cast %87 : vector<1x4x4xf32> to vector<4x4xf32>
    %89 = vector.extract_strided_slice %88 {offsets = [1, 0], sizes = [1, 4], strides = [1, 1]} : vector<4x4xf32> to vector<1x4xf32>
    %90 = vector.extract_strided_slice %71 {offsets = [1, 0, 0], sizes = [1, 4, 4], strides = [1, 1, 1]} : vector<4x4x4xf32> to vector<1x4x4xf32>
    %91 = vector.shape_cast %90 : vector<1x4x4xf32> to vector<4x4xf32>
    %92 = vector.extract_strided_slice %91 {offsets = [2, 0], sizes = [1, 4], strides = [1, 1]} : vector<4x4xf32> to vector<1x4xf32>
    %93 = vector.extract_strided_slice %71 {offsets = [1, 0, 0], sizes = [1, 4, 4], strides = [1, 1, 1]} : vector<4x4x4xf32> to vector<1x4x4xf32>
    %94 = vector.shape_cast %93 : vector<1x4x4xf32> to vector<4x4xf32>
    %95 = vector.extract_strided_slice %94 {offsets = [3, 0], sizes = [1, 4], strides = [1, 1]} : vector<4x4xf32> to vector<1x4xf32>
    %96 = vector.extract_strided_slice %71 {offsets = [2, 0, 0], sizes = [1, 4, 4], strides = [1, 1, 1]} : vector<4x4x4xf32> to vector<1x4x4xf32>
    %97 = vector.shape_cast %96 : vector<1x4x4xf32> to vector<4x4xf32>
    %98 = vector.extract_strided_slice %97 {offsets = [0, 0], sizes = [1, 4], strides = [1, 1]} : vector<4x4xf32> to vector<1x4xf32>
    %99 = vector.extract_strided_slice %71 {offsets = [2, 0, 0], sizes = [1, 4, 4], strides = [1, 1, 1]} : vector<4x4x4xf32> to vector<1x4x4xf32>
    %100 = vector.shape_cast %99 : vector<1x4x4xf32> to vector<4x4xf32>
    %101 = vector.extract_strided_slice %100 {offsets = [1, 0], sizes = [1, 4], strides = [1, 1]} : vector<4x4xf32> to vector<1x4xf32>
    %102 = vector.extract_strided_slice %71 {offsets = [2, 0, 0], sizes = [1, 4, 4], strides = [1, 1, 1]} : vector<4x4x4xf32> to vector<1x4x4xf32>
    %103 = vector.shape_cast %102 : vector<1x4x4xf32> to vector<4x4xf32>
    %104 = vector.extract_strided_slice %103 {offsets = [2, 0], sizes = [1, 4], strides = [1, 1]} : vector<4x4xf32> to vector<1x4xf32>
    %105 = vector.extract_strided_slice %71 {offsets = [2, 0, 0], sizes = [1, 4, 4], strides = [1, 1, 1]} : vector<4x4x4xf32> to vector<1x4x4xf32>
    %106 = vector.shape_cast %105 : vector<1x4x4xf32> to vector<4x4xf32>
    %107 = vector.extract_strided_slice %106 {offsets = [3, 0], sizes = [1, 4], strides = [1, 1]} : vector<4x4xf32> to vector<1x4xf32>
    %108 = vector.extract_strided_slice %71 {offsets = [3, 0, 0], sizes = [1, 4, 4], strides = [1, 1, 1]} : vector<4x4x4xf32> to vector<1x4x4xf32>
    %109 = vector.shape_cast %108 : vector<1x4x4xf32> to vector<4x4xf32>
    %110 = vector.extract_strided_slice %109 {offsets = [0, 0], sizes = [1, 4], strides = [1, 1]} : vector<4x4xf32> to vector<1x4xf32>
    %111 = vector.extract_strided_slice %71 {offsets = [3, 0, 0], sizes = [1, 4, 4], strides = [1, 1, 1]} : vector<4x4x4xf32> to vector<1x4x4xf32>
    %112 = vector.shape_cast %111 : vector<1x4x4xf32> to vector<4x4xf32>
    %113 = vector.extract_strided_slice %112 {offsets = [1, 0], sizes = [1, 4], strides = [1, 1]} : vector<4x4xf32> to vector<1x4xf32>
    %114 = vector.extract_strided_slice %71 {offsets = [3, 0, 0], sizes = [1, 4, 4], strides = [1, 1, 1]} : vector<4x4x4xf32> to vector<1x4x4xf32>
    %115 = vector.shape_cast %114 : vector<1x4x4xf32> to vector<4x4xf32>
    %116 = vector.extract_strided_slice %115 {offsets = [2, 0], sizes = [1, 4], strides = [1, 1]} : vector<4x4xf32> to vector<1x4xf32>
    %117 = vector.extract_strided_slice %71 {offsets = [3, 0, 0], sizes = [1, 4, 4], strides = [1, 1, 1]} : vector<4x4x4xf32> to vector<1x4x4xf32>
    %118 = vector.shape_cast %117 : vector<1x4x4xf32> to vector<4x4xf32>
    %119 = vector.extract_strided_slice %118 {offsets = [3, 0], sizes = [1, 4], strides = [1, 1]} : vector<4x4xf32> to vector<1x4xf32>
    %120 = tpu.concatenate %74, %77, %80, %83, %86, %89, %92, %95, %98, %101, %104, %107, %110, %113, %116, %119 in 1 : vector<1x4xf32>, vector<1x4xf32>, vector<1x4xf32>, vector<1x4xf32>, vector<1x4xf32>, vector<1x4xf32>, vector<1x4xf32>, vector<1x4xf32>, vector<1x4xf32>, vector<1x4xf32>, vector<1x4xf32>, vector<1x4xf32>, vector<1x4xf32>, vector<1x4xf32>, vector<1x4xf32>, vector<1x4xf32> -> vector<1x64xf32>
    %c0_22 = arith.constant 0 : index
    %c0_23 = arith.constant 0 : index
    %121 = vector.load %arg6[%c0_22, %c0_23] : memref<64x32xf32, #tpu.memory_space<vmem>>, vector<64x32xf32>
    %cst_24 = arith.constant dense<0.000000e+00> : vector<1x32xf32>
    %122 = tpu.matmul %120, %121, %cst_24 {dimension_numbers = #tpu.dot_dimension_numbers<[1], [0], [0], [1], [0, 0, 1, 1], [], []>} : vector<1x64xf32>, vector<64x32xf32>, vector<1x32xf32> -> vector<1x32xf32>
    %c0_25 = arith.constant 0 : index
    %c0_26 = arith.constant 0 : index
    %123 = vector.load %arg7[%c0_25, %c0_26] : memref<1x32xf32, #tpu.memory_space<vmem>>, vector<1x32xf32>
    %124 = arith.addf %122, %123 : vector<1x32xf32>
    %cst_27 = arith.constant 0.000000e+00 : f32
    %125 = vector.broadcast %cst_27 : f32 to vector<1x32xf32>
    %126 = arith.maximumf %124, %125 : vector<1x32xf32>
    %c0_28 = arith.constant 0 : index
    %c0_29 = arith.constant 0 : index
    %127 = vector.load %arg8[%c0_28, %c0_29] : memref<32x3xf32, #tpu.memory_space<vmem>>, vector<32x3xf32>
    %cst_30 = arith.constant dense<0.000000e+00> : vector<1x3xf32>
    %128 = tpu.matmul %126, %127, %cst_30 {dimension_numbers = #tpu.dot_dimension_numbers<[1], [0], [0], [1], [0, 0, 1, 1], [], []>} : vector<1x32xf32>, vector<32x3xf32>, vector<1x3xf32> -> vector<1x3xf32>
    %c0_31 = arith.constant 0 : index
    %c0_32 = arith.constant 0 : index
    %129 = vector.load %arg9[%c0_31, %c0_32] : memref<1x3xf32, #tpu.memory_space<vmem>>, vector<1x3xf32>
    %130 = arith.addf %128, %129 : vector<1x3xf32>
    %c0_33 = arith.constant 0 : index
    %c0_34 = arith.constant 0 : index
    %c0_35 = arith.constant 0 : index
    %131 = vector.load %arg10[%c0_33, %c0_34, %c0_35] : memref<1x1x3xf32, #tpu.memory_space<vmem>>, vector<1x1x3xf32>
    %132 = vector.shape_cast %131 : vector<1x1x3xf32> to vector<1x3xf32>
    %133 = vector.shape_cast %130 : vector<1x3xf32> to vector<1x1x3xf32>
    tpu.vector_store %arg10[%c0_33, %c0_34, %c0_35], %133 {strides = array<i32>} : memref<1x1x3xf32, #tpu.memory_space<vmem>>, vector<1x1x3xf32>,
    return
  }
  func.func @transform_0(%arg0: i32) -> (i32, i32, i32, i32) {
    %c0_i32 = arith.constant 0 : i32
    %c0_i32_0 = arith.constant 0 : i32
    %c0_i32_1 = arith.constant 0 : i32
    %c0_i32_2 = arith.constant 0 : i32
    return %arg0, %c0_i32, %c0_i32_0, %c0_i32_1 : i32, i32, i32, i32
  }
  func.func @transform_1(%arg0: i32) -> (i32, i32) {
    %c0_i32 = arith.constant 0 : i32
    %c0_i32_0 = arith.constant 0 : i32
    %c0_i32_1 = arith.constant 0 : i32
    return %c0_i32, %c0_i32_0 : i32, i32
  }
  func.func @transform_2(%arg0: i32) -> (i32, i32) {
    %c0_i32 = arith.constant 0 : i32
    %c0_i32_0 = arith.constant 0 : i32
    %c0_i32_1 = arith.constant 0 : i32
    return %c0_i32, %c0_i32_0 : i32, i32
  }
  func.func @transform_3(%arg0: i32) -> (i32, i32) {
    %c0_i32 = arith.constant 0 : i32
    %c0_i32_0 = arith.constant 0 : i32
    %c0_i32_1 = arith.constant 0 : i32
    return %c0_i32, %c0_i32_0 : i32, i32
  }
  func.func @transform_4(%arg0: i32) -> (i32, i32) {
    %c0_i32 = arith.constant 0 : i32
    %c0_i32_0 = arith.constant 0 : i32
    %c0_i32_1 = arith.constant 0 : i32
    return %c0_i32, %c0_i32_0 : i32, i32
  }
  func.func @transform_5(%arg0: i32) -> (i32, i32) {
    %c0_i32 = arith.constant 0 : i32
    %c0_i32_0 = arith.constant 0 : i32
    %c0_i32_1 = arith.constant 0 : i32
    return %c0_i32, %c0_i32_0 : i32, i32
  }
  func.func @transform_6(%arg0: i32) -> (i32, i32) {
    %c0_i32 = arith.constant 0 : i32
    %c0_i32_0 = arith.constant 0 : i32
    %c0_i32_1 = arith.constant 0 : i32
    return %c0_i32, %c0_i32_0 : i32, i32
  }
  func.func @transform_7(%arg0: i32) -> (i32, i32) {
    %c0_i32 = arith.constant 0 : i32
    %c0_i32_0 = arith.constant 0 : i32
    %c0_i32_1 = arith.constant 0 : i32
    return %c0_i32, %c0_i32_0 : i32, i32
  }
  func.func @transform_8(%arg0: i32) -> (i32, i32) {
    %c0_i32 = arith.constant 0 : i32
    %c0_i32_0 = arith.constant 0 : i32
    %c0_i32_1 = arith.constant 0 : i32
    return %c0_i32, %c0_i32_0 : i32, i32
  }
  func.func @transform_9(%arg0: i32) -> (i32, i32, i32) {
    %c0_i32 = arith.constant 0 : i32
    %c0_i32_0 = arith.constant 0 : i32
    %c0_i32_1 = arith.constant 0 : i32
    return %arg0, %c0_i32, %c0_i32_0 : i32, i32, i32
  }
}

</mosaic_0001>

<bundles_post_ra>
// kernel: convolutional_model_forward.1
= control target key start
LH: loop header
LB: loop body
LE: loop exit
PB: predicated region body
PF: predicated region fallthrough
CT: control target
= control target key end

     0   :  { %14 = vsyncpa [#allocation3], 0  ;;  %s6824_s0 = inlined_call_operand.vmem [shape: f32[2,16,16,3], index: 0, kind: input, shape index: {}]   ;;  %s6825_s1 = inlined_call_operand.vmem [shape: f32[27,16], index: 1, kind: input, shape index: {}]   ;;  %s6826_s2 = inlined_call_operand.vmem [shape: f32[1,16], index: 2, kind: input, shape index: {}]   ;;  %s6827_s3 = inlined_call_operand.vmem [shape: f32[144,4], index: 3, kind: input, shape index: {}]   ;;  %s6828_s4 = inlined_call_operand.vmem [shape: f32[1,4], index: 4, kind: input, shape index: {}]   ;;  %s6829_s5 = inlined_call_operand.vmem [shape: f32[64,32], index: 5, kind: input, shape index: {}]   ;;  %s6830_s6 = inlined_call_operand.vmem [shape: f32[1,32], index: 6, kind: input, shape index: {}]   ;;  %s6831_s7 = inlined_call_operand.vmem [shape: f32[32,3], index: 7, kind: input, shape index: {}]   ;;  %s6832_s8 = inlined_call_operand.vmem [shape: f32[1,3], index: 8, kind: input, shape index: {}]   ;;  %s6833_s9 = inlined_call_operand.hbm [shape: f32[2,1,3], index: 9, kind: output, shape index: {}]  }
   0x1   :  { %16 = vsyncpa [#allocation3 + $0x1], 0  ;;  %s4669_s30 = smov 0   ;;  %s4671_s10 = smov 0  }
   0x2   :  { %s4673_s11 = smov 0   ;;  %s4675_s12 = smov 0  }
   0x3 LB: > { %s4690_s13 = sadd.s32 4294967295, %s4586_s12   ;;  %s4082_s14 = sadd.s32 4294967294, %s4586_s12   ;;  %s4586_s12 = sphi %s4675_s12, %s7030_s12   ;;  %s4582_s11 = sphi %s4673_s11, %s7029_s11   ;;  %s4578_s10 = sphi %s4671_s10, %s7028_s10   ;;  %s4574_s30 = sphi %s4669_s30, %s7027_s30  }
   0x4   : > { %s4694_s15 = sadd.s32 1, %s4586_s12   ;;  %s223_s16 = sadd.s32 1, %s4582_s11 }
   0x5   : > { %s220_s17 = ssub.s32 %s4586_s12, %s4694_s15  ;;  %p233_p0 = scmp.ne.s32.totalorder %s4582_s11, %s4578_s10 }
   0x6   : > { %p221_p1 = scmp.eq.s32.totalorder %s220_s17, 0  ;;  %p234_p2 = scmp.eq.s32.totalorder %s4690_s13, 1 }
   0x7   : > { %p239_p3 = scmp.ne.s32.totalorder %s4578_s10, %s4574_s30  ;;  %p240_p4 = scmp.eq.s32.totalorder %s4082_s14, 1 }
   0x8   : > { %s4705_s18 = scalar_select %p221_p1, %s4582_s11, %s223_s16  }
   0x9   : > { %p4707_p5 = por %p234_p2, %p233_p0  ;;  %p4711_p6 = por %p240_p4, %p239_p3 }
   0xa   : > { %p4085_p7 = scmp.ge.s32.totalorder %s4586_s12, 1  ;;  %p290_p8 = scmp.lt.s32.totalorder %s4586_s12, 3 }
   0xc   : > { %p291_p9 = pnand %p4085_p7, %p290_p8 }
   0xd   : > { %v6836_v0 = vmov (!%p291_p9), 0.0   ;;  %p325_p10 = scmp.lt.s32.totalorder (!%p291_p9), %s4690_s13, 1  ;;  %s4589_s21 = smov (!%p291_p9), 3   ;;  %vm394_vm0 = vcmask (!%p291_p9), 1040384   ;;  %vm553_vm1 = vcmask (!%p291_p9), 1046528   ;;  %vm6841_vm2 = vcmask (!%p291_p9), 1045504  }
   0xe   : > { %294 = sbr.rel (%p291_p9) target bundleno = 1831 (0x727), region = 56  ;;  %v4718_v1 = vrot.slane (!%p291_p9), %v6836_v0, 1  ;;  %v4724_v2 = vrot.slane (!%p291_p9), %v6836_v0, 2  ;;  %s6834_s27 = smov (!%p291_p9), 6   ;;  %v1736_v29 = vld [vmem:[%s6825_s1] sm:$0xff] (!%p291_p9)  ;;  %v1737_v30 = vld [vmem:[%s6825_s1 + $0x8] sm:$0xff] (!%p291_p9) }
   0xf   : > { %s4591_s28 = smov (!%p291_p9), 9   ;;  %s6850_s29 = smov (!%p291_p9), 12   ;;  %v4273_v31 = vpack.c.bf16 (!%p291_p9), %v1737_v30, %v1736_v29  ;;  %v1738_v34 = vld [vmem:[%s6825_s1 + $0x10] sm:$0xff] (!%p291_p9)  ;;  %v1739_v35 = vld [vmem:[%s6825_s1 + $0x18] sm:$0x7] (!%p291_p9)  ;;  %vm1844_vm3 = vcmask (!%p291_p9), 1042432  }
  0x10   : > { %721 = vrot.lane.b32.xlu0 (!%p291_p9), %v4718_v1, %s4589_s21  ;;  %s4593_s14 = smov (!%p291_p9), 15   ;;  %s4594_s16 = smov (!%p291_p9), 18   ;;  %v4277_v36 = vpack.c.bf16 (!%p291_p9), %v1739_v35, %v1738_v34  ;;  %vm4595_vm4 = vmmov (!%p291_p9), 1   ;;  %vm1474_vm6 = vcmask (!%p291_p9), 23552   ;;  %vm6848_vm7 = vcmask (!%p291_p9), 48128  }
  0x11   : > { %4274 = vmatprep.subr.bf16.mxu0 (!%p291_p9), %v4273_v31  ;;  %vm4278_vm5 = vmpackc.low (!%p291_p9), %vm1844_vm3, %vm4595_vm4  ;;  %s6856_s24 = smov (!%p291_p9), 6   ;;  %vm6847_vm8 = vcmask (!%p291_p9), 72704   ;;  %vm1571_vm9 = vcmask (!%p291_p9), 97280   ;;  %vm1604_vm10 = vcmask (!%p291_p9), 121856   ;;  %vm1637_vm11 = vcmask (!%p291_p9), 146432   ;;  %s4611_s17 = smov (!%p291_p9), 36  }
  0x12   : > { %4276 = vmatpush3.bf16.msra.mxu0 (!%p291_p9), %v4273_v31  ;;  %vm1670_vm12 = vcmask (!%p291_p9), 171008   ;;  %vm6853_vm13 = vcmask (!%p291_p9), 195584   ;;  %vm1747_vm14 = vcmask (!%p291_p9), 220160   ;;  %vm6839_vm15 = vcmask (!%p291_p9), 130048  }
  0x13   : > { %4279 = vmatprep.subr.msk.bf16.mxu0 (!%p291_p9), %vm4278_vm5, %v4277_v36  ;;  %vm6840_vm3 = vcmask (!%p291_p9), 123904   ;;  %vm6842_vm4 = vcmask (!%p291_p9), 1042434  }
  0x14   : > { %814 = vrot.lane.b32.xlu0 (!%p291_p9), %v4724_v2, %s6834_s27 }
  0x15   : > { %s326_s22 = scalar_select %p325_p10, %s4690_s13, 1 }
  0x16   : > { %4282 = vmatpush3.bf16.msk.msra.mxu0 %vm4278_vm5, %v4277_v36  ;;  %vm3021_vm5 = vcmask 1043459  }
  0x17   : > { %s4136_s23 = sshll.u32 %s326_s22, 8  ;;  %s4609_s22 = smov 20  }
  0x18   : > { %s4730_s26 = scalar_lea.vmem %s6824_s0, %s4136_s23  ;;  %s4596_s23 = smov 21  }
  0x19   : > { %v330_v3 = vld [vmem:[%s4730_s26] sm:$0xff]  ;;  %v331_v4 = vld [vmem:[%s4730_s26 + $0x8] sm:$0xff]  ;;  %v332_v19 = vld [vmem:[%s4730_s26 + $0x10] sm:$0xff] }
  0x1a   : > { %v395_v5 = vrot.slane %v330_v3, 7  ;;  %v396_v6 = vrot.slane %v331_v4, 7  ;;  %v398_v21 = vrot.slane %v332_v19, 7  ;;  %v333_v22 = vld [vmem:[%s4730_s26 + $0x18] sm:$0xff]  ;;  %v334_v43 = vld [vmem:[%s4730_s26 + $0x20] sm:$0xff]  ;;  %v335_v45 = vld [vmem:[%s4730_s26 + $0x28] sm:$0xff] }
  0x1b   : > { %v399_v23 = vrot.slane %v333_v22, 7  ;;  %v401_v44 = vrot.slane %v334_v43, 7  ;;  %v402_v46 = vrot.slane %v335_v45, 7  ;;  %v336_v60 = vld [vmem:[%s4730_s26 + $0x30] sm:$0xff]  ;;  %v337_v62 = vld [vmem:[%s4730_s26 + $0x38] sm:$0xff]  ;;  %v338_v19 = vld [vmem:[%s4730_s26 + $0x40] sm:$0xff] }
  0x1c   : > { %v4737_v7 = vsel %vm394_vm0, 0.0, %v395_v5  ;;  %v4740_v8 = vsel %vm394_vm0, %v395_v5, %v396_v6  ;;  %v506_v9 = vsel %vm394_vm0, %v396_v6, 0.0  ;;  %v4765_v24 = vsel %vm394_vm0, 0.0, %v398_v21 }
  0x1d   : > { %907 = vrot.lane.b32.xlu1 %v4737_v7, %s4591_s28  ;;  %v556_v10 = vrot.slane %v4737_v7, 1  ;;  %v557_v11 = vrot.slane %v4740_v8, 1  ;;  %v559_v12 = vrot.slane %v506_v9, 1  ;;  %v634_v15 = vrot.slane %v4737_v7, 2 }
  0x1e   : > { %v635_v16 = vrot.slane %v4740_v8, 2  ;;  %v637_v17 = vrot.slane %v506_v9, 2  ;;  %v4771_v25 = vsel %vm394_vm0, %v398_v21, %v399_v23  ;;  %v561_v26 = vrot.slane %v4765_v24, 1  ;;  %v339_v21 = vld [vmem:[%s4730_s26 + $0x48] sm:$0xff] }
  0x1f   : > { %v558_v13 = vsel %vm553_vm1, %v556_v10, %v557_v11  ;;  %v560_v14 = vsel %vm553_vm1, %v557_v11, %v559_v12  ;;  %v562_v27 = vrot.slane %v4771_v25, 1  ;;  %v507_v28 = vsel %vm394_vm0, %v399_v23, 0.0 }
  0x20   : > { %1003 = vrot.lane.b32.xlu0 %v558_v13, %s6850_s29  ;;  %v636_v18 = vsel %vm6841_vm2, %v634_v15, %v635_v16  ;;  %v638_v20 = vsel %vm6841_vm2, %v635_v16, %v637_v17  ;;  %v564_v32 = vrot.slane %v507_v28, 1  ;;  %v639_v38 = vrot.slane %v4765_v24, 2 }
  0x21   : > { %909 = vrot.lane.b32.xlu1 %v4740_v8, %s4591_s28  ;;  %v563_v33 = vsel %vm553_vm1, %v561_v26, %v562_v27  ;;  %v640_v39 = vrot.slane %v4771_v25, 2  ;;  %v642_v41 = vrot.slane %v507_v28, 2  ;;  %v4814_v47 = vsel %vm394_vm0, 0.0, %v401_v44 }
  0x22   : > { %v565_v37 = vsel %vm553_vm1, %v562_v27, %v564_v32  ;;  %v4820_v48 = vsel %vm394_vm0, %v401_v44, %v402_v46  ;;  %v566_v49 = vrot.slane %v4814_v47, 1  ;;  %v508_v51 = vsel %vm394_vm0, %v402_v46, 0.0 }
  0x23   : > { %v641_v40 = vsel %vm6841_vm2, %v639_v38, %v640_v39  ;;  %v643_v42 = vsel %vm6841_vm2, %v640_v39, %v642_v41  ;;  %v567_v50 = vrot.slane %v4820_v48, 1  ;;  %v569_v52 = vrot.slane %v508_v51, 1 }
  0x24   : > { %1005 = vrot.lane.b32.xlu0 %v560_v14, %s6850_s29  ;;  %v644_v55 = vrot.slane %v4814_v47, 2  ;;  %v645_v56 = vrot.slane %v4820_v48, 2  ;;  %v647_v58 = vrot.slane %v508_v51, 2  ;;  %v404_v61 = vrot.slane %v336_v60, 7 }
  0x25   : > { %723 = vrot.lane.b32.xlu1 %v558_v13, %s4589_s21  ;;  %v568_v53 = vsel %vm553_vm1, %v566_v49, %v567_v50  ;;  %v570_v54 = vsel %vm553_vm1, %v567_v50, %v569_v52  ;;  %v405_v63 = vrot.slane %v337_v62, 7  ;;  %v408_v23 = vrot.slane %v339_v21, 7 }
  0x26   : > { %v646_v57 = vsel %vm6841_vm2, %v644_v55, %v645_v56  ;;  %v648_v59 = vsel %vm6841_vm2, %v645_v56, %v647_v58  ;;  %v4851_v3 = vsel %vm394_vm0, 0.0, %v404_v61  ;;  %v341_v58 = vld [vmem:[%s4730_s26 + $0x58] sm:$0xff] }
  0x27   : > { %v4857_v4 = vsel %vm394_vm0, %v404_v61, %v405_v63  ;;  %v571_v5 = vrot.slane %v4851_v3, 1  ;;  %v509_v9 = vsel %vm394_vm0, %v405_v63, 0.0  ;;  %v649_v13 = vrot.slane %v4851_v3, 2 }
  0x28   : > { %725 = vrot.lane.b32.xlu0 %v560_v14, %s4589_s21  ;;  %v572_v6 = vrot.slane %v4857_v4, 1  ;;  %v574_v10 = vrot.slane %v509_v9, 1  ;;  %v650_v14 = vrot.slane %v4857_v4, 2  ;;  %v652_v16 = vrot.slane %v509_v9, 2 }
  0x29   : > { %1099 = vrot.lane.b32.xlu1 %v636_v18, %s4593_s14  ;;  %v510_v32 = vsel %vm394_vm0, %v408_v23, 0.0  ;;  %v411_v61 = vrot.slane %v341_v58, 7 }
  0x2a   : > { %v573_v11 = vsel %vm553_vm1, %v571_v5, %v572_v6  ;;  %v575_v12 = vsel %vm553_vm1, %v572_v6, %v574_v10  ;;  %v651_v15 = vsel %vm6841_vm2, %v649_v13, %v650_v14  ;;  %v653_v17 = vsel %vm6841_vm2, %v650_v14, %v652_v16 }
  0x2b   : > { %v579_v34 = vrot.slane %v510_v32, 1  ;;  %v657_v49 = vrot.slane %v510_v32, 2  ;;  %v511_v16 = vsel %vm394_vm0, %v411_v61, 0.0 }
  0x2c   : > { %1101 = vrot.lane.b32.xlu0 %v638_v20, %s4593_s14 }
  0x2d   : > { %816 = vrot.lane.b32.xlu1 %v636_v18, %s6834_s27 }
  0x30   : > { %818 = vrot.lane.b32.xlu0 %v638_v20, %s6834_s27  ;;  %s6849_s27 = smov 24   ;;  %v407_v20 = vrot.slane %v338_v19, 7 }
  0x31   : > { %1195 = vrot.lane.b32.xlu1 %v4765_v24, %s4594_s16 }
  0x32   : > { %v4888_v26 = vsel %vm394_vm0, 0.0, %v407_v20  ;;  %v4894_v28 = vsel %vm394_vm0, %v407_v20, %v408_v23  ;;  %v584_v20 = vrot.slane %v511_v16, 1 }
  0x33   : > { %v576_v30 = vrot.slane %v4888_v26, 1  ;;  %v577_v31 = vrot.slane %v4894_v28, 1  ;;  %v655_v41 = vrot.slane %v4894_v28, 2 }
  0x34   : > { %1197 = vrot.lane.b32.xlu0 %v4771_v25, %s4594_s16 }
  0x35   : > { %911 = vrot.lane.b32.xlu1 %v4765_v24, %s4591_s28  ;;  %v578_v36 = vsel %vm553_vm1, %v576_v30, %v577_v31  ;;  %v580_v38 = vsel %vm553_vm1, %v577_v31, %v579_v34  ;;  %v658_v52 = vsel %vm6841_vm2, %v655_v41, %v657_v49  ;;  %v662_v49 = vrot.slane %v511_v16, 2 }
  0x38   : > { %913 = vrot.lane.b32.xlu0 %v4771_v25, %s4591_s28 }
  0x39   : > { %1288 = vrot.lane.b32.xlu1 %v563_v33, %s4596_s23 }
  0x3c   : > { %1290 = vrot.lane.b32.xlu0 %v565_v37, %s4596_s23 }
  0x3d   : > { %1007 = vrot.lane.b32.xlu1 %v563_v33, %s6850_s29 }
  0x40   : > { %727 = vrot.lane.b32.xlu0 %v563_v33, %s4589_s21 }
  0x41   : > { %1381 = vrot.lane.b32.xlu1 %v641_v40, %s6849_s27 }
  0x44   : > { %1103 = vrot.lane.b32.xlu0 %v641_v40, %s4593_s14 }
  0x45   : > { %1009 = vrot.lane.b32.xlu1 %v565_v37, %s6850_s29 }
  0x48   : > { %729 = vrot.lane.b32.xlu0 %v565_v37, %s4589_s21 }
  0x49   : > { %1383 = vrot.lane.b32.xlu1 %v643_v42, %s6849_s27 }
  0x4c   : > { %1105 = vrot.lane.b32.xlu0 %v643_v42, %s4593_s14 }
  0x4d   : > { %820 = vrot.lane.b32.xlu1 %v641_v40, %s6856_s24  ;;  %v654_v40 = vrot.slane %v4888_v26, 2 }
  0x4f   : > { %v656_v44 = vsel %vm6841_vm2, %v654_v40, %v655_v41 }
  0x50   : > { %822 = vrot.lane.b32.xlu0 %v643_v42, %s6856_s24 }
  0x51   : > { %1199 = vrot.lane.b32.xlu1 %v4814_v47, %s4594_s16 }
  0x54   : > { %1201 = vrot.lane.b32.xlu0 %v4820_v48, %s4594_s16 }
  0x55   : > { %915 = vrot.lane.b32.xlu1 %v4814_v47, %s4591_s28 }
  0x58   : > { %917 = vrot.lane.b32.xlu0 %v4820_v48, %s4591_s28 }
  0x59   : > { %1292 = vrot.lane.b32.xlu1 %v568_v53, %s4596_s23 }
  0x5c   : > { %1294 = vrot.lane.b32.xlu0 %v570_v54, %s4596_s23 }
  0x5d   : > { %1011 = vrot.lane.b32.xlu1 %v568_v53, %s6850_s29 }
  0x60   : > { %731 = vrot.lane.b32.xlu0 %v568_v53, %s4589_s21 }
  0x61   : > { %1385 = vrot.lane.b32.xlu1 %v646_v57, %s6849_s27 }
  0x64   : > { %1107 = vrot.lane.b32.xlu0 %v646_v57, %s4593_s14 }
  0x65   : > { %1013 = vrot.lane.b32.xlu1 %v570_v54, %s6850_s29 }
  0x68   : > { %733 = vrot.lane.b32.xlu0 %v570_v54, %s4589_s21  ;;  %v340_v54 = vld [vmem:[%s4730_s26 + $0x50] sm:$0xff] }
  0x69   : > { %1387 = vrot.lane.b32.xlu1 %v648_v59, %s6849_s27 }
  0x6c   : > { %1109 = vrot.lane.b32.xlu0 %v648_v59, %s4593_s14 }
  0x6d   : > { %824 = vrot.lane.b32.xlu1 %v646_v57, %s6856_s24  ;;  %v410_v57 = vrot.slane %v340_v54, 7 }
  0x6f   : > { %v4943_v63 = vsel %vm394_vm0, 0.0, %v410_v57 }
  0x70   : > { %826 = vrot.lane.b32.xlu0 %v648_v59, %s6856_s24  ;;  %v581_v14 = vrot.slane %v4943_v63, 1 }
  0x71   : > { %1203 = vrot.lane.b32.xlu1 %v4851_v3, %s4594_s16 }
  0x74   : > { %1205 = vrot.lane.b32.xlu0 %v4857_v4, %s4594_s16 }
  0x75   : > { %919 = vrot.lane.b32.xlu1 %v4851_v3, %s4591_s28 }
  0x78   : > { %921 = vrot.lane.b32.xlu0 %v4857_v4, %s4591_s28 }
  0x79   : > { %1296 = vrot.lane.b32.xlu1 %v573_v11, %s4596_s23 }
  0x7c   : > { %1298 = vrot.lane.b32.xlu0 %v575_v12, %s4596_s23 }
  0x7d   : > { %1015 = vrot.lane.b32.xlu1 %v573_v11, %s6850_s29 }
  0x80   : > { %735 = vrot.lane.b32.xlu0 %v573_v11, %s4589_s21  ;;  %v4954_v11 = vsel %vm394_vm0, %v410_v57, %v411_v61 }
  0x81   : > { %1389 = vrot.lane.b32.xlu1 %v651_v15, %s6849_s27 }
  0x82   : > { %v722_v18 = vpop.permute.xlu0 %721 }
  0x83   : > { %v1475_v55 = vsel %vm1474_vm6, 0.0, %v722_v18 }
  0x84   : > { %1111 = vrot.lane.b32.xlu0 %v651_v15, %s4593_s14 }
  0x85   : > { %1017 = vrot.lane.b32.xlu1 %v575_v12, %s6850_s29 }
  0x86   : > { %v815_v22 = vpop.permute.xlu0 %814 }
  0x87   : > { %v1507_v60 = vsel %vm6848_vm7, %v1475_v55, %v815_v22  ;;  %v342_v55 = vld [vmem:[%s4730_s26 + $0x60] sm:$0xff] }
  0x88   : > { %737 = vrot.lane.b32.xlu0 %v575_v12, %s4589_s21  ;;  %v413_v58 = vrot.slane %v342_v55, 7 }
  0x89   : > { %1391 = vrot.lane.b32.xlu1 %v653_v17, %s6849_s27 }
  0x8c   : > { %1113 = vrot.lane.b32.xlu0 %v653_v17, %s4593_s14 }
  0x8d   : > { %828 = vrot.lane.b32.xlu1 %v651_v15, %s6856_s24  ;;  %v582_v15 = vrot.slane %v4954_v11, 1 }
  0x8f   : > { %v908_v27 = vpop.permute.xlu1 %907  ;;  %v583_v22 = vsel %vm553_vm1, %v581_v14, %v582_v15  ;;  %v585_v31 = vsel %vm553_vm1, %v582_v15, %v584_v20 }
  0x90   : > { %830 = vrot.lane.b32.xlu0 %v653_v17, %s6856_s24  ;;  %v1539_v5 = vsel %vm6847_vm8, %v1507_v60, %v908_v27 }
  0x91   : > { %1207 = vrot.lane.b32.xlu1 %v4888_v26, %s4594_s16 }
  0x92   : > { %v1004_v29 = vpop.permute.xlu0 %1003 }
  0x93   : > { %v4899_v33 = vpop.permute.xlu1 %909  ;;  %v1572_v9 = vsel %vm1571_vm9, %v1539_v5, %v1004_v29 }
  0x94   : > { %1209 = vrot.lane.b32.xlu0 %v4894_v28, %s4594_s16  ;;  %v1540_v23 = vsel %vm6847_vm8, %v1507_v60, %v4899_v33  ;;  %v659_v33 = vrot.slane %v4943_v63, 2 }
  0x95   : > { %923 = vrot.lane.b32.xlu1 %v4888_v26, %s4591_s28 }
  0x96   : > { %v4905_v35 = vpop.permute.xlu0 %1005 }
  0x97   : > { %v4908_v37 = vpop.permute.xlu1 %723  ;;  %v1573_v29 = vsel %vm1571_vm9, %v1540_v23, %v4905_v35 }
  0x98   : > { %925 = vrot.lane.b32.xlu0 %v4894_v28, %s4591_s28  ;;  %v1476_v61 = vsel %vm1474_vm6, %v4737_v7, %v4908_v37 }
  0x99   : > { %1300 = vrot.lane.b32.xlu1 %v578_v36, %s4596_s23 }
  0x9a   : > { %v4914_v39 = vpop.permute.xlu0 %725 }
  0x9b   : > { %v1100_v42 = vpop.permute.xlu1 %1099 }
  0x9c   : > { %1302 = vrot.lane.b32.xlu0 %v580_v38, %s4596_s23  ;;  %v1605_v10 = vsel %vm1604_vm10, %v1572_v9, %v1100_v42 }
  0x9d   : > { %1019 = vrot.lane.b32.xlu1 %v578_v36, %s6850_s29 }
  0x9e   : > { %v1102_v43 = vpop.permute.xlu0 %1101 }
  0x9f   : > { %v4921_v45 = vpop.permute.xlu1 %816  ;;  %v1606_v30 = vsel %vm1604_vm10, %v1573_v29, %v1102_v43 }
  0xa0   : > { %739 = vrot.lane.b32.xlu0 %v578_v36, %s4589_s21  ;;  %v660_v36 = vrot.slane %v4954_v11, 2  ;;  %v1508_v5 = vsel %vm6848_vm7, %v1476_v61, %v4921_v45 }
  0xa1   : > { %1393 = vrot.lane.b32.xlu1 %v656_v44, %s6849_s27 }
  0xa2   : > { %v4925_v46 = vpop.permute.xlu0 %818  ;;  %v661_v42 = vsel %vm6841_vm2, %v659_v33, %v660_v36 }
  0xa3   : > { %v1196_v50 = vpop.permute.xlu1 %1195 }
  0xa4   : > { %1115 = vrot.lane.b32.xlu0 %v656_v44, %s4593_s14  ;;  %v1638_v12 = vsel %vm1637_vm11, %v1605_v10, %v1196_v50  ;;  %v5017_v10 = vsel %vm394_vm0, 0.0, %v413_v58 }
  0xa5   : > { %1021 = vrot.lane.b32.xlu1 %v580_v38, %s6850_s29 }
  0xa6   : > { %v1198_v51 = vpop.permute.xlu0 %1197 }
  0xa7   : > { %v4930_v53 = vpop.permute.xlu1 %911  ;;  %v1639_v32 = vsel %vm1637_vm11, %v1606_v30, %v1198_v51 }
  0xa8   : > { %741 = vrot.lane.b32.xlu0 %v580_v38, %s4589_s21 }
  0xa9   : > { %1395 = vrot.lane.b32.xlu1 %v658_v52, %s6849_s27 }
  0xaa   : > { %v4936_v56 = vpop.permute.xlu0 %913 }
  0xab   : > { %v1289_v59 = vpop.permute.xlu1 %1288 }
  0xac   : > { %1117 = vrot.lane.b32.xlu0 %v658_v52, %s4593_s14  ;;  %v1671_v17 = vsel %vm1670_vm12, %v1638_v12, %v1289_v59  ;;  %v343_v59 = vld [vmem:[%s4730_s26 + $0x68] sm:$0xff]  ;;  %v1541_v12 = vsel %vm6847_vm8, %v1508_v5, %v4930_v53  ;;  %v586_v53 = vrot.slane %v5017_v10, 1  ;;  %v345_v5 = vld [vmem:[%s4730_s26 + $0x78] sm:$0xff] }
  0xad   : > { %832 = vrot.lane.b32.xlu1 %v656_v44, %s6856_s24 }
  0xae   : > { %v1291_v62 = vpop.permute.xlu0 %1290 }
  0xaf   : > { %v4946_v6 = vpop.permute.xlu1 %1007  ;;  %v1672_v38 = vsel %vm1670_vm12, %v1639_v32, %v1291_v62  ;;  %v414_v62 = vrot.slane %v343_v59, 7 }
  0xb0   : > { %834 = vrot.lane.b32.xlu0 %v658_v52, %s6856_s24  ;;  %v663_v52 = vsel %vm6841_vm2, %v660_v36, %v662_v49  ;;  %v1574_v15 = vsel %vm1571_vm9, %v1541_v12, %v4946_v6 }
  0xb1   : > { %1211 = vrot.lane.b32.xlu1 %v4943_v63, %s4594_s16  ;;  %v5030_v37 = vsel %vm394_vm0, %v413_v58, %v414_v62  ;;  %v512_v6 = vsel %vm394_vm0, %v414_v62, 0.0 }
  0xb2   : > { %v4957_v13 = vpop.permute.xlu0 %727 }
  0xb3   : > { %v1382_v18 = vpop.permute.xlu1 %1381  ;;  %v1478_v12 = vsel %vm1474_vm6, %v4765_v24, %v4957_v13 }
  0xb4   : > { %1213 = vrot.lane.b32.xlu0 %v4954_v11, %s4594_s16  ;;  %v1704_v19 = vsel %vm6853_vm13, %v1671_v17, %v1382_v18  ;;  %v587_v17 = vrot.slane %v5030_v37, 1 }
  0xb5   : > { %927 = vrot.lane.b32.xlu1 %v4943_v63, %s4591_s28  ;;  %4195 = vmatprep.mubr.msk.f32.mxu0 %vm1747_vm14, %v1704_v19 }
  0xb6   : > { %v1104_v21 = vpop.permute.xlu0 %1103  ;;  %v588_v30 = vsel %vm553_vm1, %v586_v53, %v587_v17 }
  0xb7   : > { %v4972_v27 = vpop.permute.xlu1 %1009  ;;  %v1607_v7 = vsel %vm1604_vm10, %v1574_v15, %v1104_v21  ;;  %v1477_v21 = vsel %vm1474_vm6, %v4740_v8, %v4914_v39  ;;  %v417_v15 = vrot.slane %v345_v5, 7 }
  0xb8   : > { %929 = vrot.lane.b32.xlu0 %v4954_v11, %s4591_s28  ;;  %v1509_v23 = vsel %vm6848_vm7, %v1477_v21, %v4925_v46 }
  0xb9   : > { %1304 = vrot.lane.b32.xlu1 %v583_v22, %s4596_s23 }
  0xba   : > { %v4982_v34 = vpop.permute.xlu0 %729 }
  0xbb   : > { %v1384_v35 = vpop.permute.xlu1 %1383 }
  0xbc   : > { %v1705_v40 = vsel %vm6853_vm13, %v1672_v38, %v1384_v35  ;;  %1306 = vrot.lane.b32.xlu0 %v585_v31, %s4596_s23  ;;  %v665_v38 = vrot.slane %v5030_v37, 2 }
  0xbd   : > { %1023 = vrot.lane.b32.xlu1 %v583_v22, %s6850_s29  ;;  %4196 = vmatmul.mubr.msk.f32.vlgmr.msra.gmra.mrb[0].mxu0 %vm1747_vm14, %v1705_v40 }
  0xbe   : > { %v1106_v41 = vpop.permute.xlu0 %1105 }
  0xbf   : > { %v4992_v43 = vpop.permute.xlu1 %820 }
  0xc0   : > { %743 = vrot.lane.b32.xlu0 %v583_v22, %s4589_s21  ;;  %v589_v22 = vrot.slane %v512_v6, 1 }
  0xc1   : > { %1397 = vrot.lane.b32.xlu1 %v661_v42, %s6849_s27 }
  0xc2   : > { %v4996_v44 = vpop.permute.xlu0 %822  ;;  %v590_v46 = vsel %vm553_vm1, %v587_v17, %v589_v22 }
  0xc3   : > { %v1200_v50 = vpop.permute.xlu1 %1199 }
  0xc4   : > { %1119 = vrot.lane.b32.xlu0 %v661_v42, %s4593_s14  ;;  %v1640_v45 = vsel %vm1637_vm11, %v1607_v7, %v1200_v50  ;;  %v1510_v7 = vsel %vm6848_vm7, %v1478_v12, %v4992_v43 }
  0xc5   : > { %1025 = vrot.lane.b32.xlu1 %v585_v31, %s6850_s29 }
  0xc6   : > { %v1202_v51 = vpop.permute.xlu0 %1201 }
  0xc7   : > { %v5001_v54 = vpop.permute.xlu1 %915 }
  0xc8   : > { %745 = vrot.lane.b32.xlu0 %v585_v31, %s4589_s21  ;;  %v1542_v31 = vsel %vm6847_vm8, %v1509_v23, %v4936_v56  ;;  %v664_v56 = vrot.slane %v5017_v10, 2  ;;  %v1543_v17 = vsel %vm6847_vm8, %v1510_v7, %v5001_v54  ;;  %v347_v7 = vld [vmem:[%s4730_s26 + $0x88] sm:$0xff] }
  0xc9   : > { %1399 = vrot.lane.b32.xlu1 %v663_v52, %s6849_s27  ;;  %v1575_v8 = vsel %vm1571_vm9, %v1542_v31, %v4972_v27 }
  0xca   : > { %v5006_v57 = vpop.permute.xlu0 %917  ;;  %v1608_v39 = vsel %vm1604_vm10, %v1575_v8, %v1106_v41 }
  0xcb   : > { %v1293_v60 = vpop.permute.xlu1 %1292  ;;  %v1641_v33 = vsel %vm1637_vm11, %v1608_v39, %v1202_v51  ;;  %v667_v51 = vrot.slane %v512_v6, 2 }
  0xcc   : > { %1121 = vrot.lane.b32.xlu0 %v663_v52, %s4593_s14  ;;  %v1673_v18 = vsel %vm1670_vm12, %v1640_v45, %v1293_v60  ;;  %v344_v60 = vld [vmem:[%s4730_s26 + $0x70] sm:$0xff] }
  0xcd   : > { %836 = vrot.lane.b32.xlu1 %v661_v42, %s6856_s24  ;;  %v666_v42 = vsel %vm6841_vm2, %v664_v56, %v665_v38  ;;  %v668_v58 = vsel %vm6841_vm2, %v665_v38, %v667_v51  ;;  %v416_v62 = vrot.slane %v344_v60, 7 }
  0xce   : > { %v1295_v9 = vpop.permute.xlu0 %1294 }
  0xcf   : > { %v5021_v14 = vpop.permute.xlu1 %1011  ;;  %v1674_v35 = vsel %vm1670_vm12, %v1641_v33, %v1295_v9  ;;  %v5098_v53 = vsel %vm394_vm0, 0.0, %v416_v62  ;;  %v5111_v13 = vsel %vm394_vm0, %v416_v62, %v417_v15 }
  0xd0   : > { %838 = vrot.lane.b32.xlu0 %v663_v52, %s6856_s24  ;;  %v591_v54 = vrot.slane %v5098_v53, 1 }
  0xd1   : > { %1215 = vrot.lane.b32.xlu1 %v5017_v10, %s4594_s16 }
  0xd2   : > { %v5033_v16 = vpop.permute.xlu0 %731 }
  0xd3   : > { %v1386_v19 = vpop.permute.xlu1 %1385 }
  0xd4   : > { %v1706_v20 = vsel %vm6853_vm13, %v1673_v18, %v1386_v19  ;;  %1217 = vrot.lane.b32.xlu0 %v5030_v37, %s4594_s16  ;;  %v1576_v18 = vsel %vm1571_vm9, %v1543_v17, %v5021_v14  ;;  %v513_v14 = vsel %vm394_vm0, %v417_v15, 0.0  ;;  %v1480_v17 = vsel %vm1474_vm6, %v4814_v47, %v5033_v16 }
  0xd5   : > { %931 = vrot.lane.b32.xlu1 %v5017_v10, %s4591_s28  ;;  %4198 = vmatprep.mubr.msk.f32.mxu0 %vm1747_vm14, %v1706_v20  ;;  %v592_v20 = vrot.slane %v5111_v13, 1 }
  0xd6   : > { %v1108_v29 = vpop.permute.xlu0 %1107 }
  0xd7   : > { %v5053_v32 = vpop.permute.xlu1 %1013  ;;  %v1609_v24 = vsel %vm1604_vm10, %v1576_v18, %v1108_v29  ;;  %v1479_v29 = vsel %vm1474_vm6, %v4771_v25, %v4982_v34  ;;  %v593_v39 = vsel %vm553_vm1, %v591_v54, %v592_v20  ;;  %v420_v18 = vrot.slane %v347_v7, 7 }
  0xd8   : > { %933 = vrot.lane.b32.xlu0 %v5030_v37, %s4591_s28  ;;  %v1511_v31 = vsel %vm6848_vm7, %v1479_v29, %v4996_v44 }
  0xd9   : > { %1308 = vrot.lane.b32.xlu1 %v588_v30, %s4596_s23 }
  0xda   : > { %v5063_v36 = vpop.permute.xlu0 %733 }
  0xdb   : > { %v1388_v27 = vpop.permute.xlu1 %1387 }
  0xdc   : > { %v1707_v40 = vsel %vm6853_vm13, %v1674_v35, %v1388_v27  ;;  %1310 = vrot.lane.b32.xlu0 %v590_v46, %s4596_s23  ;;  %v670_v35 = vrot.slane %v5111_v13, 2 }
  0xdd   : > { %1027 = vrot.lane.b32.xlu1 %v588_v30, %s6850_s29  ;;  %4199 = vmatmul.mubr.msk.f32.gmra.mrb[2].mxu0 %vm1747_vm14, %v1707_v40 }
  0xde   : > { %v1110_v41 = vpop.permute.xlu0 %1109 }
  0xdf   : > { %v5073_v49 = vpop.permute.xlu1 %824 }
  0xe0   : > { %747 = vrot.lane.b32.xlu0 %v588_v30, %s4589_s21  ;;  %v594_v30 = vrot.slane %v513_v14, 1 }
  0xe1   : > { %1401 = vrot.lane.b32.xlu1 %v666_v42, %s6849_s27 }
  0xe2   : > { %v5077_v50 = vpop.permute.xlu0 %826  ;;  %v595_v44 = vsel %vm553_vm1, %v592_v20, %v594_v30 }
  0xe3   : > { %v1204_v52 = vpop.permute.xlu1 %1203 }
  0xe4   : > { %1123 = vrot.lane.b32.xlu0 %v666_v42, %s4593_s14  ;;  %v1642_v43 = vsel %vm1637_vm11, %v1609_v24, %v1204_v52  ;;  %v1512_v24 = vsel %vm6848_vm7, %v1480_v17, %v5073_v49 }
  0xe5   : > { %1029 = vrot.lane.b32.xlu1 %v590_v46, %s6850_s29 }
  0xe6   : > { %v1206_v55 = vpop.permute.xlu0 %1205 }
  0xe7   : > { %v5082_v59 = vpop.permute.xlu1 %919 }
  0xe8   : > { %749 = vrot.lane.b32.xlu0 %v590_v46, %s4589_s21  ;;  %v1544_v46 = vsel %vm6847_vm8, %v1511_v31, %v5006_v57  ;;  %v669_v57 = vrot.slane %v5098_v53, 2  ;;  %v1545_v20 = vsel %vm6847_vm8, %v1512_v24, %v5082_v59  ;;  %v349_v24 = vld [vmem:[%s4730_s26 + $0x98] sm:$0xff] }
  0xe9   : > { %1403 = vrot.lane.b32.xlu1 %v668_v58, %s6849_s27  ;;  %v1577_v25 = vsel %vm1571_vm9, %v1544_v46, %v5053_v32 }
  0xea   : > { %v5087_v61 = vpop.permute.xlu0 %921  ;;  %v1610_v34 = vsel %vm1604_vm10, %v1577_v25, %v1110_v41 }
  0xeb   : > { %v1297_v9 = vpop.permute.xlu1 %1296  ;;  %v1643_v56 = vsel %vm1637_vm11, %v1610_v34, %v1206_v55  ;;  %v672_v55 = vrot.slane %v513_v14, 2 }
  0xec   : > { %1125 = vrot.lane.b32.xlu0 %v668_v58, %s4593_s14  ;;  %v1675_v21 = vsel %vm1670_vm12, %v1642_v43, %v1297_v9  ;;  %v346_v9 = vld [vmem:[%s4730_s26 + $0x80] sm:$0xff] }
  0xed   : > { %840 = vrot.lane.b32.xlu1 %v666_v42, %s6856_s24  ;;  %v671_v42 = vsel %vm6841_vm2, %v669_v57, %v670_v35  ;;  %v673_v62 = vsel %vm6841_vm2, %v670_v35, %v672_v55  ;;  %v419_v15 = vrot.slane %v346_v9, 7 }
  0xee   : > { %v1299_v45 = vpop.permute.xlu0 %1298 }
  0xef   : > { %v5102_v6 = vpop.permute.xlu1 %1015  ;;  %v1676_v27 = vsel %vm1670_vm12, %v1643_v56, %v1299_v45  ;;  %v5179_v54 = vsel %vm394_vm0, 0.0, %v419_v15  ;;  %v5192_v16 = vsel %vm394_vm0, %v419_v15, %v420_v18 }
  0xf0   : > { %842 = vrot.lane.b32.xlu0 %v668_v58, %s6856_s24  ;;  %v596_v59 = vrot.slane %v5179_v54, 1 }
  0xf1   : > { %1219 = vrot.lane.b32.xlu1 %v5098_v53, %s4594_s16 }
  0xf2   : > { %v5114_v19 = vpop.permute.xlu0 %735 }
  0xf3   : > { %v1390_v22 = vpop.permute.xlu1 %1389 }
  0xf4   : > { %v1708_v23 = vsel %vm6853_vm13, %v1675_v21, %v1390_v22  ;;  %1221 = vrot.lane.b32.xlu0 %v5111_v13, %s4594_s16  ;;  %v1578_v21 = vsel %vm1571_vm9, %v1545_v20, %v5102_v6  ;;  %v514_v6 = vsel %vm394_vm0, %v420_v18, 0.0  ;;  %v1482_v20 = vsel %vm1474_vm6, %v4851_v3, %v5114_v19 }
  0xf5   : > { %935 = vrot.lane.b32.xlu1 %v5098_v53, %s4591_s28  ;;  %4201 = vmatprep.mubr.msk.f32.mxu0 %vm1747_vm14, %v1708_v23  ;;  %v597_v23 = vrot.slane %v5192_v16, 1 }
  0xf6   : > { %v1112_v8 = vpop.permute.xlu0 %1111 }
  0xf7   : > { %v5134_v33 = vpop.permute.xlu1 %1017  ;;  %v1611_v47 = vsel %vm1604_vm10, %v1578_v21, %v1112_v8  ;;  %v1481_v8 = vsel %vm1474_vm6, %v4820_v48, %v5063_v36  ;;  %v598_v34 = vsel %vm553_vm1, %v596_v59, %v597_v23  ;;  %v423_v21 = vrot.slane %v349_v24, 7 }
  0xf8   : > { %937 = vrot.lane.b32.xlu0 %v5111_v13, %s4591_s28  ;;  %v1513_v46 = vsel %vm6848_vm7, %v1481_v8, %v5077_v50 }
  0xf9   : > { %1312 = vrot.lane.b32.xlu1 %v593_v39, %s4596_s23 }
  0xfa   : > { %v5144_v38 = vpop.permute.xlu0 %737 }
  0xfb   : > { %v1392_v32 = vpop.permute.xlu1 %1391 }
  0xfc   : > { %v1709_v40 = vsel %vm6853_vm13, %v1676_v27, %v1392_v32  ;;  %1314 = vrot.lane.b32.xlu0 %v595_v44, %s4596_s23  ;;  %v675_v27 = vrot.slane %v5192_v16, 2 }
  0xfd   : > { %1031 = vrot.lane.b32.xlu1 %v593_v39, %s6850_s29  ;;  %4202 = vmatmul.mubr.msk.f32.gmra.mrb[4].mxu0 %vm1747_vm14, %v1709_v40 }
  0xfe   : > { %v1114_v41 = vpop.permute.xlu0 %1113 }
  0xff   : > { %v5154_v51 = vpop.permute.xlu1 %828 }
 0x100   : > { %751 = vrot.lane.b32.xlu0 %v593_v39, %s4589_s21  ;;  %v599_v39 = vrot.slane %v514_v6, 1 }
 0x101   : > { %1405 = vrot.lane.b32.xlu1 %v671_v42, %s6849_s27 }
 0x102   : > { %v5158_v52 = vpop.permute.xlu0 %830  ;;  %v600_v50 = vsel %vm553_vm1, %v597_v23, %v599_v39 }
 0x103   : > { %v1208_v58 = vpop.permute.xlu1 %1207 }
 0x104   : > { %1127 = vrot.lane.b32.xlu0 %v671_v42, %s4593_s14  ;;  %v1644_v49 = vsel %vm1637_vm11, %v1611_v47, %v1208_v58  ;;  %v1514_v47 = vsel %vm6848_vm7, %v1482_v20, %v5154_v51 }
 0x105   : > { %1033 = vrot.lane.b32.xlu1 %v595_v44, %s6850_s29 }
 0x106   : > { %v1210_v60 = vpop.permute.xlu0 %1209 }
 0x107   : > { %v5163_v5 = vpop.permute.xlu1 %923 }
 0x108   : > { %753 = vrot.lane.b32.xlu0 %v595_v44, %s4589_s21  ;;  %v1546_v44 = vsel %vm6847_vm8, %v1513_v46, %v5087_v61  ;;  %v674_v61 = vrot.slane %v5179_v54, 2  ;;  %v1547_v23 = vsel %vm6847_vm8, %v1514_v47, %v5163_v5  ;;  %v351_v47 = vld [vmem:[%s4730_s26 + $0xa8] sm:$0xff] }
 0x109   : > { %1407 = vrot.lane.b32.xlu1 %v673_v62, %s6849_s27  ;;  %v1579_v48 = vsel %vm1571_vm9, %v1546_v44, %v5134_v33 }
 0x10a   : > { %v5168_v12 = vpop.permute.xlu0 %925  ;;  %v1612_v36 = vsel %vm1604_vm10, %v1579_v48, %v1114_v41 }
 0x10b   : > { %v1301_v45 = vpop.permute.xlu1 %1300  ;;  %v1645_v57 = vsel %vm1637_vm11, %v1612_v36, %v1210_v60  ;;  %v677_v60 = vrot.slane %v514_v6, 2 }
 0x10c   : > { %1129 = vrot.lane.b32.xlu0 %v673_v62, %s4593_s14  ;;  %v1677_v29 = vsel %vm1670_vm12, %v1644_v49, %v1301_v45  ;;  %v348_v45 = vld [vmem:[%s4730_s26 + $0x90] sm:$0xff] }
 0x10d   : > { %844 = vrot.lane.b32.xlu1 %v671_v42, %s6856_s24  ;;  %v676_v42 = vsel %vm6841_vm2, %v674_v61, %v675_v27  ;;  %v678_v15 = vsel %vm6841_vm2, %v675_v27, %v677_v60  ;;  %v422_v18 = vrot.slane %v348_v45, 7 }
 0x10e   : > { %v1303_v43 = vpop.permute.xlu0 %1302 }
 0x10f   : > { %v5183_v14 = vpop.permute.xlu1 %1019  ;;  %v1678_v32 = vsel %vm1670_vm12, %v1645_v57, %v1303_v43  ;;  %v5260_v59 = vsel %vm394_vm0, 0.0, %v422_v18  ;;  %v5273_v19 = vsel %vm394_vm0, %v422_v18, %v423_v21 }
 0x110   : > { %846 = vrot.lane.b32.xlu0 %v673_v62, %s6856_s24  ;;  %v601_v5 = vrot.slane %v5260_v59, 1 }
 0x111   : > { %1223 = vrot.lane.b32.xlu1 %v5179_v54, %s4594_s16 }
 0x112   : > { %v5195_v22 = vpop.permute.xlu0 %739 }
 0x113   : > { %v1394_v30 = vpop.permute.xlu1 %1393 }
 0x114   : > { %v1710_v31 = vsel %vm6853_vm13, %v1677_v29, %v1394_v30  ;;  %1225 = vrot.lane.b32.xlu0 %v5192_v16, %s4594_s16  ;;  %v1580_v29 = vsel %vm1571_vm9, %v1547_v23, %v5183_v14  ;;  %v515_v14 = vsel %vm394_vm0, %v423_v21, 0.0  ;;  %v1484_v23 = vsel %vm1474_vm6, %v4888_v26, %v5195_v22 }
 0x115   : > { %939 = vrot.lane.b32.xlu1 %v5179_v54, %s4591_s28  ;;  %4204 = vmatprep.mubr.msk.f32.mxu0 %vm1747_vm14, %v1710_v31  ;;  %v602_v31 = vrot.slane %v5273_v19, 1 }
 0x116   : > { %v1116_v25 = vpop.permute.xlu0 %1115 }
 0x117   : > { %v5215_v56 = vpop.permute.xlu1 %1021  ;;  %v1613_v3 = vsel %vm1604_vm10, %v1580_v29, %v1116_v25  ;;  %v1483_v25 = vsel %vm1474_vm6, %v4857_v4, %v5144_v38  ;;  %v603_v36 = vsel %vm553_vm1, %v601_v5, %v602_v31  ;;  %v426_v29 = vrot.slane %v351_v47, 7 }
 0x118   : > { %941 = vrot.lane.b32.xlu0 %v5192_v16, %s4591_s28  ;;  %v1515_v44 = vsel %vm6848_vm7, %v1483_v25, %v5158_v52 }
 0x119   : > { %1316 = vrot.lane.b32.xlu1 %v598_v34, %s4596_s23 }
 0x11a   : > { %v5225_v35 = vpop.permute.xlu0 %741 }
 0x11b   : > { %v1396_v33 = vpop.permute.xlu1 %1395 }
 0x11c   : > { %v1711_v40 = vsel %vm6853_vm13, %v1678_v32, %v1396_v33  ;;  %1318 = vrot.lane.b32.xlu0 %v600_v50, %s4596_s23  ;;  %v680_v32 = vrot.slane %v5273_v19, 2 }
 0x11d   : > { %1035 = vrot.lane.b32.xlu1 %v598_v34, %s6850_s29  ;;  %4205 = vmatmul.mubr.msk.f32.gmra.mrb[6].mxu0 %vm1747_vm14, %v1711_v40 }
 0x11e   : > { %v1118_v41 = vpop.permute.xlu0 %1117 }
 0x11f   : > { %v5235_v55 = vpop.permute.xlu1 %832 }
 0x120   : > { %755 = vrot.lane.b32.xlu0 %v598_v34, %s4589_s21  ;;  %v604_v34 = vrot.slane %v515_v14, 1 }
 0x121   : > { %1409 = vrot.lane.b32.xlu1 %v676_v42, %s6849_s27 }
 0x122   : > { %v5239_v58 = vpop.permute.xlu0 %834  ;;  %v605_v52 = vsel %vm553_vm1, %v602_v31, %v604_v34 }
 0x123   : > { %v1212_v62 = vpop.permute.xlu1 %1211 }
 0x124   : > { %1131 = vrot.lane.b32.xlu0 %v676_v42, %s4593_s14  ;;  %v1646_v51 = vsel %vm1637_vm11, %v1613_v3, %v1212_v62  ;;  %v1516_v3 = vsel %vm6848_vm7, %v1484_v23, %v5235_v55 }
 0x125   : > { %1037 = vrot.lane.b32.xlu1 %v600_v50, %s6850_s29 }
 0x126   : > { %v1214_v9 = vpop.permute.xlu0 %1213 }
 0x127   : > { %v5244_v7 = vpop.permute.xlu1 %927 }
 0x128   : > { %757 = vrot.lane.b32.xlu0 %v600_v50, %s4589_s21  ;;  %v1548_v50 = vsel %vm6847_vm8, %v1515_v44, %v5168_v12  ;;  %v679_v12 = vrot.slane %v5260_v59, 2  ;;  %v1549_v31 = vsel %vm6847_vm8, %v1516_v3, %v5244_v7  ;;  %v353_v3 = vld [vmem:[%s4730_s26 + $0xb8] sm:$0xff] }
 0x129   : > { %1411 = vrot.lane.b32.xlu1 %v678_v15, %s6849_s27  ;;  %v1581_v4 = vsel %vm1571_vm9, %v1548_v50, %v5215_v56 }
 0x12a   : > { %v5249_v17 = vpop.permute.xlu0 %929  ;;  %v1614_v38 = vsel %vm1604_vm10, %v1581_v4, %v1118_v41 }
 0x12b   : > { %v1305_v43 = vpop.permute.xlu1 %1304  ;;  %v1647_v61 = vsel %vm1637_vm11, %v1614_v38, %v1214_v9  ;;  %v682_v9 = vrot.slane %v515_v14, 2 }
 0x12c   : > { %1133 = vrot.lane.b32.xlu0 %v678_v15, %s4593_s14  ;;  %v1679_v8 = vsel %vm1670_vm12, %v1646_v51, %v1305_v43  ;;  %v350_v43 = vld [vmem:[%s4730_s26 + $0xa0] sm:$0xff] }
 0x12d   : > { %848 = vrot.lane.b32.xlu1 %v676_v42, %s6856_s24  ;;  %v681_v42 = vsel %vm6841_vm2, %v679_v12, %v680_v32  ;;  %v683_v18 = vsel %vm6841_vm2, %v680_v32, %v682_v9  ;;  %v425_v21 = vrot.slane %v350_v43, 7 }
 0x12e   : > { %v1307_v49 = vpop.permute.xlu0 %1306 }
 0x12f   : > { %v5264_v6 = vpop.permute.xlu1 %1023  ;;  %v1680_v33 = vsel %vm1670_vm12, %v1647_v61, %v1307_v49  ;;  %v5341_v5 = vsel %vm394_vm0, 0.0, %v425_v21  ;;  %v5354_v22 = vsel %vm394_vm0, %v425_v21, %v426_v29 }
 0x130   : > { %850 = vrot.lane.b32.xlu0 %v678_v15, %s6856_s24  ;;  %v606_v7 = vrot.slane %v5341_v5, 1 }
 0x131   : > { %1227 = vrot.lane.b32.xlu1 %v5260_v59, %s4594_s16 }
 0x132   : > { %v5276_v30 = vpop.permute.xlu0 %743 }
 0x133   : > { %v1398_v39 = vpop.permute.xlu1 %1397 }
 0x134   : > { %v1712_v46 = vsel %vm6853_vm13, %v1679_v8, %v1398_v39  ;;  %1229 = vrot.lane.b32.xlu0 %v5273_v19, %s4594_s16  ;;  %v1582_v8 = vsel %vm1571_vm9, %v1549_v31, %v5264_v6  ;;  %v516_v6 = vsel %vm394_vm0, %v426_v29, 0.0  ;;  %v1486_v31 = vsel %vm1474_vm6, %v4943_v63, %v5276_v30 }
 0x135   : > { %943 = vrot.lane.b32.xlu1 %v5260_v59, %s4591_s28  ;;  %4207 = vmatprep.mubr.msk.f32.mxu0 %vm1747_vm14, %v1712_v46  ;;  %v607_v46 = vrot.slane %v5354_v22, 1 }
 0x136   : > { %v1120_v48 = vpop.permute.xlu0 %1119 }
 0x137   : > { %v5296_v57 = vpop.permute.xlu1 %1025  ;;  %v1615_v26 = vsel %vm1604_vm10, %v1582_v8, %v1120_v48  ;;  %v1485_v48 = vsel %vm1474_vm6, %v4894_v28, %v5225_v35  ;;  %v608_v38 = vsel %vm553_vm1, %v606_v7, %v607_v46  ;;  %v429_v8 = vrot.slane %v353_v3, 7 }
 0x138   : > { %945 = vrot.lane.b32.xlu0 %v5273_v19, %s4591_s28  ;;  %v1517_v50 = vsel %vm6848_vm7, %v1485_v48, %v5239_v58 }
 0x139   : > { %1320 = vrot.lane.b32.xlu1 %v603_v36, %s4596_s23 }
 0x13a   : > { %v5306_v27 = vpop.permute.xlu0 %745 }
 0x13b   : > { %v1400_v56 = vpop.permute.xlu1 %1399 }
 0x13c   : > { %v1713_v40 = vsel %vm6853_vm13, %v1680_v33, %v1400_v56  ;;  %1322 = vrot.lane.b32.xlu0 %v605_v52, %s4596_s23  ;;  %v685_v33 = vrot.slane %v5354_v22, 2 }
 0x13d   : > { %1039 = vrot.lane.b32.xlu1 %v603_v36, %s6850_s29  ;;  %4208 = vmatmul.mubr.msk.f32.gmra.mrb[8].mxu0 %vm1747_vm14, %v1713_v40 }
 0x13e   : > { %v1122_v41 = vpop.permute.xlu0 %1121 }
 0x13f   : > { %v5316_v60 = vpop.permute.xlu1 %836 }
 0x140   : > { %759 = vrot.lane.b32.xlu0 %v603_v36, %s4589_s21  ;;  %v609_v36 = vrot.slane %v516_v6, 1 }
 0x141   : > { %1413 = vrot.lane.b32.xlu1 %v681_v42, %s6849_s27 }
 0x142   : > { %v5320_v62 = vpop.permute.xlu0 %838  ;;  %v610_v58 = vsel %vm553_vm1, %v607_v46, %v609_v36 }
 0x143   : > { %v1216_v15 = vpop.permute.xlu1 %1215 }
 0x144   : > { %1135 = vrot.lane.b32.xlu0 %v681_v42, %s4593_s14  ;;  %v1648_v55 = vsel %vm1637_vm11, %v1615_v26, %v1216_v15  ;;  %v1518_v26 = vsel %vm6848_vm7, %v1486_v31, %v5316_v60 }
 0x145   : > { %1041 = vrot.lane.b32.xlu1 %v605_v52, %s6850_s29 }
 0x146   : > { %v1218_v45 = vpop.permute.xlu0 %1217 }
 0x147   : > { %v5325_v24 = vpop.permute.xlu1 %931 }
 0x148   : > { %761 = vrot.lane.b32.xlu0 %v605_v52, %s4589_s21  ;;  %v1550_v52 = vsel %vm6847_vm8, %v1517_v50, %v5249_v17  ;;  %v684_v17 = vrot.slane %v5341_v5, 2  ;;  %v1551_v46 = vsel %vm6847_vm8, %v1518_v26, %v5325_v24  ;;  %v355_v26 = vld [vmem:[%s4730_s26 + $0xc8] sm:$0xff] }
 0x149   : > { %1415 = vrot.lane.b32.xlu1 %v683_v18, %s6849_s27  ;;  %v1583_v28 = vsel %vm1571_vm9, %v1550_v52, %v5296_v57 }
 0x14a   : > { %v5330_v20 = vpop.permute.xlu0 %933  ;;  %v1616_v35 = vsel %vm1604_vm10, %v1583_v28, %v1122_v41 }
 0x14b   : > { %v1309_v49 = vpop.permute.xlu1 %1308  ;;  %v1649_v12 = vsel %vm1637_vm11, %v1616_v35, %v1218_v45  ;;  %v687_v45 = vrot.slane %v516_v6, 2 }
 0x14c   : > { %1137 = vrot.lane.b32.xlu0 %v683_v18, %s4593_s14  ;;  %v1681_v25 = vsel %vm1670_vm12, %v1648_v55, %v1309_v49  ;;  %v352_v49 = vld [vmem:[%s4730_s26 + $0xb0] sm:$0xff] }
 0x14d   : > { %852 = vrot.lane.b32.xlu1 %v681_v42, %s6856_s24  ;;  %v686_v42 = vsel %vm6841_vm2, %v684_v17, %v685_v33  ;;  %v688_v21 = vsel %vm6841_vm2, %v685_v33, %v687_v45  ;;  %v428_v29 = vrot.slane %v352_v49, 7 }
 0x14e   : > { %v1311_v51 = vpop.permute.xlu0 %1310 }
 0x14f   : > { %v5345_v14 = vpop.permute.xlu1 %1027  ;;  %v1682_v56 = vsel %vm1670_vm12, %v1649_v12, %v1311_v51  ;;  %v5422_v7 = vsel %vm394_vm0, 0.0, %v428_v29  ;;  %v5435_v30 = vsel %vm394_vm0, %v428_v29, %v429_v8 }
 0x150   : > { %854 = vrot.lane.b32.xlu0 %v683_v18, %s6856_s24  ;;  %v611_v24 = vrot.slane %v5422_v7, 1 }
 0x151   : > { %1231 = vrot.lane.b32.xlu1 %v5341_v5, %s4594_s16 }
 0x152   : > { %v5357_v39 = vpop.permute.xlu0 %747 }
 0x153   : > { %v1402_v34 = vpop.permute.xlu1 %1401 }
 0x154   : > { %v1714_v44 = vsel %vm6853_vm13, %v1681_v25, %v1402_v34  ;;  %1233 = vrot.lane.b32.xlu0 %v5354_v22, %s4594_s16  ;;  %v1584_v25 = vsel %vm1571_vm9, %v1551_v46, %v5345_v14  ;;  %v517_v14 = vsel %vm394_vm0, %v429_v8, 0.0  ;;  %v1488_v46 = vsel %vm1474_vm6, %v5017_v10, %v5357_v39 }
 0x155   : > { %947 = vrot.lane.b32.xlu1 %v5341_v5, %s4591_s28  ;;  %4210 = vmatprep.mubr.msk.f32.mxu0 %vm1747_vm14, %v1714_v44  ;;  %v612_v44 = vrot.slane %v5435_v30, 1 }
 0x156   : > { %v1124_v4 = vpop.permute.xlu0 %1123 }
 0x157   : > { %v5377_v61 = vpop.permute.xlu1 %1029  ;;  %v1617_v63 = vsel %vm1604_vm10, %v1584_v25, %v1124_v4  ;;  %v1487_v4 = vsel %vm1474_vm6, %v4954_v11, %v5306_v27  ;;  %v613_v35 = vsel %vm553_vm1, %v611_v24, %v612_v44  ;;  %v432_v25 = vrot.slane %v355_v26, 7 }
 0x158   : > { %949 = vrot.lane.b32.xlu0 %v5354_v22, %s4591_s28  ;;  %v1519_v52 = vsel %vm6848_vm7, %v1487_v4, %v5320_v62 }
 0x159   : > { %1324 = vrot.lane.b32.xlu1 %v608_v38, %s4596_s23 }
 0x15a   : > { %v5387_v32 = vpop.permute.xlu0 %749 }
 0x15b   : > { %v1404_v57 = vpop.permute.xlu1 %1403 }
 0x15c   : > { %v1715_v40 = vsel %vm6853_vm13, %v1682_v56, %v1404_v57  ;;  %1326 = vrot.lane.b32.xlu0 %v610_v58, %s4596_s23  ;;  %v690_v56 = vrot.slane %v5435_v30, 2 }
 0x15d   : > { %1043 = vrot.lane.b32.xlu1 %v608_v38, %s6850_s29  ;;  %4211 = vmatmul.mubr.msk.f32.gmra.mrb[10].mxu0 %vm1747_vm14, %v1715_v40 }
 0x15e   : > { %v1126_v41 = vpop.permute.xlu0 %1125 }
 0x15f   : > { %v5397_v9 = vpop.permute.xlu1 %840 }
 0x160   : > { %763 = vrot.lane.b32.xlu0 %v608_v38, %s4589_s21  ;;  %v614_v38 = vrot.slane %v517_v14, 1 }
 0x161   : > { %1417 = vrot.lane.b32.xlu1 %v686_v42, %s6849_s27 }
 0x162   : > { %v5401_v15 = vpop.permute.xlu0 %842  ;;  %v615_v62 = vsel %vm553_vm1, %v612_v44, %v614_v38  ;;  %v518_v38 = vsel %vm394_vm0, %v432_v25, 0.0 }
 0x163   : > { %v1220_v18 = vpop.permute.xlu1 %1219 }
 0x164   : > { %1139 = vrot.lane.b32.xlu0 %v686_v42, %s4593_s14  ;;  %v1650_v60 = vsel %vm1637_vm11, %v1617_v63, %v1220_v18  ;;  %v1520_v63 = vsel %vm6848_vm7, %v1488_v46, %v5397_v9 }
 0x165   : > { %1045 = vrot.lane.b32.xlu1 %v610_v58, %s6850_s29 }
 0x166   : > { %v1222_v43 = vpop.permute.xlu0 %1221 }
 0x167   : > { %v5406_v47 = vpop.permute.xlu1 %935 }
 0x168   : > { %765 = vrot.lane.b32.xlu0 %v610_v58, %s4589_s21  ;;  %v1552_v58 = vsel %vm6847_vm8, %v1519_v52, %v5330_v20  ;;  %v689_v20 = vrot.slane %v5422_v7, 2  ;;  %v1553_v44 = vsel %vm6847_vm8, %v1520_v63, %v5406_v47  ;;  %v357_v63 = vld [vmem:[%s4730_s26 + $0xd8] sm:$0xff] }
 0x169   : > { %1419 = vrot.lane.b32.xlu1 %v688_v21, %s6849_s27  ;;  %v1585_v11 = vsel %vm1571_vm9, %v1552_v58, %v5377_v61  ;;  %v1489_v58 = vsel %vm1474_vm6, %v5030_v37, %v5387_v32 }
 0x16a   : > { %v5411_v23 = vpop.permute.xlu0 %937  ;;  %v1618_v27 = vsel %vm1604_vm10, %v1585_v11, %v1126_v41  ;;  %v619_v11 = vrot.slane %v518_v38, 1 }
 0x16b   : > { %v1313_v51 = vpop.permute.xlu1 %1312  ;;  %v1651_v17 = vsel %vm1637_vm11, %v1618_v27, %v1222_v43  ;;  %v692_v43 = vrot.slane %v517_v14, 2  ;;  %v1521_v27 = vsel %vm6848_vm7, %v1489_v58, %v5401_v15 }
 0x16c   : > { %1141 = vrot.lane.b32.xlu0 %v688_v21, %s4593_s14  ;;  %v1683_v48 = vsel %vm1670_vm12, %v1650_v60, %v1313_v51  ;;  %v354_v51 = vld [vmem:[%s4730_s26 + $0xc0] sm:$0xff] }
 0x16d   : > { %856 = vrot.lane.b32.xlu1 %v686_v42, %s6856_s24  ;;  %v691_v42 = vsel %vm6841_vm2, %v689_v20, %v690_v56  ;;  %v693_v29 = vsel %vm6841_vm2, %v690_v56, %v692_v43  ;;  %v431_v8 = vrot.slane %v354_v51, 7  ;;  %v1554_v20 = vsel %vm6847_vm8, %v1521_v27, %v5411_v23 }
 0x16e   : > { %v1315_v55 = vpop.permute.xlu0 %1314  ;;  %v697_v51 = vrot.slane %v518_v38, 2  ;;  %v435_v38 = vrot.slane %v357_v63, 7 }
 0x16f   : > { %v5426_v6 = vpop.permute.xlu1 %1031  ;;  %v1684_v57 = vsel %vm1670_vm12, %v1651_v17, %v1315_v55  ;;  %v5503_v24 = vsel %vm394_vm0, 0.0, %v431_v8  ;;  %v5520_v9 = vsel %vm394_vm0, %v431_v8, %v432_v25  ;;  %v356_v25 = vld [vmem:[%s4730_s26 + $0xd0] sm:$0xff] }
 0x170   : > { %858 = vrot.lane.b32.xlu0 %v688_v21, %s6856_s24  ;;  %v617_v4 = vrot.slane %v5520_v9, 1  ;;  %v694_v23 = vrot.slane %v5503_v24, 2 }
 0x171   : > { %1235 = vrot.lane.b32.xlu1 %v5422_v7, %s4594_s16 }
 0x172   : > { %v5438_v34 = vpop.permute.xlu0 %751  ;;  %v620_v15 = vsel %vm553_vm1, %v617_v4, %v619_v11 }
 0x173   : > { %v1406_v36 = vpop.permute.xlu1 %1405 }
 0x174   : > { %v1716_v50 = vsel %vm6853_vm13, %v1683_v48, %v1406_v36  ;;  %1237 = vrot.lane.b32.xlu0 %v5435_v30, %s4594_s16  ;;  %v1586_v48 = vsel %vm1571_vm9, %v1553_v44, %v5426_v6  ;;  %v616_v6 = vrot.slane %v5503_v24, 1 }
 0x175   : > { %951 = vrot.lane.b32.xlu1 %v5422_v7, %s4591_s28  ;;  %4213 = vmatprep.mubr.msk.f32.mxu0 %vm1747_vm14, %v1716_v50 }
 0x176   : > { %v1128_v28 = vpop.permute.xlu0 %1127  ;;  %v618_v17 = vsel %vm553_vm1, %v616_v6, %v617_v4  ;;  %v2174_v4 = vlaneseq }
 0x177   : > { %v5458_v12 = vpop.permute.xlu1 %1033  ;;  %v1619_v10 = vsel %vm1604_vm10, %v1586_v48, %v1128_v28  ;;  %v434_v48 = vrot.slane %v356_v25, 7 }
 0x178   : > { %953 = vrot.lane.b32.xlu0 %v5435_v30, %s4591_s28  ;;  %v1587_v37 = vsel %vm1571_vm9, %v1554_v20, %v5458_v12 }
 0x179   : > { %1328 = vrot.lane.b32.xlu1 %v613_v35, %s4596_s23  ;;  %v5605_v27 = vsel %vm394_vm0, 0.0, %v434_v48 }
 0x17a   : > { %v5468_v33 = vpop.permute.xlu0 %753 }
 0x17b   : > { %v1408_v61 = vpop.permute.xlu1 %1407 }
 0x17c   : > { %v1717_v40 = vsel %vm6853_vm13, %v1684_v57, %v1408_v61  ;;  %1330 = vrot.lane.b32.xlu0 %v615_v62, %s4596_s23 }
 0x17d   : > { %1047 = vrot.lane.b32.xlu1 %v613_v35, %s6850_s29  ;;  %4214 = vmatmul.mubr.msk.f32.gmra.mrb[12].mxu0 %vm1747_vm14, %v1717_v40  ;;  %v695_v40 = vrot.slane %v5520_v9, 2 }
 0x17e   : > { %v1130_v41 = vpop.permute.xlu0 %1129 }
 0x17f   : > { %v5478_v45 = vpop.permute.xlu1 %844  ;;  %v1620_v32 = vsel %vm1604_vm10, %v1587_v37, %v1130_v41  ;;  %v621_v37 = vrot.slane %v5605_v27, 1 }
 0x180   : > { %767 = vrot.lane.b32.xlu0 %v613_v35, %s4589_s21 }
 0x181   : > { %1421 = vrot.lane.b32.xlu1 %v691_v42, %s6849_s27 }
 0x182   : > { %v5482_v18 = vpop.permute.xlu0 %846 }
 0x183   : > { %v1224_v21 = vpop.permute.xlu1 %1223 }
 0x184   : > { %1143 = vrot.lane.b32.xlu0 %v691_v42, %s4593_s14  ;;  %v1652_v47 = vsel %vm1637_vm11, %v1619_v10, %v1224_v21  ;;  %v696_v21 = vsel %vm6841_vm2, %v694_v23, %v695_v40 }
 0x185   : > { %1049 = vrot.lane.b32.xlu1 %v615_v62, %s6850_s29 }
 0x186   : > { %v1226_v49 = vpop.permute.xlu0 %1225 }
 0x187   : > { %v5487_v3 = vpop.permute.xlu1 %939  ;;  %v1653_v57 = vsel %vm1637_vm11, %v1620_v32, %v1226_v49 }
 0x188   : > { %769 = vrot.lane.b32.xlu0 %v615_v62, %s4589_s21 }
 0x189   : > { %1423 = vrot.lane.b32.xlu1 %v693_v29, %s6849_s27 }
 0x18a   : > { %v5492_v31 = vpop.permute.xlu0 %941 }
 0x18b   : > { %v1317_v55 = vpop.permute.xlu1 %1316 }
 0x18c   : > { %1145 = vrot.lane.b32.xlu0 %v693_v29, %s4593_s14  ;;  %v1685_v52 = vsel %vm1670_vm12, %v1652_v47, %v1317_v55  ;;  %v698_v55 = vsel %vm6841_vm2, %v695_v40, %v697_v51  ;;  %v4598_v47 = vmov 1983009808  }
 0x18d   : > { %860 = vrot.lane.b32.xlu1 %v691_v42, %s6856_s24  ;;  %v2172_v6 = vunpack.c.l.s4 %v4598_v47 }
 0x18e   : > { %v1319_v60 = vpop.permute.xlu0 %1318 }
 0x18f   : > { %v5507_v14 = vpop.permute.xlu1 %1035  ;;  %v1686_v42 = vsel %vm1670_vm12, %v1653_v57, %v1319_v60  ;;  %v5587_v60 = vld [vmem:[%s6826_s2] ss:$0 sm:$0xff] }
 0x190   : > { %v5511_v36 = vpop.f32.mrb[0].mxu0  ;;  %862 = vrot.lane.b32.xlu0 %v693_v29, %s6856_s24 }
 0x191   : > { %1239 = vrot.lane.b32.xlu1 %v5503_v24, %s4594_s16  ;;  %v5517_v39 = vpop.f32.mrb[1].mxu0 }
 0x192   : > { %v5523_v50 = vpop.permute.xlu0 %755  ;;  %v1915_v58 = vadd.f32 %v5587_v60, %v5517_v39  ;;  %v5615_v39 = vsel %vm394_vm0, %v434_v48, %v435_v38 }
 0x193   : > { %v1410_v28 = vpop.permute.xlu1 %1409 }
 0x194   : > { %v1718_v35 = vsel %vm6853_vm13, %v1685_v52, %v1410_v28  ;;  %1241 = vrot.lane.b32.xlu0 %v5520_v9, %s4594_s16  ;;  %v1490_v52 = vsel %vm1474_vm6, %v5098_v53, %v5438_v34  ;;  %v1920_v28 = vadd.f32 %v5511_v36, %v5587_v60  ;;  %v2173_v34 = vunpack.c.0.s8 %v2172_v6 }
 0x195   : > { %955 = vrot.lane.b32.xlu1 %v5503_v24, %s4591_s28  ;;  %4216 = vmatprep.mubr.msk.f32.mxu0 %vm1747_vm14, %v1718_v35  ;;  %v1522_v35 = vsel %vm6848_vm7, %v1490_v52, %v5478_v45  ;;  %v2175_v45 = vshrl.u32 %v2174_v4, 7  ;;  %v2073_v23 = vmax.f32 %v1915_v58, 0.0 }
 0x196   : > { %v5540_v62 = vpop.permute.xlu0 %1131  ;;  %v2074_v32 = vmax.f32 %v1920_v28, 0.0 }
 0x197   : > { %v5545_v56 = vpop.permute.xlu1 %1037  ;;  %v2106_v47 = vsel %vm6839_vm15, %v2073_v23, -inf }
 0x198   : > { %957 = vrot.lane.b32.xlu0 %v5520_v9, %s4591_s28 }
 0x199   : > { %1332 = vrot.lane.b32.xlu1 %v618_v17, %s4596_s23 }
 0x19a   : > { %v5555_v61 = vpop.permute.xlu0 %757 }
 0x19b   : > { %v1412_v12 = vpop.permute.xlu1 %1411 }
 0x19c   : > { %v1719_v43 = vsel %vm6853_vm13, %v1686_v42, %v1412_v12  ;;  %1334 = vrot.lane.b32.xlu0 %v620_v15, %s4596_s23 }
 0x19d   : > { %1051 = vrot.lane.b32.xlu1 %v618_v17, %s6850_s29  ;;  %4217 = vmatmul.mubr.msk.f32.gmra.mrb[14].mxu0 %vm1747_vm14, %v1719_v43  ;;  %v5629_v43 = vsel %vm394_vm0, %v435_v38, 0.0 }
 0x19e   : > { %v5564_v41 = vpop.permute.xlu0 %1133 }
 0x19f   : > { %v5567_v49 = vpop.permute.xlu1 %848 }
 0x1a0   : > { %771 = vrot.lane.b32.xlu0 %v618_v17, %s4589_s21  ;;  %v1555_v17 = vsel %vm6847_vm8, %v1522_v35, %v5487_v3 }
 0x1a1   : > { %1425 = vrot.lane.b32.xlu1 %v696_v21, %s6849_s27  ;;  %v1588_v36 = vsel %vm1571_vm9, %v1555_v17, %v5507_v14  ;;  %v622_v14 = vrot.slane %v5615_v39, 1 }
 0x1a2   : > { %v5571_v29 = vpop.permute.xlu0 %850  ;;  %v1621_v3 = vsel %vm1604_vm10, %v1588_v36, %v5540_v62  ;;  %v6838_v36 = vrot.slane %v5615_v39, 2 }
 0x1a3   : > { %v1228_v8 = vpop.permute.xlu1 %1227  ;;  %v623_v52 = vsel %vm553_vm1, %v621_v37, %v622_v14 }
 0x1a4   : > { %1147 = vrot.lane.b32.xlu0 %v696_v21, %s4593_s14  ;;  %v1654_v40 = vsel %vm1637_vm11, %v1621_v3, %v1228_v8  ;;  %v2109_v8 = vsel %vm6839_vm15, %v2074_v32, -inf }
 0x1a5   : > { %1053 = vrot.lane.b32.xlu1 %v620_v15, %s6850_s29 }
 0x1a6   : > { %v5575_v26 = vpop.permute.xlu0 %1229 }
 0x1a7   : > { %v5578_v46 = vpop.permute.xlu1 %943 }
 0x1a8   : > { %773 = vrot.lane.b32.xlu0 %v620_v15, %s4589_s21 }
 0x1a9   : > { %1427 = vrot.lane.b32.xlu1 %v698_v55, %s6849_s27 }
 0x1aa   : > { %v5589_v44 = vpop.permute.xlu0 %945 }
 0x1ab   : > { %v1321_v10 = vpop.permute.xlu1 %1320 }
 0x1ac   : > { %1149 = vrot.lane.b32.xlu0 %v698_v55, %s4593_s14  ;;  %v1687_v62 = vsel %vm1670_vm12, %v1654_v40, %v1321_v10  ;;  %v624_v10 = vrot.slane %v5629_v43, 1 }
 0x1ad   : > { %864 = vrot.lane.b32.xlu1 %v696_v21, %s6856_s24 }
 0x1ae   : > { %v5602_v11 = vpop.permute.xlu0 %1322  ;;  %v5658_v37 = vsel %vm553_vm1, %v622_v14, %v624_v10 }
 0x1af   : > { %v5609_v53 = vpop.permute.xlu1 %1039 }
 0x1b0   : > { %v4200_v20 = vpop.f32.mrb[2].mxu0  ;;  %866 = vrot.lane.b32.xlu0 %v698_v55, %s6856_s24  ;;  %v5632_v55 = vsub.s32 %v2173_v34, %v2175_v45  ;;  %v699_v34 = vrot.slane %v5605_v27, 2 }
 0x1b1   : > { %v1930_v15 = vadd.f32 %v4200_v20, %v5587_v60  ;;  %1243 = vrot.lane.b32.xlu1 %v5605_v27, %s4594_s16  ;;  %v1924_v57 = vpop.f32.mrb[3].mxu0 }
 0x1b2   : > { %v1925_v42 = vadd.f32 %v5587_v60, %v1924_v57  ;;  %v5626_v12 = vpop.permute.xlu0 %759 }
 0x1b3   : > { %v2076_v21 = vmax.f32 %v1930_v15, 0.0  ;;  %v1414_v51 = vpop.permute.xlu1 %1413 }
 0x1b4   : > { %v2075_v25 = vmax.f32 %v1925_v42, 0.0  ;;  %v1720_v63 = vsel %vm6853_vm13, %v1687_v62, %v1414_v51  ;;  %1245 = vrot.lane.b32.xlu0 %v5615_v39, %s4594_s16 }
 0x1b5   : > { %v2110_v48 = vsel %vm6839_vm15, %v2076_v21, -inf  ;;  %959 = vrot.lane.b32.xlu1 %v5605_v27, %s4591_s28  ;;  %4219 = vmatprep.mubr.msk.f32.mxu0 %vm1747_vm14, %v1720_v63  ;;  %v5676_v63 = vsel %vm6841_vm2, %v699_v34, %v6838_v36 }
 0x1b6   : > { %v2111_v6 = vmax.f32 %v2109_v8, %v2110_v48  ;;  %v2107_v4 = vsel %vm6839_vm15, %v2075_v25, -inf  ;;  %v5645_v38 = vpop.permute.xlu0 %1135  ;;  %vm6846_vm15 = vcmask 1044484  }
 0x1b7   : > { %v2108_v28 = vmax.f32 %v2106_v47, %v2107_v4  ;;  %v5648_v35 = vpop.permute.xlu1 %1041 }
 0x1b8   : > { %v2187_v58 = vcombine.high %v2111_v6, %v2111_v6  ;;  %v2194_v17 = vrot.slane %v2111_v6, %v5632_v55  ;;  %961 = vrot.lane.b32.xlu0 %v5615_v39, %s4591_s28  ;;  %v1491_v6 = vsel %vm1474_vm6, %v5111_v13, %v5468_v33 }
 0x1b9   : > { %v2170_v20 = vcombine.high %v2108_v28, %v2108_v28  ;;  %v2177_v45 = vrot.slane %v2108_v28, %v5632_v55  ;;  %1336 = vrot.lane.b32.xlu1 %v623_v52, %s4596_s23  ;;  %v1523_v34 = vsel %vm6848_vm7, %v1491_v6, %v5482_v18 }
 0x1ba   : > { %v5661_v32 = vrot.slane %v2187_v58, %v5632_v55  ;;  %v2202_v3 = vcombine.high %v2194_v17, %v2194_v17  ;;  %v2535_v15 = vsel %vm6840_vm3, %v2194_v17, -inf  ;;  %v5664_v57 = vpop.permute.xlu0 %761  ;;  %v1556_v13 = vsel %vm6847_vm8, %v1523_v34, %v5492_v31 }
 0x1bb   : > { %v2536_v23 = vrot.slane %v2535_v15, 4  ;;  %v2184_v40 = vrot.slane %v2170_v20, %v5632_v55  ;;  %v2185_v42 = vcombine.high %v2177_v45, %v2177_v45  ;;  %v2507_v62 = vsel %vm6840_vm3, %v2177_v45, -inf  ;;  %v1416_v21 = vpop.permute.xlu1 %1415 }
 0x1bc   : > { %v2542_v51 = vsel %vm6840_vm3, %v2202_v3, -inf  ;;  %v2549_v14 = vsel %vm6840_vm3, %v5661_v32, -inf  ;;  %v2508_v25 = vrot.slane %v2507_v62, 4  ;;  %1338 = vrot.lane.b32.xlu0 %v5658_v37, %s4596_s23 }
 0x1bd   : > { %v2537_v8 = vmax.f32 %v2535_v15, %v2536_v23  ;;  %v2543_v48 = vrot.slane %v2542_v51, 4  ;;  %v2550_v10 = vrot.slane %v2549_v14, 4  ;;  %v2186_v47 = vcombine.high %v2184_v40, %v2184_v40  ;;  %1055 = vrot.lane.b32.xlu1 %v623_v52, %s6850_s29 }
 0x1be   : > { %v2509_v4 = vmax.f32 %v2507_v62, %v2508_v25  ;;  %v2514_v28 = vsel %vm6840_vm3, %v2185_v42, -inf  ;;  %v2521_v58 = vsel %vm6840_vm3, %v2184_v40, -inf  ;;  %v5684_v17 = vpop.permute.xlu0 %1137  ;;  %v1589_v25 = vsel %vm1571_vm9, %v1556_v13, %v5545_v56 }
 0x1bf   : > { %v2544_v20 = vmax.f32 %v2542_v51, %v2543_v48  ;;  %v2551_v45 = vmax.f32 %v2549_v14, %v2550_v10  ;;  %v5688_v3 = vpop.permute.xlu1 %852  ;;  %v2515_v23 = vrot.slane %v2514_v28, 4  ;;  %v2522_v0 = vrot.slane %v2521_v58, 4 }
 0x1c0   : > { %v2510_v15 = vrot.slane %v2509_v4, 2  ;;  %v2528_v36 = vsel %vm6840_vm3, %v2186_v47, -inf  ;;  %775 = vrot.lane.b32.xlu0 %v623_v52, %s4589_s21  ;;  %v2538_v33 = vrot.slane %v2537_v8, 2  ;;  %v702_v52 = vrot.slane %v5629_v43, 2 }
 0x1c1   : > { %v2545_v40 = vrot.slane %v2544_v20, 2  ;;  %1429 = vrot.lane.b32.xlu1 %v5676_v63, %s6849_s27  ;;  %v2516_v42 = vmax.f32 %v2514_v28, %v2515_v23  ;;  %v2523_v62 = vmax.f32 %v2521_v58, %v2522_v0  ;;  %v2529_v51 = vrot.slane %v2528_v36, 4 }
 0x1c2   : > { %v2511_v18 = vmax.f32 %v2509_v4, %v2510_v15  ;;  %v5696_v14 = vpop.permute.xlu0 %854  ;;  %v2552_v48 = vrot.slane %v2551_v45, 2  ;;  %v1622_v31 = vsel %vm1604_vm10, %v1589_v25, %v5564_v41  ;;  %v2539_v4 = vmax.f32 %v2537_v8, %v2538_v33 }
 0x1c3   : > { %v5700_v10 = vpop.permute.xlu1 %1231  ;;  %v2517_v47 = vrot.slane %v2516_v42, 2  ;;  %v2524_v6 = vrot.slane %v2523_v62, 2  ;;  %v2530_v34 = vmax.f32 %v2528_v36, %v2529_v51  ;;  %v1655_v0 = vsel %vm1637_vm11, %v1622_v31, %v5575_v26 }
 0x1c4   : > { %1151 = vrot.lane.b32.xlu0 %v5676_v63, %s4593_s14  ;;  %v2546_v28 = vmax.f32 %v2544_v20, %v2545_v40  ;;  %v2512_v56 = vrot.slane %v2511_v18, 1  ;;  %v1688_v36 = vsel %vm1670_vm12, %v1655_v0, %v5602_v11  ;;  %v2553_v23 = vmax.f32 %v2551_v45, %v2552_v48  ;;  %v359_v11 = vld [vmem:[%s4730_s26 + $0xe8] sm:$0xff] }
 0x1c5   : > { %1057 = vrot.lane.b32.xlu1 %v5658_v37, %s6850_s29  ;;  %v2518_v43 = vmax.f32 %v2516_v42, %v2517_v47  ;;  %v2525_v58 = vmax.f32 %v2523_v62, %v2524_v6  ;;  %v2531_v15 = vrot.slane %v2530_v34, 2  ;;  %v6857_v26 = vrot.slane %v5615_v39, 2  ;;  %v358_v62 = vld [vmem:[%s4730_s26 + $0xe0] sm:$0xff] }
 0x1c6   : > { %v5711_v41 = vpop.permute.xlu0 %1233  ;;  %v1721_v42 = vsel %vm6853_vm13, %v1688_v36, %v1416_v21  ;;  %v2540_v51 = vrot.slane %v2539_v4, 1  ;;  %v2547_v25 = vrot.slane %v2546_v28, 1  ;;  %v2513_v45 = vmax.f32 %v2511_v18, %v2512_v56 }
 0x1c7   : > { %v5715_v13 = vpop.permute.xlu1 %947  ;;  %v703_v8 = vsel %vm6841_vm2, %v6857_v26, %v702_v52  ;;  %v2519_v20 = vrot.slane %v2518_v43, 1  ;;  %v2526_v33 = vrot.slane %v2525_v58, 1  ;;  %v2532_v40 = vmax.f32 %v2530_v34, %v2531_v15  ;;  %4220 = vmatmul.mubr.msk.f32.gmra.mrb[16].mxu0 %vm1747_vm14, %v1721_v42 }
 0x1c8   : > { %777 = vrot.lane.b32.xlu0 %v5658_v37, %s4589_s21  ;;  %v2554_v21 = vrot.slane %v2553_v23, 1  ;;  %v437_v37 = vrot.slane %v358_v62, 7  ;;  %v438_v15 = vrot.slane %v359_v11, 7  ;;  %vm6845_vm3 = vcmask 1045509  }
 0x1c9   : > { %v2520_v48 = vmax.f32 %v2518_v43, %v2519_v20  ;;  %v2527_v31 = vmax.f32 %v2525_v58, %v2526_v33  ;;  %v2533_v52 = vrot.slane %v2532_v40, 1  ;;  %1431 = vrot.lane.b32.xlu1 %v703_v8, %s6849_s27  ;;  %v1492_v18 = vsel %vm1474_vm6, %v5179_v54, %v5523_v50 }
 0x1ca   : > { %v5727_v47 = vpop.permute.xlu0 %949  ;;  %v2541_v56 = vmax.f32 %v2539_v4, %v2540_v51  ;;  %vm6844_vm2 = vcmask 1046534   ;;  %v1524_v58 = vsel %vm6848_vm7, %v1492_v18, %v5567_v49  ;;  %v2548_v36 = vmax.f32 %v2546_v28, %v2547_v25 }
 0x1cb   : > { %v1325_v6 = vpop.permute.xlu1 %1324  ;;  %v2534_v34 = vmax.f32 %v2532_v40, %v2533_v52  ;;  %v3020_v0 = vsel %vm6842_vm4, %v2520_v48, %v2513_v45  ;;  %vm6843_vm4 = vcmask 1047559   ;;  %v1557_v33 = vsel %vm6847_vm8, %v1524_v58, %v5578_v46 }
 0x1cc   : > { %1153 = vrot.lane.b32.xlu0 %v703_v8, %s4593_s14  ;;  %v3022_v43 = vsel %vm3021_vm5, %v2527_v31, %v3020_v0  ;;  %v2555_v40 = vmax.f32 %v2553_v23, %v2554_v21  ;;  %v5745_v50 = vsel %vm394_vm0, 0.0, %v437_v37  ;;  %v1590_v49 = vsel %vm1571_vm9, %v1557_v33, %v5609_v53 }
 0x1cd   : > { %v3024_v26 = vsel %vm6846_vm15, %v2534_v34, %v3022_v43  ;;  %868 = vrot.lane.b32.xlu1 %v5676_v63, %s6856_s24  ;;  %v1623_v46 = vsel %vm1604_vm10, %v1590_v49, %v5645_v38  ;;  %v5759_v42 = vsel %vm394_vm0, %v437_v37, %v438_v15  ;;  %v520_v51 = vsel %vm394_vm0, %v438_v15, 0.0 }
 0x1ce   : > { %v1327_v20 = vpop.permute.xlu0 %1326  ;;  %v3026_v4 = vsel %vm6845_vm3, %v2541_v56, %v3024_v26  ;;  %v1656_v53 = vsel %vm1637_vm11, %v1623_v46, %v5700_v10  ;;  %v626_v11 = vrot.slane %v5745_v50, 1  ;;  %v627_v45 = vrot.slane %v5759_v42, 1  ;;  %v361_v46 = vld [vmem:[%s4730_s26 + $0xf8] sm:$0xff] }
 0x1cf   : > { %v5742_v54 = vpop.permute.xlu1 %1043  ;;  %v3028_v63 = vsel %vm6844_vm2, %v2548_v36, %v3026_v4  ;;  %v1689_v38 = vsel %vm1670_vm12, %v1656_v53, %v1325_v6  ;;  %v1493_v10 = vsel %vm1474_vm6, %v5192_v16, %v5555_v61  ;;  %v629_v31 = vrot.slane %v520_v51, 1 }
 0x1d0   : > { %v5750_v28 = vpop.f32.mrb[4].mxu0  ;;  %870 = vrot.lane.b32.xlu0 %v703_v8, %s6856_s24  ;;  %v5762_v62 = vsel %vm6843_vm4, %v2555_v40, %v3028_v63  ;;  %v1525_v52 = vsel %vm6848_vm7, %v1493_v10, %v5571_v29  ;;  %v628_v34 = vsel %vm553_vm1, %v626_v11, %v627_v45  ;;  %v705_v56 = vrot.slane %v5759_v42, 2 }
 0x1d1   : > { %v5756_v23 = vpop.f32.mrb[5].mxu0  ;;  %1247 = vrot.lane.b32.xlu1 %v5745_v50, %s4594_s16  ;;  %v1558_v6 = vsel %vm6847_vm8, %v1525_v52, %v5589_v44  ;;  %v630_v29 = vsel %vm553_vm1, %v627_v45, %v629_v31  ;;  %vm6858_vm4 = vcmask 1045504   ;;  %v2203_v36 = vcombine.high %v5661_v32, %v5661_v32  ;;  %v360_v32 = vld [vmem:[%s4730_s26 + $0xf0] sm:$0xff]  ;;  %s4600_s26 = smov 16  }
 0x1d2   : > { %v5768_v8 = vpop.permute.xlu0 %763  ;;  %v1591_v16 = vsel %vm1571_vm9, %v1558_v6, %v5648_v35  ;;  %v704_v35 = vrot.slane %v5745_v50, 2  ;;  %v707_v33 = vrot.slane %v520_v51, 2  ;;  %vm6859_vm2 = vcmask 123904  }
 0x1d3   : > { %v1418_v25 = vpop.permute.xlu1 %1417  ;;  %v1624_v61 = vsel %vm1604_vm10, %v1591_v16, %v5684_v17  ;;  %v2556_v40 = vsel %vm6859_vm2, %v2203_v36, -inf  ;;  %v441_v11 = vrot.slane %v361_v46, 7  ;;  %v1940_v10 = vadd.f32 %v5750_v28, %v5587_v60 }
 0x1d4   : > { %v1722_v48 = vsel %vm6853_vm13, %v1689_v38, %v1418_v25  ;;  %1249 = vrot.lane.b32.xlu0 %v5759_v42, %s4594_s16  ;;  %v1657_v0 = vsel %vm1637_vm11, %v1624_v61, %v5711_v41  ;;  %v706_v58 = vsel %vm6858_vm4, %v704_v35, %v705_v56  ;;  %v708_v63 = vsel %vm6858_vm4, %v705_v56, %v707_v33 }
 0x1d5   : > { %4222 = vmatprep.mubr.msk.f32.mxu0 %vm1747_vm14, %v1722_v48  ;;  %963 = vrot.lane.b32.xlu1 %v5745_v50, %s4591_s28  ;;  %v1690_v15 = vsel %vm1670_vm12, %v1657_v0, %v1327_v20  ;;  %v2557_v53 = vrot.slane %v2556_v40, 4  ;;  %v440_v25 = vrot.slane %v360_v32, 7  ;;  %v1494_v48 = vsel %vm1474_vm6, %v5260_v59, %v5626_v12 }
 0x1d6   : > { %v5785_v21 = vpop.permute.xlu0 %1139  ;;  %v1526_v31 = vsel %vm6848_vm7, %v1494_v48, %v5688_v3  ;;  %v1935_v52 = vadd.f32 %v5587_v60, %v5756_v23  ;;  %v521_v28 = vsel %vm394_vm0, %v441_v11, 0.0  ;;  %vm6860_vm2 = vcmask 130048  }
 0x1d7   : > { %v5789_v37 = vpop.permute.xlu1 %1045  ;;  %v2558_v45 = vmax.f32 %v2556_v40, %v2557_v53  ;;  %v505_v59 = vsel %vm394_vm0, 0.0, %v440_v25  ;;  %v442_v12 = vsel %vm394_vm0, %v440_v25, %v441_v11  ;;  %v714_v36 = vrot.slane %v521_v28, 1  ;;  %vm6861_vm4 = vmmov %vm6860_vm2 }
 0x1d8   : > { %965 = vrot.lane.b32.xlu0 %v5759_v42, %s4591_s28  ;;  %v711_v23 = vrot.slane %v505_v59, 1  ;;  %v2077_v56 = vmax.f32 %v1935_v52, 0.0  ;;  %v717_v46 = vrot.slane %v442_v12, 2  ;;  %v719_v25 = vrot.slane %v521_v28, 2  ;;  %vm6862_vm3 = vmmov %vm6860_vm2 }
 0x1d9   : > { %1340 = vrot.lane.b32.xlu1 %v628_v34, %s4596_s23  ;;  %v2559_v0 = vrot.slane %v2558_v45, 2  ;;  %vm6863_vm15 = vmmov %vm6860_vm2 }
 0x1da   : > { %v5802_v44 = vpop.permute.xlu0 %765 }
 0x1db   : > { %v1420_v18 = vpop.permute.xlu1 %1419 }
 0x1dc   : > { %v1723_v43 = vsel %vm6853_vm13, %v1690_v15, %v1420_v18  ;;  %1342 = vrot.lane.b32.xlu0 %v630_v29, %s4596_s23  ;;  %v2078_v15 = vmax.f32 %v1940_v10, 0.0  ;;  %v2112_v10 = vsel %vm6862_vm3, %v2077_v56, -inf  ;;  %vm6866_vm3 = vcmask 123904  }
 0x1dd   : > { %4223 = vmatmul.mubr.msk.f32.gmra.mrb[18].mxu0 %vm1747_vm14, %v1723_v43  ;;  %1059 = vrot.lane.b32.xlu1 %v628_v34, %s6850_s29 }
 0x1de   : > { %v5811_v17 = vpop.permute.xlu0 %1141  ;;  %v2115_v11 = vsel %vm6860_vm2, %v2078_v15, -inf  ;;  %vm6864_vm2 = vcmask 1045504  }
 0x1df   : > { %v5813_v41 = vpop.permute.xlu1 %856 }
 0x1e0   : > { %779 = vrot.lane.b32.xlu0 %v628_v34, %s4589_s21  ;;  %v1559_v34 = vsel %vm6847_vm8, %v1526_v31, %v5715_v13 }
 0x1e1   : > { %1433 = vrot.lane.b32.xlu1 %v706_v58, %s6849_s27  ;;  %v1592_v3 = vsel %vm1571_vm9, %v1559_v34, %v5742_v54 }
 0x1e2   : > { %v5820_v26 = vpop.permute.xlu0 %858  ;;  %v1625_v13 = vsel %vm1604_vm10, %v1592_v3, %v5785_v21 }
 0x1e3   : > { %v1236_v20 = vpop.permute.xlu1 %1235 }
 0x1e4   : > { %1155 = vrot.lane.b32.xlu0 %v706_v58, %s4593_s14  ;;  %v1658_v43 = vsel %vm1637_vm11, %v1625_v13, %v1236_v20  ;;  %v2560_v20 = vmax.f32 %v2558_v45, %v2559_v0  ;;  %v1495_v0 = vsel %vm1474_vm6, %v5273_v19, %v5664_v57 }
 0x1e5   : > { %1061 = vrot.lane.b32.xlu1 %v630_v29, %s6850_s29 }
 0x1e6   : > { %v5825_v4 = vpop.permute.xlu0 %1237 }
 0x1e7   : > { %v5827_v49 = vpop.permute.xlu1 %951 }
 0x1e8   : > { %781 = vrot.lane.b32.xlu0 %v630_v29, %s4589_s21  ;;  %v712_v29 = vrot.slane %v442_v12, 1  ;;  %s4599_s21 = smov 32  }
 0x1e9   : > { %1435 = vrot.lane.b32.xlu1 %v708_v63, %s6849_s27 }
 0x1ea   : > { %v5834_v51 = vpop.permute.xlu0 %953  ;;  %v713_v45 = vsel %vm553_vm1, %v711_v23, %v712_v29  ;;  %v715_v28 = vsel %vm553_vm1, %v712_v29, %v714_v36  ;;  %v1527_v23 = vsel %vm6848_vm7, %v1495_v0, %v5696_v14 }
 0x1eb   : > { %v1329_v38 = vpop.permute.xlu1 %1328  ;;  %v1560_v56 = vsel %vm6847_vm8, %v1527_v23, %v5727_v47 }
 0x1ec   : > { %1157 = vrot.lane.b32.xlu0 %v708_v63, %s4593_s14  ;;  %v1691_v33 = vsel %vm1670_vm12, %v1658_v43, %v1329_v38  ;;  %v1593_v0 = vsel %vm1571_vm9, %v1560_v56, %v5789_v37 }
 0x1ed   : > { %872 = vrot.lane.b32.xlu1 %v706_v58, %s6856_s24 }
 0x1ee   : > { %v5847_v6 = vpop.permute.xlu0 %1330 }
 0x1ef   : > { %v5851_v16 = vpop.permute.xlu1 %1047 }
 0x1f0   : > { %v4206_v61 = vpop.f32.mrb[6].mxu0  ;;  %874 = vrot.lane.b32.xlu0 %v708_v63, %s6856_s24  ;;  %v716_v63 = vrot.slane %v505_v59, 2  ;;  %s4610_s24 = smov 28  }
 0x1f1   : > { %v1950_v18 = vadd.f32 %v4206_v61, %v5587_v60  ;;  %v1944_v35 = vpop.f32.mrb[7].mxu0  ;;  %1251 = vrot.lane.b32.xlu1 %v505_v59, %s4594_s16 }
 0x1f2   : > { %v1945_v54 = vadd.f32 %v5587_v60, %v1944_v35  ;;  %v5865_v58 = vpop.permute.xlu0 %767  ;;  %v5883_v61 = vsel %vm6864_vm2, %v716_v63, %v717_v46 }
 0x1f3   : > { %v2080_v40 = vmax.f32 %v1950_v18, 0.0  ;;  %v1422_v32 = vpop.permute.xlu1 %1421  ;;  %v2561_v18 = vrot.slane %v2560_v20, 1 }
 0x1f4   : > { %v2079_v21 = vmax.f32 %v1945_v54, 0.0  ;;  %v1724_v53 = vsel %vm6853_vm13, %v1691_v33, %v1422_v32  ;;  %1253 = vrot.lane.b32.xlu0 %v442_v12, %s4594_s16 }
 0x1f5   : > { %v2116_v48 = vsel %vm6861_vm4, %v2080_v40, -inf  ;;  %4225 = vmatprep.mubr.msk.f32.mxu0 %vm1747_vm14, %v1724_v53  ;;  %967 = vrot.lane.b32.xlu1 %v505_v59, %s4591_s28  ;;  %vm6867_vm4 = vmmov %vm6866_vm3 }
 0x1f6   : > { %v2117_v38 = vmax.f32 %v2115_v11, %v2116_v48  ;;  %v2113_v31 = vsel %vm6863_vm15, %v2079_v21, -inf  ;;  %v5876_v52 = vpop.permute.xlu0 %1143  ;;  %vm6865_vm15 = vmmov %vm6864_vm2 }
 0x1f7   : > { %v2114_v34 = vmax.f32 %v2112_v10, %v2113_v31  ;;  %v5878_v3 = vpop.permute.xlu1 %1049  ;;  %v5891_v59 = vsel %vm6865_vm15, %v717_v46, %v719_v25  ;;  %vm6868_vm2 = vmmov %vm6866_vm3 }
 0x1f8   : > { %v2221_v15 = vcombine.high %v2117_v38, %v2117_v38  ;;  %v2228_v13 = vrot.slane %v2117_v38, %v5632_v55  ;;  %969 = vrot.lane.b32.xlu0 %v442_v12, %s4591_s28  ;;  %vm6869_vm15 = vmmov %vm6868_vm2  ;;  %s4601_s28 = smov 48  }
 0x1f9   : > { %v2204_v29 = vcombine.high %v2114_v34, %v2114_v34  ;;  %v2211_v35 = vrot.slane %v2114_v34, %v5632_v55  ;;  %1344 = vrot.lane.b32.xlu1 %v713_v45, %s4596_s23  ;;  %vm6871_vm8 = vmmov %vm6868_vm2 }
 0x1fa   : > { %v2235_v19 = vrot.slane %v2221_v15, %v5632_v55  ;;  %v2236_v57 = vcombine.high %v2228_v13, %v2228_v13  ;;  %v2591_v43 = vsel %vm6866_vm3, %v2228_v13, -inf  ;;  %v5901_v12 = vpop.permute.xlu0 %769  ;;  %vm6870_vm3 = vmmov %vm6868_vm2 }
 0x1fb   : > { %v2592_v54 = vrot.slane %v2591_v43, 4  ;;  %v2218_v36 = vrot.slane %v2204_v29, %v5632_v55  ;;  %v2219_v33 = vcombine.high %v2211_v35, %v2211_v35  ;;  %v2563_v14 = vsel %vm6867_vm4, %v2211_v35, -inf  ;;  %v1424_v40 = vpop.permute.xlu1 %1423  ;;  %vm6872_vm7 = vmmov %vm6868_vm2 }
 0x1fc   : > { %v2237_v63 = vcombine.high %v2235_v19, %v2235_v19  ;;  %v2598_v32 = vsel %vm6868_vm2, %v2236_v57, -inf  ;;  %v2605_v47 = vsel %vm6869_vm15, %v2235_v19, -inf  ;;  %v2564_v46 = vrot.slane %v2563_v14, 4  ;;  %1346 = vrot.lane.b32.xlu0 %v715_v28, %s4596_s23  ;;  %vm6873_vm4 = vmmov %vm6868_vm2 }
 0x1fd   : > { %v2593_v21 = vmax.f32 %v2591_v43, %v2592_v54  ;;  %v2599_v53 = vrot.slane %v2598_v32, 4  ;;  %v2606_v25 = vrot.slane %v2605_v47, 4  ;;  %v2220_v11 = vcombine.high %v2218_v36, %v2218_v36  ;;  %1063 = vrot.lane.b32.xlu1 %v713_v45, %s6850_s29 }
 0x1fe   : > { %v2612_v48 = vsel %vm6870_vm3, %v2237_v63, -inf  ;;  %v2565_v10 = vmax.f32 %v2563_v14, %v2564_v46  ;;  %v2570_v38 = vsel %vm6871_vm8, %v2219_v33, -inf  ;;  %v2577_v31 = vsel %vm6872_vm7, %v2218_v36, -inf  ;;  %v5912_v34 = vpop.permute.xlu0 %1145 }
 0x1ff   : > { %v2600_v15 = vmax.f32 %v2598_v32, %v2599_v53  ;;  %v2607_v13 = vmax.f32 %v2605_v47, %v2606_v25  ;;  %v5916_v23 = vpop.permute.xlu1 %860  ;;  %v2562_v29 = vmax.f32 %v2560_v20, %v2561_v18  ;;  %v2571_v19 = vrot.slane %v2570_v38, 4 }
 0x200   : > { %v2566_v35 = vrot.slane %v2565_v10, 2  ;;  %v2578_v57 = vrot.slane %v2577_v31, 4  ;;  %v2584_v43 = vsel %vm6873_vm4, %v2220_v11, -inf  ;;  %1065 = vrot.lane.b32.xlu0 %v715_v28, %s6850_s29  ;;  %v1626_v45 = vsel %vm1604_vm10, %v1593_v0, %v5811_v17  ;;  %s4605_s29 = smov 96  }
 0x201   : > { %v2594_v54 = vrot.slane %v2593_v21, 2  ;;  %v2601_v36 = vrot.slane %v2600_v15, 2  ;;  %v2613_v33 = vrot.slane %v2612_v48, 4  ;;  %v2572_v37 = vmax.f32 %v2570_v38, %v2571_v19  ;;  %1437 = vrot.lane.b32.xlu1 %v5883_v61, %s6849_s27 }
 0x202   : > { %v2567_v14 = vmax.f32 %v2565_v10, %v2566_v35  ;;  %v2579_v56 = vmax.f32 %v2577_v31, %v2578_v57  ;;  %v2585_v63 = vrot.slane %v2584_v43, 4  ;;  %v5924_v20 = vpop.permute.xlu0 %862  ;;  %v1659_v18 = vsel %vm1637_vm11, %v1626_v45, %v5825_v4 }
 0x203   : > { %v2608_v32 = vrot.slane %v2607_v13, 2  ;;  %v5928_v28 = vpop.permute.xlu1 %1239  ;;  %v5932_v17 = vsel %vm394_vm0, 0.0, %v5762_v62  ;;  %v3097_v47 = vsel %vm394_vm0, %v2562_v29, 0.0  ;;  %v1692_v46 = vsel %vm1670_vm12, %v1659_v18, %v5847_v6 }
 0x204   : > { %v2573_v53 = vrot.slane %v2572_v37, 2  ;;  %v2580_v25 = vrot.slane %v2579_v56, 2  ;;  %v2586_v11 = vmax.f32 %v2584_v43, %v2585_v63  ;;  %1439 = vrot.lane.b32.xlu0 %v5891_v59, %s6849_s27  ;;  %v2595_v10 = vmax.f32 %v2593_v21, %v2594_v54 }
 0x205   : > { %v2602_v4 = vmax.f32 %v2600_v15, %v2601_v36  ;;  %v2614_v38 = vmax.f32 %v2612_v48, %v2613_v33  ;;  %v1725_v31 = vsel %vm6853_vm13, %v1692_v46, %v1424_v40  ;;  %v2568_v0 = vrot.slane %v2567_v14, 1  ;;  %1159 = vrot.lane.b32.xlu1 %v5883_v61, %s4593_s14 }
 0x206   : > { %v2574_v35 = vmax.f32 %v2572_v37, %v2573_v53  ;;  %v2581_v62 = vmax.f32 %v2579_v56, %v2580_v25  ;;  %v2587_v19 = vrot.slane %v2586_v11, 2  ;;  %4226 = vmatmul.mubr.msk.f32.gmra.mrb[20].mxu0 %vm1747_vm14, %v1725_v31  ;;  %v5943_v6 = vpop.permute.xlu0 %1241  ;;  %v2609_v29 = vmax.f32 %v2607_v13, %v2608_v32 }
 0x207   : > { %v5945_v57 = vpop.permute.xlu1 %955  ;;  %v3140_v21 = vrot.slane %v5932_v17, 2  ;;  %v6874_v40 = vmov 0.0   ;;  %v3141_v45 = vrot.slane %v3097_v47, 2  ;;  %v2596_v54 = vrot.slane %v2595_v10, 1 }
 0x208   : > { %v2575_v15 = vrot.slane %v2574_v35, 1  ;;  %v2582_v48 = vrot.slane %v2581_v62, 1  ;;  %v2588_v43 = vmax.f32 %v2586_v11, %v2587_v19  ;;  %1255 = vrot.lane.b32.xlu0 %v6874_v40, %s4594_s16  ;;  %v2603_v36 = vrot.slane %v2602_v4, 1  ;;  %s6851_s16 = smov 80  }
 0x209   : > { %v3119_v33 = vrot.slane %v5932_v17, 1  ;;  %v2615_v37 = vrot.slane %v2614_v38, 2  ;;  %v2569_v61 = vmax.f32 %v2567_v14, %v2568_v0  ;;  %1161 = vrot.lane.b32.xlu1 %v5891_v59, %s4593_s14  ;;  %v2610_v32 = vrot.slane %v2609_v29, 1  ;;  %s4602_s14 = smov 64  }
 0x20a   : > { %v2576_v56 = vmax.f32 %v2574_v35, %v2575_v15  ;;  %v2583_v63 = vmax.f32 %v2581_v62, %v2582_v48  ;;  %v2589_v13 = vrot.slane %v2588_v43, 1  ;;  %v5953_v18 = vpop.permute.xlu0 %957  ;;  %vm6875_vm7 = vcmask 1045504  }
 0x20b   : > { %v1333_v46 = vpop.permute.xlu1 %1332  ;;  %v5956_v53 = vsel %vm6875_vm7, %v3140_v21, %v3141_v45  ;;  %v3120_v25 = vrot.slane %v3097_v47, 1  ;;  %v2616_v11 = vmax.f32 %v2614_v38, %v2615_v37  ;;  %v1496_v31 = vsel %vm1474_vm6, %v5341_v5, %v5768_v8 }
 0x20c   : > { %v2590_v14 = vmax.f32 %v2588_v43, %v2589_v13  ;;  %vm6876_vm8 = vcmask 1042434   ;;  %1441 = vrot.lane.b32.xlu0 %v4724_v2, %s6849_s27  ;;  %v2597_v59 = vmax.f32 %v2595_v10, %v2596_v54  ;;  %vm6877_vm2 = vcmask 48128   ;;  %s4606_s27 = smov 112  }
 0x20d   : > { %v3031_v0 = vsel %vm6876_vm8, %v2576_v56, %v2569_v61  ;;  %v3121_v62 = vsel %vm553_vm1, %v3119_v33, %v3120_v25  ;;  %v2617_v19 = vrot.slane %v2616_v11, 1  ;;  %v1528_v47 = vsel %vm6877_vm2, %v1496_v31, %v5813_v41  ;;  %1348 = vrot.lane.b32.xlu1 %v4718_v1, %s4596_s23  ;;  %s6936_s23 = smov 80  }
 0x20e   : > { %v3032_v35 = vsel %vm3021_vm5, %v2583_v63, %v3031_v0  ;;  %v2604_v38 = vmax.f32 %v2602_v4, %v2603_v36  ;;  %v1335_v5 = vpop.permute.xlu0 %1334  ;;  %v4402_v8 = vpack.i.bf16 %v5956_v53, %v4724_v2  ;;  %vm6878_vm15 = vcmask 1044484  }
 0x20f   : > { %v3033_v21 = vsel %vm6878_vm15, %v2590_v14, %v3032_v35  ;;  %vm6879_vm3 = vcmask 72704   ;;  %v2611_v15 = vmax.f32 %v2609_v29, %v2610_v32  ;;  %v5975_v48 = vpop.permute.xlu1 %1051  ;;  %v2618_v43 = vmax.f32 %v2616_v11, %v2617_v19 }
 0x210   : > { %v1561_v10 = vsel %vm6879_vm3, %v1528_v47, %v5827_v49  ;;  %vm6880_vm4 = vcmask 1045509   ;;  %v5980_v4 = vpop.f32.mrb[8].mxu0  ;;  %4403 = vrot.lane.b32.xlu0 %v4402_v8, %s4599_s21  ;;  %v4397_v54 = vpack.i.bf16 %v3121_v62, %v4718_v1  ;;  %vm6881_vm7 = vcmask 1046534  }
 0x211   : > { %v3034_v45 = vsel %vm6880_vm4, %v2597_v59, %v3033_v21  ;;  %v1594_v41 = vsel %vm1571_vm9, %v1561_v10, %v5851_v16  ;;  %v5987_v29 = vpop.f32.mrb[9].mxu0  ;;  %vm6882_vm8 = vcmask 1047559   ;;  %v3098_v37 = vsel %vm394_vm0, %v2618_v43, 0.0 }
 0x212   : > { %v3035_v36 = vsel %vm6881_vm7, %v2604_v38, %v3034_v45  ;;  %v1627_v49 = vsel %vm1604_vm10, %v1594_v41, %v5876_v52  ;;  %4398 = vrot.lane.b32.xlu1 %v4397_v54, %s4600_s26  ;;  %v5994_v61 = vpop.permute.xlu0 %771  ;;  %v3144_v32 = vrot.slane %v3098_v37, 2  ;;  %v3123_v11 = vrot.slane %v3098_v37, 1  ;;  %v3402_v54 = vld [vmem:[%s6827_s3 + $0x18] sm:$0xff] }
 0x213   : > { %v3036_v33 = vsel %vm6882_vm8, %v2611_v15, %v3035_v36  ;;  %v1660_v16 = vsel %vm1637_vm11, %v1627_v49, %v5928_v28  ;;  %v1426_v52 = vpop.permute.xlu1 %1425  ;;  %v1497_v14 = vsel %vm1474_vm6, %v5354_v22, %v5802_v44  ;;  %vm6883_vm2 = vcmask 1045504   ;;  %v3400_v15 = vld [vmem:[%s6827_s3 + $0x8] sm:$0xff] }
 0x214   : > { %v5997_v56 = vsel %vm394_vm0, 0.0, %v3036_v33  ;;  %v1693_v63 = vsel %vm1670_vm12, %v1660_v16, %v1333_v46  ;;  %vm6884_vm15 = vcmask 48128   ;;  %vm6885_vm3 = vcmask 130048  }
 0x215   : > { %v3143_v13 = vrot.slane %v5997_v56, 2  ;;  %v1726_v25 = vsel %vm6853_vm13, %v1693_v63, %v1426_v52  ;;  %v4407_v28 = vpack.i.bf16 %v5997_v56, %v5932_v17  ;;  %v3122_v31 = vrot.slane %v5997_v56, 1  ;;  %vm6887_vm7 = vmmov %vm6884_vm15 }
 0x216   : > { %4228 = vmatprep.mubr.msk.f32.mxu0 %vm1747_vm14, %v1726_v25  ;;  %v1529_v46 = vsel %vm6884_vm15, %v1497_v14, %v5820_v26  ;;  %v1148_v35 = vpop.permute.xlu0 %1147  ;;  %vm6886_vm4 = vcmask 72704   ;;  %v4604_v45 = vmov 0.0|0.0   ;;  %v1498_v63 = vsel %vm1474_vm6, %v5422_v7, %v5865_v58 }
 0x217   : > { %v6009_v0 = vsel %vm6883_vm2, %v3143_v13, %v3144_v32  ;;  %4408 = vrot.lane.b32.xlu1 %v4407_v28, %s4601_s28  ;;  %v6018_v59 = vsel %vm553_vm1, %v3122_v31, %v3123_v11  ;;  %v1562_v22 = vsel %vm6886_vm4, %v1529_v46, %v5834_v51  ;;  %v6023_v19 = vpop.permute.xlu1 %1053  ;;  %4283 = vmatprep.subr.bf16.mxu1 %v4604_v45  ;;  %vm6888_vm8 = vmmov %vm6886_vm4 }
 0x218   : > { %4123 = vmatprep.mubr.msk.f32.mxu1 %vm6885_vm3, %v6009_v0  ;;  %v4412_v44 = vpack.i.bf16 %v6018_v59, %v3121_v62  ;;  %v1595_v26 = vsel %vm1571_vm9, %v1562_v22, %v5878_v3  ;;  %v4417_v47 = vpack.i.bf16 %v6009_v0, %v5956_v53  ;;  %4322 = vmatprep.subr.bf16.mxu0 %v4604_v45  ;;  %vm6889_vm2 = vmmov %vm6885_vm3 }
 0x219   : > { %v1628_v38 = vsel %vm1604_vm10, %v1595_v26, %v5912_v34  ;;  %v1960_v52 = vadd.f32 %v5980_v4, %v5587_v60  ;;  %v1530_v13 = vsel %vm6887_vm7, %v1498_v63, %v5916_v23  ;;  %v1955_v32 = vadd.f32 %v5587_v60, %v5987_v29  ;;  %vm6890_vm15 = vmmov %vm6889_vm2 }
 0x21a   : > { %4413 = vrot.lane.b32.xlu0 %v4412_v44, %s4602_s14  ;;  %v1661_v8 = vsel %vm1637_vm11, %v1628_v38, %v5943_v6  ;;  %v6035_v51 = vpop.permute.xlu0 %773  ;;  %v3399_v6 = vld [vmem:[%s6827_s3] sm:$0xff]  ;;  %v1563_v11 = vsel %vm6888_vm8, %v1530_v13, %v5945_v57  ;;  %vm6891_vm3 = vmmov %vm6889_vm2  ;;  %vm6893_vm7 = vcmask 123904  }
 0x21b   : > { %4418 = vrot.lane.b32.xlu1 %v4417_v47, %s6851_s16  ;;  %v1694_v62 = vsel %vm1670_vm12, %v1661_v8, %v1335_v5  ;;  %v1428_v3 = vpop.permute.xlu1 %1427  ;;  %v3401_v5 = vld [vmem:[%s6827_s3 + $0x10] sm:$0xff]  ;;  %v4284_v41 = vpack.c.bf16 %v3400_v15, %v3399_v6  ;;  %v1596_v31 = vsel %vm1571_vm9, %v1563_v11, %v5975_v48  ;;  %v2082_v58 = vmax.f32 %v1960_v52, 0.0  ;;  %vm6892_vm4 = vmmov %vm6889_vm2 }
 0x21c   : > { %v1727_v21 = vsel %vm6853_vm13, %v1694_v62, %v1428_v3  ;;  %v4287_v36 = vpack.c.bf16 %v3402_v54, %v3401_v5  ;;  %v1629_v4 = vsel %vm1604_vm10, %v1596_v31, %v1148_v35  ;;  %v2081_v46 = vmax.f32 %v1955_v32, 0.0  ;;  %vm6894_vm8 = vmmov %vm6893_vm7 }
 0x21d   : > { %4229 = vmatmul.mubr.msk.f32.gmra.mrb[22].mxu0 %vm1747_vm14, %v1727_v21  ;;  %4285 = vmatpush1.bf16.msra.mxu1 %v4284_v41  ;;  %v2121_v8 = vsel %vm6889_vm2, %v2082_v58, -inf  ;;  %vm6895_vm2 = vmmov %vm6893_vm7 }
 0x21e   : > { %v6040_v53 = vpop.permute.xlu0 %1149  ;;  %4286 = vmatprep.subr.bf16.mxu1 %v4604_v45  ;;  %v2118_v62 = vsel %vm6891_vm3, %v2081_v46, -inf  ;;  %vm6897_vm3 = vmmov %vm6895_vm2 }
 0x21f   : > { %v6042_v34 = vpop.permute.xlu1 %864 }
 0x221   : > { %4288 = vmatpush1.bf16.msra.mxu1 %v4287_v36  ;;  %v1499_v36 = vsel %vm1474_vm6, %v5435_v30, %v5901_v12 }
 0x222   : > { %v6044_v10 = vpop.permute.xlu0 %866  ;;  %4289 = vmatprep.subr.bf16.mxu1 %v4604_v45 }
 0x223   : > { %v1244_v43 = vpop.permute.xlu1 %1243 }
 0x224   : > { %v1662_v29 = vsel %vm1637_vm11, %v1629_v4, %v1244_v43 }
 0x226   : > { %v6060_v49 = vpop.permute.xlu0 %1245 }
 0x227   : > { %v6063_v33 = vpop.permute.xlu1 %959 }
 0x22a   : > { %v6065_v37 = vpop.permute.xlu0 %961 }
 0x22b   : > { %v1337_v16 = vpop.permute.xlu1 %1336 }
 0x22c   : > { %v1695_v57 = vsel %vm1670_vm12, %v1662_v29, %v1337_v16 }
 0x22e   : > { %v6077_v25 = vpop.permute.xlu0 %1338 }
 0x22f   : > { %v6081_v28 = vpop.permute.xlu1 %1055 }
 0x230   : > { %v4212_v7 = vpop.f32.mrb[10].mxu0 }
 0x231   : > { %v1970_v14 = vadd.f32 %v4212_v7, %v5587_v60  ;;  %v1964_v23 = vpop.f32.mrb[11].mxu0 }
 0x232   : > { %v1965_v22 = vadd.f32 %v5587_v60, %v1964_v23  ;;  %v6089_v44 = vpop.permute.xlu0 %775 }
 0x233   : > { %v2084_v26 = vmax.f32 %v1970_v14, 0.0  ;;  %v1430_v47 = vpop.permute.xlu1 %1429 }
 0x234   : > { %v2083_v38 = vmax.f32 %v1965_v22, 0.0  ;;  %v1728_v48 = vsel %vm6853_vm13, %v1695_v57, %v1430_v47 }
 0x235   : > { %v2122_v35 = vsel %vm6890_vm15, %v2084_v26, -inf  ;;  %4231 = vmatprep.mubr.msk.f32.mxu0 %vm1747_vm14, %v1728_v48  ;;  %vm6896_vm15 = vmmov %vm6895_vm2 }
 0x236   : > { %v2123_v3 = vmax.f32 %v2121_v8, %v2122_v35  ;;  %v2119_v60 = vsel %vm6892_vm4, %v2083_v38, -inf  ;;  %v6098_v21 = vpop.permute.xlu0 %1151  ;;  %vm6898_vm4 = vmmov %vm6895_vm2 }
 0x237   : > { %v2120_v6 = vmax.f32 %v2118_v62, %v2119_v60  ;;  %v6100_v15 = vpop.permute.xlu1 %1057 }
 0x238   : > { %v2255_v5 = vcombine.high %v2123_v3, %v2123_v3  ;;  %v2262_v43 = vrot.slane %v2123_v3, %v5632_v55 }
 0x239   : > { %v2238_v41 = vcombine.high %v2120_v6, %v2120_v6  ;;  %v2245_v54 = vrot.slane %v2120_v6, %v5632_v55 }
 0x23a   : > { %v2269_v16 = vrot.slane %v2255_v5, %v5632_v55  ;;  %v2270_v63 = vcombine.high %v2262_v43, %v2262_v43  ;;  %v2647_v52 = vsel %vm6893_vm7, %v2262_v43, -inf  ;;  %v6109_v13 = vpop.permute.xlu0 %777  ;;  %vm6899_vm7 = vmmov %vm6895_vm2 }
 0x23b   : > { %v2648_v32 = vrot.slane %v2647_v52, 4  ;;  %v2252_v11 = vrot.slane %v2238_v41, %v5632_v55  ;;  %v2253_v31 = vcombine.high %v2245_v54, %v2245_v54  ;;  %v2619_v7 = vsel %vm6894_vm8, %v2245_v54, -inf  ;;  %v1432_v30 = vpop.permute.xlu1 %1431 }
 0x23c   : > { %v2271_v58 = vcombine.high %v2269_v16, %v2269_v16  ;;  %v2654_v4 = vsel %vm6895_vm2, %v2270_v63, -inf  ;;  %v2661_v14 = vsel %vm6896_vm15, %v2269_v16, -inf  ;;  %v2620_v23 = vrot.slane %v2619_v7, 4 }
 0x23d   : > { %v2649_v12 = vmax.f32 %v2647_v52, %v2648_v32  ;;  %v2655_v46 = vrot.slane %v2654_v4, 4  ;;  %v2662_v29 = vrot.slane %v2661_v14, 4  ;;  %v2254_v22 = vcombine.high %v2252_v11, %v2252_v11 }
 0x23e   : > { %v2668_v57 = vsel %vm6897_vm3, %v2271_v58, -inf  ;;  %v2621_v26 = vmax.f32 %v2619_v7, %v2620_v23  ;;  %v2626_v47 = vsel %vm6898_vm4, %v2253_v31, -inf  ;;  %v2633_v38 = vsel %vm6899_vm7, %v2252_v11, -inf  ;;  %v6118_v48 = vpop.permute.xlu0 %1153 }
 0x23f   : > { %vm6900_vm8 = vcmask 48128   ;;  %v2656_v35 = vmax.f32 %v2654_v4, %v2655_v46  ;;  %v2663_v62 = vmax.f32 %v2661_v14, %v2662_v29  ;;  %v2669_v3 = vrot.slane %v2668_v57, 4  ;;  %v6123_v41 = vpop.permute.xlu1 %868 }
 0x240   : > { %v1531_v8 = vsel %vm6900_vm8, %v1499_v36, %v5924_v20  ;;  %v2622_v60 = vrot.slane %v2621_v26, 2  ;;  %v2627_v6 = vrot.slane %v2626_v47, 4  ;;  %v2634_v5 = vrot.slane %v2633_v38, 4  ;;  %vm6903_vm4 = vmmov %vm6900_vm8 }
 0x241   : > { %v2640_v43 = vsel %vm6895_vm2, %v2254_v22, -inf  ;;  %vm6901_vm15 = vcmask 72704   ;;  %v2650_v16 = vrot.slane %v2649_v12, 2  ;;  %v2657_v63 = vrot.slane %v2656_v35, 2 }
 0x242   : > { %v1564_v54 = vsel %vm6901_vm15, %v1531_v8, %v5953_v18  ;;  %v2670_v52 = vmax.f32 %v2668_v57, %v2669_v3  ;;  %v2623_v32 = vmax.f32 %v2621_v26, %v2622_v60  ;;  %v2628_v11 = vmax.f32 %v2626_v47, %v2627_v6  ;;  %v6127_v36 = vpop.permute.xlu0 %870  ;;  %vm6905_vm8 = vmmov %vm6901_vm15 }
 0x243   : > { %v2635_v31 = vmax.f32 %v2633_v38, %v2634_v5  ;;  %v2641_v20 = vrot.slane %v2640_v43, 4  ;;  %v1597_v7 = vsel %vm1571_vm9, %v1564_v54, %v6023_v19  ;;  %v2664_v58 = vrot.slane %v2663_v62, 2  ;;  %v1248_v29 = vpop.permute.xlu1 %1247 }
 0x244   : > { %v2671_v4 = vrot.slane %v2670_v52, 2  ;;  %v1630_v14 = vsel %vm1604_vm10, %v1597_v7, %v6040_v53  ;;  %v2629_v23 = vrot.slane %v2628_v11, 2  ;;  %v2651_v57 = vmax.f32 %v2649_v12, %v2650_v16 }
 0x245   : > { %v2636_v46 = vrot.slane %v2635_v31, 2  ;;  %v2642_v18 = vmax.f32 %v2640_v43, %v2641_v20  ;;  %v1663_v22 = vsel %vm1637_vm11, %v1630_v14, %v6060_v49  ;;  %v2658_v26 = vmax.f32 %v2656_v35, %v2657_v63 }
 0x246   : > { %v2672_v47 = vmax.f32 %v2670_v52, %v2671_v4  ;;  %v2624_v38 = vrot.slane %v2623_v32, 1  ;;  %v2630_v8 = vmax.f32 %v2628_v11, %v2629_v23  ;;  %v6135_v19 = vpop.permute.xlu0 %1249  ;;  %v1696_v6 = vsel %vm1670_vm12, %v1663_v22, %v6077_v25  ;;  %v3403_v25 = vld [vmem:[%s6827_s3 + $0x20] sm:$0xff] }
 0x247   : > { %v2637_v3 = vmax.f32 %v2635_v31, %v2636_v46  ;;  %v2643_v60 = vrot.slane %v2642_v18, 2  ;;  %v2665_v53 = vmax.f32 %v2663_v62, %v2664_v58  ;;  %v1729_v7 = vsel %vm6853_vm13, %v1696_v6, %v1432_v30  ;;  %v6140_v49 = vpop.permute.xlu1 %963  ;;  %v3404_v30 = vld [vmem:[%s6827_s3 + $0x28] sm:$0xff]  ;;  %v3406_v46 = vld [vmem:[%s6827_s3 + $0x38] sm:$0xff] }
 0x248   : > { %v2673_v5 = vrot.slane %v2672_v47, 1  ;;  %v2631_v54 = vrot.slane %v2630_v8, 1  ;;  %v2652_v12 = vrot.slane %v2651_v57, 1  ;;  %v2659_v35 = vrot.slane %v2658_v26, 1  ;;  %4232 = vmatmul.mubr.msk.f32.gmra.mrb[24].mxu0 %vm1747_vm14, %v1729_v7 }
 0x249   : > { %v2638_v43 = vrot.slane %v2637_v3, 1  ;;  %v2644_v20 = vmax.f32 %v2642_v18, %v2643_v60  ;;  %v2625_v16 = vmax.f32 %v2623_v32, %v2624_v38  ;;  %v2666_v62 = vrot.slane %v2665_v53, 1  ;;  %v3405_v32 = vld [vmem:[%s6827_s3 + $0x30] sm:$0xff] }
 0x24a   : > { %v2632_v63 = vmax.f32 %v2630_v8, %v2631_v54  ;;  %v6143_v31 = vpop.permute.xlu0 %965  ;;  %v2674_v58 = vmax.f32 %v2672_v47, %v2673_v5  ;;  %vm6902_vm3 = vcmask 1042434   ;;  %v1500_v18 = vsel %vm1474_vm6, %v5503_v24, %v5994_v61 }
 0x24b   : > { %v2639_v52 = vmax.f32 %v2637_v3, %v2638_v43  ;;  %v2645_v11 = vrot.slane %v2644_v20, 1  ;;  %v1341_v23 = vpop.permute.xlu1 %1340  ;;  %v2653_v22 = vmax.f32 %v2651_v57, %v2652_v12  ;;  %v4290_v47 = vpack.c.bf16 %v3404_v30, %v3403_v25 }
 0x24c   : > { %v3037_v14 = vsel %vm6902_vm3, %v2632_v63, %v2625_v16  ;;  %v1532_v8 = vsel %vm6903_vm4, %v1500_v18, %v6042_v34  ;;  %v2660_v3 = vmax.f32 %v2658_v26, %v2659_v35  ;;  %vm6904_vm7 = vcmask 1044484  }
 0x24d   : > { %v2646_v4 = vmax.f32 %v2644_v20, %v2645_v11  ;;  %v3038_v38 = vsel %vm3021_vm5, %v2639_v52, %v3037_v14  ;;  %v1565_v5 = vsel %vm6905_vm8, %v1532_v8, %v6063_v33  ;;  %v2667_v54 = vmax.f32 %v2665_v53, %v2666_v62  ;;  %4291 = vmatpush1.bf16.msra.mxu1 %v4290_v47  ;;  %v3407_v33 = vld [vmem:[%s6827_s3 + $0x40] sm:$0xff]  ;;  %v3408_v53 = vld [vmem:[%s6827_s3 + $0x48] sm:$0xff] }
 0x24e   : > { %v1343_v60 = vpop.permute.xlu0 %1342  ;;  %vm6906_vm2 = vcmask 1045509   ;;  %v4293_v20 = vpack.c.bf16 %v3406_v46, %v3405_v32  ;;  %v1598_v24 = vsel %vm1571_vm9, %v1565_v5, %v6081_v28  ;;  %vm6907_vm15 = vcmask 1046534   ;;  %4292 = vmatprep.subr.bf16.mxu1 %v4604_v45 }
 0x24f   : > { %v3039_v6 = vsel %vm6904_vm7, %v2646_v4, %v3038_v38  ;;  %v6170_v61 = vpop.permute.xlu1 %1059  ;;  %v3099_v26 = vsel %vm394_vm0, %v2674_v58, 0.0  ;;  %v1631_v28 = vsel %vm1604_vm10, %v1598_v24, %v6098_v21  ;;  %vm6908_vm3 = vcmask 1047559   ;;  %v3410_v4 = vld [vmem:[%s6827_s3 + $0x58] sm:$0xff] }
 0x250   : > { %v3040_v43 = vsel %vm6906_vm2, %v2653_v22, %v3039_v6  ;;  %v6172_v57 = vpop.f32.mrb[12].mxu0  ;;  %v1664_v35 = vsel %vm1637_vm11, %v1631_v28, %v1248_v29  ;;  %v3126_v25 = vrot.slane %v3099_v26, 1  ;;  %v4296_v30 = vpack.c.bf16 %v3408_v53, %v3407_v33  ;;  %v3409_v29 = vld [vmem:[%s6827_s3 + $0x50] sm:$0xff]  ;;  %v3416_v33 = vld [vmem:[%s6827_s3 + $0x88] sm:$0xff]  ;;  %vm6910_vm2 = vmmov %vm6903_vm4 }
 0x251   : > { %v3041_v34 = vsel %vm6907_vm15, %v2660_v3, %v3040_v43  ;;  %v6185_v7 = vpop.f32.mrb[13].mxu0  ;;  %4294 = vmatpush1.bf16.msra.mxu1 %v4293_v20  ;;  %v1697_v21 = vsel %vm1670_vm12, %v1664_v35, %v1341_v23  ;;  %v3147_v32 = vrot.slane %v3099_v26, 2  ;;  %v1501_v46 = vsel %vm1474_vm6, %v5520_v9, %v6035_v51  ;;  %v3412_v51 = vld [vmem:[%s6827_s3 + $0x68] sm:$0xff]  ;;  %v3415_v26 = vld [vmem:[%s6827_s3 + $0x80] sm:$0xff]  ;;  %vm6911_vm15 = vmmov %vm6905_vm8 }
 0x252   : > { %v3042_v12 = vsel %vm6908_vm3, %v2667_v54, %v3041_v34  ;;  %v6189_v16 = vpop.permute.xlu0 %779  ;;  %4295 = vmatprep.subr.bf16.mxu1 %v4604_v45  ;;  %v1533_v38 = vsel %vm6903_vm4, %v1501_v46, %v6044_v10  ;;  %vm6909_vm7 = vcmask 1045504   ;;  %v4299_v8 = vpack.c.bf16 %v3410_v4, %v3409_v29  ;;  %vm6912_vm3 = vmmov %vm6910_vm2 }
 0x253   : > { %v6192_v63 = vsel %vm394_vm0, 0.0, %v3042_v12  ;;  %v1434_v62 = vpop.permute.xlu1 %1433  ;;  %v1566_v3 = vsel %vm6905_vm8, %v1533_v38, %v6065_v37  ;;  %v4308_v28 = vpack.c.bf16 %v3416_v33, %v3415_v26  ;;  %vm6913_vm4 = vmmov %vm6905_vm8  ;;  %v1504_v26 = vsel %vm1474_vm6, %v5745_v50, %v6189_v16 }
 0x254   : > { %v4422_v52 = vpack.i.bf16 %v6192_v63, %v5997_v56  ;;  %v3125_v11 = vrot.slane %v6192_v63, 1  ;;  %v3146_v58 = vrot.slane %v6192_v63, 2  ;;  %v1730_v14 = vsel %vm6853_vm13, %v1697_v21, %v1434_v62 }
 0x255   : > { %4234 = vmatprep.mubr.msk.f32.mxu0 %vm1747_vm14, %v1730_v14  ;;  %4297 = vmatpush1.bf16.msra.mxu1 %v4296_v30  ;;  %v1599_v10 = vsel %vm1571_vm9, %v1566_v3, %v6100_v15  ;;  %v6276_v30 = vld [vmem:[%s6826_s2] ss:$0 sm:$0xff]  ;;  %v1502_v62 = vsel %vm1474_vm6, %v5605_v27, %v6089_v44  ;;  %v1503_v14 = vsel %vm1474_vm6, %v5615_v39, %v6109_v13 }
 0x256   : > { %4423 = vrot.lane.b32.xlu0 %v4422_v52, %s4605_s29  ;;  %v6209_v23 = vsel %vm553_vm1, %v3125_v11, %v3126_v25  ;;  %v6217_v22 = vpop.permute.xlu0 %1155  ;;  %v6222_v47 = vsel %vm6909_vm7, %v3146_v58, %v3147_v32  ;;  %4298 = vmatprep.subr.bf16.mxu1 %v4604_v45  ;;  %v1632_v37 = vsel %vm1604_vm10, %v1599_v10, %v6118_v48  ;;  %v3413_v48 = vld [vmem:[%s6827_s3 + $0x70] sm:$0xff]  ;;  %vm6914_vm7 = vcmask 130048  }
 0x257   : > { %v4427_v18 = vpack.i.bf16 %v6209_v23, %v6018_v59  ;;  %v1062_v9 = vpop.permute.xlu1 %1061  ;;  %v3411_v59 = vld [vmem:[%s6827_s3 + $0x60] sm:$0xff]  ;;  %v4437_v6 = vpack.i.bf16 %v6222_v47, %v6009_v0  ;;  %v1665_v54 = vsel %vm1637_vm11, %v1632_v37, %v6135_v19  ;;  %v3414_v0 = vld [vmem:[%s6827_s3 + $0x78] sm:$0xff]  ;;  %v1980_v21 = vadd.f32 %v6276_v30, %v6172_v57  ;;  %vm6915_vm8 = vmmov %vm6914_vm7 }
 0x258   : > { %v4302_v43 = vpack.c.bf16 %v3412_v51, %v3411_v59  ;;  %v1698_v20 = vsel %vm1670_vm12, %v1665_v54, %v1343_v60  ;;  %v4305_v60 = vpack.c.bf16 %v3414_v0, %v3413_v48  ;;  %v1975_v58 = vadd.f32 %v6276_v30, %v6185_v7 }
 0x259   : > { %4428 = vrot.lane.b32.xlu1 %v4427_v18, %s4606_s27  ;;  %4300 = vmatpush1.bf16.msra.mxu1 %v4299_v8  ;;  %v1534_v4 = vsel %vm6910_vm2, %v1502_v62, %v6123_v41  ;;  %v1535_v27 = vsel %vm6912_vm3, %v1503_v14, %v6127_v36  ;;  %v2086_v7 = vmax.f32 %v1980_v21, 0.0  ;;  %vm6916_vm2 = vmmov %vm6914_vm7  ;;  %vm6918_vm3 = vcmask 123904  }
 0x25a   : > { %4433 = vrot.lane.b32.xlu0 %v4427_v18, %s4600_s26  ;;  %v6241_v5 = vpop.permute.xlu0 %781  ;;  %4301 = vmatprep.subr.bf16.mxu1 %v4604_v45  ;;  %v1567_v32 = vsel %vm6911_vm15, %v1534_v4, %v6140_v49  ;;  %v1568_v38 = vsel %vm6913_vm4, %v1535_v27, %v6143_v31  ;;  %v2085_v39 = vmax.f32 %v1975_v58, 0.0  ;;  %vm6917_vm15 = vmmov %vm6916_vm2 }
 0x25b   : > { %v1436_v15 = vpop.permute.xlu1 %1435  ;;  %v1600_v44 = vsel %vm1571_vm9, %v1567_v32, %v6170_v61  ;;  %v1601_v36 = vsel %vm1571_vm9, %v1568_v38, %v1062_v9  ;;  %v2127_v31 = vsel %vm6914_vm7, %v2086_v7, -inf  ;;  %vm6919_vm4 = vmmov %vm6918_vm3 }
 0x25c   : > { %v1731_v24 = vsel %vm6853_vm13, %v1698_v20, %v1436_v15  ;;  %v1633_v13 = vsel %vm1604_vm10, %v1600_v44, %v6217_v22  ;;  %vm6920_vm7 = vmmov %vm6918_vm3 }
 0x25d   : > { %4438 = vrot.lane.b32.xlu1 %v4437_v6, %s4599_s21  ;;  %4235 = vmatmul.mubr.msk.f32.gmra.mrb[26].mxu0 %vm1747_vm14, %v1731_v24 }
 0x25e   : > { %v1158_v19 = vpop.permute.xlu0 %1157  ;;  %4303 = vmatpush1.bf16.msra.mxu1 %v4302_v43  ;;  %v2124_v43 = vsel %vm6916_vm2, %v2085_v39, -inf  ;;  %vm6923_vm2 = vmmov %vm6918_vm3 }
 0x25f   : > { %v6256_v34 = vpop.permute.xlu1 %872  ;;  %4304 = vmatprep.subr.bf16.mxu1 %v4604_v45  ;;  %v1634_v59 = vsel %vm1604_vm10, %v1601_v36, %v1158_v19 }
 0x262   : > { %v6265_v53 = vpop.permute.xlu0 %874  ;;  %4306 = vmatpush1.bf16.msra.mxu1 %v4305_v60 }
 0x263   : > { %v1252_v12 = vpop.permute.xlu1 %1251  ;;  %4307 = vmatprep.subr.bf16.mxu1 %v4604_v45 }
 0x264   : > { %v1666_v3 = vsel %vm1637_vm11, %v1633_v13, %v1252_v12  ;;  %v1505_v12 = vsel %vm1474_vm6, %v5759_v42, %v6241_v5  ;;  %vm6922_vm6 = vcmask 48128  }
 0x265   : > { %v1536_v42 = vsel %vm6922_vm6, %v1504_v26, %v6256_v34 }
 0x266   : > { %v1254_v35 = vpop.permute.xlu0 %1253  ;;  %4309 = vmatpush1.bf16.msra.mxu1 %v4308_v28 }
 0x267   : > { %v6268_v52 = vpop.permute.xlu1 %967  ;;  %4310 = vmatprep.subr.bf16.mxu1 %v4604_v45  ;;  %v1667_v6 = vsel %vm1637_vm11, %v1634_v59, %v1254_v35 }
 0x26a   : > { %v6271_v11 = vpop.permute.xlu0 %969 }
 0x26b   : > { %v1345_v25 = vpop.permute.xlu1 %1344 }
 0x26c   : > { %v1699_v51 = vsel %vm1670_vm12, %v1666_v3, %v1345_v25 }
 0x26e   : > { %v1347_v29 = vpop.permute.xlu0 %1346 }
 0x26f   : > { %v6292_v46 = vpop.permute.xlu1 %1063  ;;  %v1700_v9 = vsel %vm1670_vm12, %v1667_v6, %v1347_v29 }
 0x270   : > { %v4218_v57 = vpop.f32.mrb[14].mxu0 }
 0x271   : > { %v1990_v18 = vadd.f32 %v6276_v30, %v4218_v57  ;;  %v1984_v41 = vpop.f32.mrb[15].mxu0 }
 0x272   : > { %v1985_v49 = vadd.f32 %v6276_v30, %v1984_v41  ;;  %v6304_v8 = vpop.permute.xlu0 %1065 }
 0x273   : > { %v2088_v61 = vmax.f32 %v1990_v18, 0.0  ;;  %v1438_v37 = vpop.permute.xlu1 %1437 }
 0x274   : > { %v2087_v10 = vmax.f32 %v1985_v49, 0.0  ;;  %v1732_v54 = vsel %vm6853_vm13, %v1699_v51, %v1438_v37 }
 0x275   : > { %v2128_v22 = vsel %vm6915_vm8, %v2088_v61, -inf  ;;  %4237 = vmatprep.mubr.msk.f32.mxu0 %vm1747_vm14, %v1732_v54  ;;  %vm6921_vm8 = vmmov %vm6918_vm3 }
 0x276   : > { %v2129_v20 = vmax.f32 %v2127_v31, %v2128_v22  ;;  %v2125_v15 = vsel %vm6917_vm15, %v2087_v10, -inf  ;;  %v1440_v48 = vpop.permute.xlu0 %1439  ;;  %vm6924_vm15 = vmmov %vm6923_vm2 }
 0x277   : > { %v2126_v0 = vmax.f32 %v2124_v43, %v2125_v15  ;;  %v1733_v24 = vsel %vm6853_vm13, %v1700_v9, %v1440_v48  ;;  %v1160_v62 = vpop.permute.xlu1 %1159 }
 0x278   : > { %v2289_v19 = vcombine.high %v2129_v20, %v2129_v20  ;;  %v2296_v60 = vrot.slane %v2129_v20, %v5632_v55  ;;  %4238 = vmatmul.mubr.msk.f32.gmra.mrb[28].mxu0 %vm1747_vm14, %v1733_v24 }
 0x279   : > { %v2272_v33 = vcombine.high %v2126_v0, %v2126_v0  ;;  %v2279_v28 = vrot.slane %v2126_v0, %v5632_v55 }
 0x27a   : > { %v2303_v35 = vrot.slane %v2289_v19, %v5632_v55  ;;  %v2304_v25 = vcombine.high %v2296_v60, %v2296_v60  ;;  %v2703_v21 = vsel %vm6918_vm3, %v2296_v60, -inf  ;;  %vm6925_vm3 = vmmov %vm6923_vm2  ;;  %v1256_v26 = vpop.permute.xlu0 %1255 }
 0x27b   : > { %v2704_v58 = vrot.slane %v2703_v21, 4  ;;  %v2286_v29 = vrot.slane %v2272_v33, %v5632_v55  ;;  %v2287_v4 = vcombine.high %v2279_v28, %v2279_v28  ;;  %v2675_v14 = vsel %vm6919_vm4, %v2279_v28, -inf  ;;  %vm6926_vm4 = vmmov %vm6923_vm2  ;;  %v1162_v34 = vpop.permute.xlu1 %1161 }
 0x27c   : > { %v2305_v50 = vcombine.high %v2303_v35, %v2303_v35  ;;  %v2710_v16 = vsel %vm6920_vm7, %v2304_v25, -inf  ;;  %v2717_v32 = vsel %vm6921_vm8, %v2303_v35, -inf  ;;  %v2676_v57 = vrot.slane %v2675_v14, 4  ;;  %vm6927_vm7 = vmmov %vm6922_vm6 }
 0x27d   : > { %v2711_v5 = vrot.slane %v2710_v16, 4  ;;  %v2718_v27 = vrot.slane %v2717_v32, 4  ;;  %v2288_v44 = vcombine.high %v2286_v29, %v2286_v29  ;;  %v2682_v41 = vsel %vm6924_vm15, %v2287_v4, -inf }
 0x27e   : > { %v2724_v7 = vsel %vm6923_vm2, %v2305_v50, -inf  ;;  %v2677_v18 = vmax.f32 %v2675_v14, %v2676_v57  ;;  %v2689_v38 = vsel %vm6925_vm3, %v2286_v29, -inf  ;;  %v2705_v39 = vmax.f32 %v2703_v21, %v2704_v58 }
 0x27f   : > { %v2712_v13 = vmax.f32 %v2710_v16, %v2711_v5  ;;  %v2719_v49 = vmax.f32 %v2717_v32, %v2718_v27  ;;  %v2725_v36 = vrot.slane %v2724_v7, 4  ;;  %v2683_v61 = vrot.slane %v2682_v41, 4  ;;  %v1349_v58 = vpop.permute.xlu1 %1348 }
 0x280   : > { %v2678_v3 = vrot.slane %v2677_v18, 2  ;;  %v2690_v59 = vrot.slane %v2689_v38, 4  ;;  %v2696_v51 = vsel %vm6926_vm4, %v2288_v44, -inf  ;;  %v1537_v10 = vsel %vm6927_vm7, %v1505_v12, %v6265_v53 }
 0x281   : > { %vm6928_vm8 = vcmask 72704   ;;  %v2726_v31 = vmax.f32 %v2724_v7, %v2725_v36  ;;  %v2684_v22 = vmax.f32 %v2682_v41, %v2683_v61  ;;  %v2697_v43 = vrot.slane %v2696_v51, 4  ;;  %v1442_v7 = vpop.permute.xlu0 %1441 }
 0x282   : > { %v1569_v37 = vsel %vm6928_vm8, %v1536_v42, %v6268_v52  ;;  %v2679_v6 = vmax.f32 %v2677_v18, %v2678_v3  ;;  %v2691_v54 = vmax.f32 %v2689_v38, %v2690_v59  ;;  %v2706_v9 = vrot.slane %v2705_v39, 2  ;;  %vm6929_vm6 = vmmov %vm6928_vm8 }
 0x283   : > { %v2713_v20 = vrot.slane %v2712_v13, 2  ;;  %v2720_v15 = vrot.slane %v2719_v49, 2  ;;  %v2727_v48 = vrot.slane %v2726_v31, 2  ;;  %v1570_v0 = vsel %vm6929_vm6, %v1537_v10, %v6271_v11 }
 0x284   : > { %v2685_v24 = vrot.slane %v2684_v22, 2  ;;  %v2692_v19 = vrot.slane %v2691_v54, 2  ;;  %v2698_v60 = vmax.f32 %v2696_v51, %v2697_v43  ;;  %v1602_v53 = vsel %vm1571_vm9, %v1569_v37, %v6292_v46 }
 0x285   : > { %v2728_v52 = vmax.f32 %v2726_v31, %v2727_v48  ;;  %v2680_v33 = vrot.slane %v2679_v6, 1  ;;  %v1603_v28 = vsel %vm1571_vm9, %v1570_v0, %v6304_v8  ;;  %v1635_v21 = vsel %vm1604_vm10, %v1602_v53, %v1160_v62 }
 0x286   : > { %v2686_v12 = vmax.f32 %v2684_v22, %v2685_v24  ;;  %v2693_v35 = vmax.f32 %v2691_v54, %v2692_v19  ;;  %v2699_v25 = vrot.slane %v2698_v60, 2  ;;  %v2707_v29 = vmax.f32 %v2705_v39, %v2706_v9 }
 0x287   : > { %v2714_v11 = vmax.f32 %v2712_v13, %v2713_v20  ;;  %v2721_v4 = vmax.f32 %v2719_v49, %v2720_v15  ;;  %v1668_v14 = vsel %vm1637_vm11, %v1635_v21, %v1256_v26  ;;  %v1636_v46 = vsel %vm1604_vm10, %v1603_v28, %v1162_v34 }
 0x288   : > { %v2687_v50 = vrot.slane %v2686_v12, 1  ;;  %v2694_v16 = vrot.slane %v2693_v35, 1  ;;  %v2700_v32 = vmax.f32 %v2698_v60, %v2699_v25  ;;  %v2729_v57 = vrot.slane %v2728_v52, 1 }
 0x289   : > { %v2681_v42 = vmax.f32 %v2679_v6, %v2680_v33  ;;  %v1669_v8 = vsel %vm1637_vm11, %v1636_v46, %v1256_v26  ;;  %v1701_v5 = vsel %vm1670_vm12, %v1668_v14, %v1349_v58  ;;  %v2708_v41 = vrot.slane %v2707_v29, 1  ;;  %v6391_v14 = vpop.permute.xlu0 %4403 }
 0x28a   : > { %v2688_v27 = vmax.f32 %v2686_v12, %v2687_v50  ;;  %v2695_v44 = vmax.f32 %v2693_v35, %v2694_v16  ;;  %v2701_v62 = vrot.slane %v2700_v32, 1  ;;  %v1702_v18 = vsel %vm1670_vm12, %v1669_v8, %v1349_v58  ;;  %v4399_v12 = vpop.permute.xlu1 %4398 }
 0x28b   : > { %v1734_v38 = vsel %vm6853_vm13, %v1701_v5, %v1442_v7  ;;  %v2715_v39 = vrot.slane %v2714_v11, 1  ;;  %vm6930_vm2 = vcmask 1042434   ;;  %v1735_v36 = vsel %vm6853_vm13, %v1702_v18, %v1442_v7 }
 0x28c   : > { %v2702_v13 = vmax.f32 %v2700_v32, %v2701_v62  ;;  %v3043_v49 = vsel %vm6930_vm2, %v2688_v27, %v2681_v42  ;;  %4240 = vmatprep.mubr.msk.f32.mxu0 %vm1747_vm14, %v1734_v38  ;;  %v2722_v3 = vrot.slane %v2721_v4, 1  ;;  %v2730_v61 = vmax.f32 %v2728_v52, %v2729_v57 }
 0x28d   : > { %v3044_v59 = vsel %vm3021_vm5, %v2695_v44, %v3043_v49  ;;  %4241 = vmatmul.mubr.msk.f32.gmra.mrb[30].mxu0 %vm1747_vm14, %v1735_v36  ;;  %v2709_v51 = vmax.f32 %v2707_v29, %v2708_v41  ;;  %v2716_v34 = vmax.f32 %v2714_v11, %v2715_v39  ;;  %vm6931_vm10 = vcmask 1044484  }
 0x28e   : > { %v3045_v10 = vsel %vm6931_vm10, %v2702_v13, %v3044_v59  ;;  %v2723_v37 = vmax.f32 %v2721_v4, %v2722_v3  ;;  %vm6932_vm11 = vcmask 1045509   ;;  %v3100_v6 = vsel %vm394_vm0, %v2730_v61, 0.0  ;;  %v6395_v57 = vpop.permute.xlu1 %4408 }
 0x28f   : > { %v3046_v31 = vsel %vm6932_vm11, %v2709_v51, %v3045_v10  ;;  %vm6933_vm12 = vcmask 1046534   ;;  %vm6934_vm15 = vcmask 1047559   ;;  %v3129_v9 = vrot.slane %v3100_v6, 1 }
 0x290   : > { %v3047_v22 = vsel %vm6933_vm12, %v2716_v34, %v3046_v31  ;;  %v3150_v0 = vrot.slane %v3100_v6, 2  ;;  %vm6935_vm14 = vcmask 1045504   ;;  %v4401_v50 = vunpack.i.h.bf16 %v4399_v12 }
 0x291   : > { %v3048_v54 = vsel %vm6934_vm15, %v2723_v37, %v3047_v22  ;;  %vm6937_vm3 = vcmask 130048   ;;  %v4400_v46 = vunpack.i.l.bf16 %v4399_v12  ;;  %vm3345_vm6 = vcmask 261120  }
 0x292   : > { %v6368_v43 = vsel %vm394_vm0, 0.0, %v3048_v54  ;;  %vm6938_vm4 = vmmov %vm6937_vm3  ;;  %v4406_v44 = vunpack.i.h.bf16 %v6391_v14  ;;  %v4405_v62 = vunpack.i.l.bf16 %v6391_v14  ;;  %v4411_v38 = vunpack.i.h.bf16 %v6395_v57 }
 0x293   : > { %v4442_v20 = vpack.i.bf16 %v6368_v43, %v6192_v63  ;;  %v3128_v15 = vrot.slane %v6368_v43, 1  ;;  %v3149_v48 = vrot.slane %v6368_v43, 2  ;;  %vm6939_vm7 = vmmov %vm6937_vm3  ;;  %vm3354_vm11 = vcmask 392192  }
 0x294   : > { %vm6940_vm8 = vmmov %vm6937_vm3  ;;  %vm6943_vm12 = vcmask 123904  }
 0x295   : > { %4443 = vrot.lane.b32.xlu0 %v4442_v20, %s4601_s28  ;;  %v6376_v24 = vsel %vm553_vm1, %v3128_v15, %v3129_v9  ;;  %v6379_v19 = vsel %vm6935_vm14, %v3149_v48, %v3150_v0  ;;  %vm6941_vm2 = vmmov %vm6937_vm3 }
 0x296   : > { %v4447_v60 = vpack.i.bf16 %v6376_v24, %v6209_v23  ;;  %v4452_v26 = vpack.i.bf16 %v6379_v19, %v6222_v47  ;;  %v3338_v41 = vsel %vm6941_vm2, %v5932_v17, %v4401_v50  ;;  %vm6942_vm10 = vmmov %vm6941_vm2 }
 0x297   : > { %v3337_v49 = vsel %vm6942_vm10, 0.0, %v4400_v46  ;;  %vm6944_vm15 = vmmov %vm6943_vm12 }
 0x298   : > { %4448 = vrot.lane.b32.xlu1 %v4447_v60, %s4602_s14  ;;  %vm6945_vm14 = vmmov %vm6943_vm12 }
 0x299   : > { %4453 = vrot.lane.b32.xlu0 %v4452_v26, %s6936_s23  ;;  %v4410_v26 = vunpack.i.l.bf16 %v6395_v57 }
 0x29a   : > { %v4221_v53 = vpop.f32.mrb[16].mxu0 }
 0x29b   : > { %v1994_v52 = vpop.f32.mrb[17].mxu0  ;;  %v2000_v33 = vadd.f32 %v6276_v30, %v4221_v53 }
 0x29c   : > { %v1995_v28 = vadd.f32 %v6276_v30, %v1994_v52 }
 0x29d   : > { %v2090_v25 = vmax.f32 %v2000_v33, 0.0 }
 0x29e   : > { %v2089_v23 = vmax.f32 %v1995_v28, 0.0  ;;  %v6417_v28 = vpop.permute.xlu0 %4413 }
 0x29f   : > { %v2133_v16 = vsel %vm6937_vm3, %v2090_v25, -inf  ;;  %vm6946_vm3 = vmmov %vm6943_vm12  ;;  %v4416_v46 = vunpack.i.h.bf16 %v6417_v28 }
 0x2a0   : > { %v2130_v42 = vsel %vm6939_vm7, %v2089_v23, -inf  ;;  %vm6947_vm7 = vmmov %vm6946_vm3 }
 0x2a1   : > { %vm6949_vm2 = vmmov %vm6946_vm3 }
 0x2a2   : > { %vm6950_vm10 = vmmov %vm6949_vm2 }
 0x2b0   : > { %v4224_v35 = vpop.f32.mrb[18].mxu0 }
 0x2b1   : > { %v2010_v21 = vadd.f32 %v6276_v30, %v4224_v35  ;;  %v2004_v58 = vpop.f32.mrb[19].mxu0 }
 0x2b2   : > { %v2005_v29 = vadd.f32 %v6276_v30, %v2004_v58  ;;  %v3346_v58 = vsel %vm3345_vm6, %v3337_v49, %v4405_v62 }
 0x2b3   : > { %v2092_v11 = vmax.f32 %v2010_v21, 0.0 }
 0x2b4   : > { %v2091_v4 = vmax.f32 %v2005_v29, 0.0 }
 0x2b5   : > { %v2134_v32 = vsel %vm6938_vm4, %v2092_v11, -inf  ;;  %vm3363_vm4 = vcmask 523264  }
 0x2b6   : > { %v2135_v8 = vmax.f32 %v2133_v16, %v2134_v32  ;;  %v2131_v5 = vsel %vm6940_vm8, %v2091_v4, -inf  ;;  %vm6948_vm8 = vmmov %vm6946_vm3  ;;  %v3347_v32 = vsel %vm3345_vm6, %v3338_v41, %v4406_v44 }
 0x2b7   : > { %v2132_v27 = vmax.f32 %v2130_v42, %v2131_v5  ;;  %v4415_v5 = vunpack.i.l.bf16 %v6417_v28  ;;  %v3356_v44 = vsel %vm3354_vm11, %v3347_v32, %v4411_v38 }
 0x2b8   : > { %v2323_v7 = vcombine.high %v2135_v8, %v2135_v8  ;;  %v2330_v18 = vrot.slane %v2135_v8, %v5632_v55 }
 0x2b9   : > { %v2306_v39 = vcombine.high %v2132_v27, %v2132_v27  ;;  %v2313_v13 = vrot.slane %v2132_v27, %v5632_v55  ;;  %v4419_v27 = vpop.permute.xlu1 %4418 }
 0x2ba   : > { %v2337_v36 = vrot.slane %v2323_v7, %v5632_v55  ;;  %v2338_v3 = vcombine.high %v2330_v18, %v2330_v18  ;;  %v2759_v61 = vsel %vm6943_vm12, %v2330_v18, -inf  ;;  %vm3372_vm12 = vcmask 654336  }
 0x2bb   : > { %v2760_v59 = vrot.slane %v2759_v61, 4  ;;  %v2320_v51 = vrot.slane %v2306_v39, %v5632_v55  ;;  %v2321_v34 = vcombine.high %v2313_v13, %v2313_v13  ;;  %v2731_v10 = vsel %vm6944_vm15, %v2313_v13, -inf }
 0x2bc   : > { %v2339_v17 = vcombine.high %v2337_v36, %v2337_v36  ;;  %v2766_v37 = vsel %vm6945_vm14, %v2338_v3, -inf  ;;  %v2773_v31 = vsel %vm6946_vm3, %v2337_v36, -inf  ;;  %v2732_v6 = vrot.slane %v2731_v10, 4 }
 0x2bd   : > { %v2761_v22 = vmax.f32 %v2759_v61, %v2760_v59  ;;  %v2767_v54 = vrot.slane %v2766_v37, 4  ;;  %v2774_v9 = vrot.slane %v2773_v31, 4  ;;  %v2322_v20 = vcombine.high %v2320_v51, %v2320_v51 }
 0x2be   : > { %v2780_v15 = vsel %vm6947_vm7, %v2339_v17, -inf  ;;  %v2733_v48 = vmax.f32 %v2731_v10, %v2732_v6  ;;  %v2738_v0 = vsel %vm6948_vm8, %v2321_v34, -inf  ;;  %v2745_v60 = vsel %vm6949_vm2, %v2320_v51, -inf }
 0x2bf   : > { %v2768_v53 = vmax.f32 %v2766_v37, %v2767_v54  ;;  %v2775_v52 = vmax.f32 %v2773_v31, %v2774_v9  ;;  %v2781_v33 = vrot.slane %v2780_v15, 4  ;;  %v2739_v35 = vrot.slane %v2738_v0, 4 }
 0x2c0   : > { %v2734_v12 = vrot.slane %v2733_v48, 2  ;;  %v2746_v25 = vrot.slane %v2745_v60, 4  ;;  %v2752_v21 = vsel %vm6950_vm10, %v2322_v20, -inf  ;;  %v2762_v23 = vrot.slane %v2761_v22, 2 }
 0x2c1   : > { %v2769_v29 = vrot.slane %v2768_v53, 2  ;;  %v2782_v11 = vmax.f32 %v2780_v15, %v2781_v33  ;;  %vm3381_vm15 = vcmask 785408   ;;  %v2740_v14 = vmax.f32 %v2738_v0, %v2739_v35 }
 0x2c2   : > { %v2735_v4 = vmax.f32 %v2733_v48, %v2734_v12  ;;  %v2747_v50 = vmax.f32 %v2745_v60, %v2746_v25  ;;  %v2753_v16 = vrot.slane %v2752_v21, 4  ;;  %vm3390_vm14 = vcmask 916480  }
 0x2c3   : > { %v2776_v42 = vrot.slane %v2775_v52, 2  ;;  %v2783_v8 = vrot.slane %v2782_v11, 2  ;;  %v2741_v7 = vrot.slane %v2740_v14, 2  ;;  %v3355_v39 = vsel %vm3354_vm11, %v3346_v58, %v4410_v26 }
 0x2c4   : > { %v2748_v62 = vrot.slane %v2747_v50, 2  ;;  %v2754_v18 = vmax.f32 %v2752_v21, %v2753_v16  ;;  %v2763_v13 = vmax.f32 %v2761_v22, %v2762_v23  ;;  %v2770_v49 = vmax.f32 %v2768_v53, %v2769_v29 }
 0x2c5   : > { %v2784_v36 = vmax.f32 %v2782_v11, %v2783_v8  ;;  %v2736_v3 = vrot.slane %v2735_v4, 1  ;;  %v2742_v61 = vmax.f32 %v2740_v14, %v2741_v7  ;;  %v4421_v41 = vunpack.i.h.bf16 %v4419_v27 }
 0x2c6   : > { %v2749_v59 = vmax.f32 %v2747_v50, %v2748_v62  ;;  %v2755_v51 = vrot.slane %v2754_v18, 2  ;;  %v4420_v34 = vunpack.i.l.bf16 %v4419_v27  ;;  %v2777_v10 = vmax.f32 %v2775_v52, %v2776_v42 }
 0x2c7   : > { %v2785_v37 = vrot.slane %v2784_v36, 1  ;;  %v2743_v31 = vrot.slane %v2742_v61, 1  ;;  %v3364_v22 = vsel %vm3363_vm4, %v3355_v39, %v4415_v5  ;;  %v2764_v9 = vrot.slane %v2763_v13, 1 }
 0x2c8   : > { %v4424_v17 = vpop.permute.xlu0 %4423  ;;  %v2750_v6 = vrot.slane %v2749_v59, 1  ;;  %v2756_v54 = vmax.f32 %v2754_v18, %v2755_v51  ;;  %v2771_v20 = vrot.slane %v2770_v49, 1  ;;  %v2737_v48 = vmax.f32 %v2735_v4, %v2736_v3 }
 0x2c9   : > { %v4425_v15 = vunpack.i.l.bf16 %v4424_v17  ;;  %v2744_v0 = vmax.f32 %v2742_v61, %v2743_v31  ;;  %v2778_v53 = vrot.slane %v2777_v10, 1  ;;  %v4426_v38 = vunpack.i.h.bf16 %v4424_v17 }
 0x2ca   : > { %v2751_v60 = vmax.f32 %v2749_v59, %v2750_v6  ;;  %v2757_v26 = vrot.slane %v2756_v54, 1  ;;  %v3373_v52 = vsel %vm3372_vm12, %v3364_v22, %v4420_v34  ;;  %v2786_v28 = vmax.f32 %v2784_v36, %v2785_v37 }
 0x2cb   : > { %v4429_v57 = vpop.permute.xlu1 %4428  ;;  %vm6951_vm3 = vcmask 1042434   ;;  %v3382_v25 = vsel %vm3381_vm15, %v3373_v52, %v4425_v15  ;;  %v2765_v21 = vmax.f32 %v2763_v13, %v2764_v9  ;;  %v3365_v11 = vsel %vm3363_vm4, %v3356_v44, %v4416_v46 }
 0x2cc   : > { %v4430_v33 = vunpack.i.l.bf16 %v4429_v57  ;;  %v2758_v12 = vmax.f32 %v2756_v54, %v2757_v26  ;;  %v3049_v35 = vsel %vm6951_vm3, %v2744_v0, %v2737_v48  ;;  %v4431_v23 = vunpack.i.h.bf16 %v4429_v57 }
 0x2cd   : > { %v3050_v58 = vsel %vm3021_vm5, %v2751_v60, %v3049_v35  ;;  %v2772_v4 = vmax.f32 %v2770_v49, %v2771_v20  ;;  %vm6952_vm7 = vcmask 1044484   ;;  %v2779_v50 = vmax.f32 %v2777_v10, %v2778_v53 }
 0x2ce   : > { %v3391_v29 = vsel %vm3390_vm14, %v3382_v25, %v4430_v33  ;;  %v3051_v14 = vsel %vm6952_vm7, %v2758_v12, %v3050_v58  ;;  %vm6953_vm8 = vcmask 130048   ;;  %v3374_v16 = vsel %vm3372_vm12, %v3365_v11, %v4421_v41 }
 0x2cf   : > { %3505 = vmatmul.mubr.f32.vlgmr.msra.gmra.mrb[0].mxu1 %v3391_v29  ;;  %vm6954_vm2 = vcmask 1045509   ;;  %v3383_v42 = vsel %vm3381_vm15, %v3374_v16, %v4426_v38  ;;  %vm6955_vm10 = vcmask 1046534   ;;  %v3101_v5 = vsel %vm394_vm0, %v2786_v28, 0.0  ;;  %vm6957_vm7 = vmmov %vm6953_vm8 }
 0x2d0   : > { %4124 = vmatprep.mubr.msk.f32.mxu1 %vm6953_vm8, %v6222_v47  ;;  %v3052_v32 = vsel %vm6954_vm2, %v2765_v21, %v3051_v14  ;;  %v3392_v46 = vsel %vm3390_vm14, %v3383_v42, %v4431_v23  ;;  %vm6956_vm3 = vcmask 1047559   ;;  %v3132_v18 = vrot.slane %v3101_v5, 1  ;;  %vm6959_vm2 = vmmov %vm6957_vm7 }
 0x2d1   : > { %v3053_v8 = vsel %vm6955_vm10, %v2772_v4, %v3052_v32  ;;  %v3153_v49 = vrot.slane %v3101_v5, 2  ;;  %vm6958_vm8 = vcmask 1045504   ;;  %vm6960_vm10 = vmmov %vm6959_vm2 }
 0x2d2   : > { %v3054_v27 = vsel %vm6956_vm3, %v2779_v50, %v3053_v8  ;;  %vm6961_vm3 = vmmov %vm6959_vm2 }
 0x2d3   : > { %3510 = vmatmul.mubr.f32.gmra.mrb[2].mxu1 %v3392_v46  ;;  %v6446_v7 = vsel %vm394_vm0, 0.0, %v3054_v27 }
 0x2d4   : > { %4125 = vmatprep.mubr.msk.f32.mxu1 %vm6957_vm7, %v6379_v19  ;;  %v4457_v47 = vpack.i.bf16 %v6446_v7, %v6368_v43  ;;  %v3131_v62 = vrot.slane %v6446_v7, 1  ;;  %v3152_v39 = vrot.slane %v6446_v7, 2  ;;  %vm6962_vm7 = vmmov %vm6959_vm2 }
 0x2d6   : > { %4458 = vrot.lane.b32.xlu1 %v4457_v47, %s4605_s29  ;;  %v6456_v13 = vsel %vm553_vm1, %v3131_v62, %v3132_v18  ;;  %v6461_v3 = vsel %vm6958_vm8, %v3152_v39, %v3153_v49  ;;  %vm6963_vm8 = vcmask 123904  }
 0x2d7   : > { %v4462_v36 = vpack.i.bf16 %v6456_v13, %v6376_v24  ;;  %v4472_v51 = vpack.i.bf16 %v6461_v3, %v6379_v19 }
 0x2d9   : > { %4463 = vrot.lane.b32.xlu0 %v4462_v36, %s4606_s27  ;;  %v4227_v61 = vpop.f32.mrb[20].mxu0 }
 0x2da   : > { %4468 = vrot.lane.b32.xlu1 %v4462_v36, %s4600_s26  ;;  %v2014_v59 = vpop.f32.mrb[21].mxu0  ;;  %v2020_v44 = vadd.f32 %v6276_v30, %v4227_v61 }
 0x2db   : > { %v2015_v41 = vadd.f32 %v6276_v30, %v2014_v59 }
 0x2dc   : > { %v2094_v24 = vmax.f32 %v2020_v44, 0.0 }
 0x2dd   : > { %4473 = vrot.lane.b32.xlu0 %v4472_v51, %s4599_s21  ;;  %v2093_v37 = vmax.f32 %v2015_v41, 0.0 }
 0x2de   : > { %v2139_v22 = vsel %vm6959_vm2, %v2094_v24, -inf  ;;  %vm6964_vm2 = vmmov %vm6963_vm8 }
 0x2df   : > { %v2136_v9 = vsel %vm6961_vm3, %v2093_v37, -inf  ;;  %vm6966_vm3 = vmmov %vm6964_vm2 }
 0x2e0   : > { %vm6969_vm13 = vmmov %vm6964_vm2 }
 0x2f0   : > { %v4230_v34 = vpop.f32.mrb[22].mxu0 }
 0x2f1   : > { %v2030_v10 = vadd.f32 %v6276_v30, %v4230_v34  ;;  %v2024_v17 = vpop.f32.mrb[23].mxu0 }
 0x2f2   : > { %v2025_v31 = vadd.f32 %v6276_v30, %v2024_v17 }
 0x2f3   : > { %v2096_v6 = vmax.f32 %v2030_v10, 0.0 }
 0x2f4   : > { %v2095_v54 = vmax.f32 %v2025_v31, 0.0 }
 0x2f5   : > { %v2140_v19 = vsel %vm6960_vm10, %v2096_v6, -inf  ;;  %vm6965_vm10 = vmmov %vm6964_vm2 }
 0x2f6   : > { %v2141_v20 = vmax.f32 %v2139_v22, %v2140_v19  ;;  %v2137_v15 = vsel %vm6962_vm7, %v2095_v54, -inf  ;;  %vm6967_vm7 = vmmov %vm6964_vm2 }
 0x2f7   : > { %v2138_v48 = vmax.f32 %v2136_v9, %v2137_v15 }
 0x2f8   : > { %v2357_v0 = vcombine.high %v2141_v20, %v2141_v20  ;;  %v2364_v60 = vrot.slane %v2141_v20, %v5632_v55 }
 0x2f9   : > { %v2340_v26 = vcombine.high %v2138_v48, %v2138_v48  ;;  %v2347_v57 = vrot.slane %v2138_v48, %v5632_v55 }
 0x2fa   : > { %v2371_v53 = vrot.slane %v2357_v0, %v5632_v55  ;;  %v2372_v38 = vcombine.high %v2364_v60, %v2364_v60  ;;  %v2815_v33 = vsel %vm6963_vm8, %v2364_v60, -inf  ;;  %vm6968_vm8 = vmmov %vm6964_vm2 }
 0x2fb   : > { %v2816_v52 = vrot.slane %v2815_v33, 4  ;;  %v2354_v28 = vrot.slane %v2340_v26, %v5632_v55  ;;  %v2355_v12 = vcombine.high %v2347_v57, %v2347_v57  ;;  %v2787_v35 = vsel %vm6964_vm2, %v2347_v57, -inf }
 0x2fc   : > { %v2373_v25 = vcombine.high %v2371_v53, %v2371_v53  ;;  %v2822_v21 = vsel %vm6965_vm10, %v2372_v38, -inf  ;;  %v2829_v58 = vsel %vm6966_vm3, %v2371_v53, -inf  ;;  %v2788_v23 = vrot.slane %v2787_v35, 4 }
 0x2fd   : > { %v2817_v29 = vmax.f32 %v2815_v33, %v2816_v52  ;;  %v2823_v11 = vrot.slane %v2822_v21, 4  ;;  %v2830_v4 = vrot.slane %v2829_v58, 4  ;;  %v2356_v14 = vcombine.high %v2354_v28, %v2354_v28 }
 0x2fe   : > { %v2836_v50 = vsel %vm6967_vm7, %v2373_v25, -inf  ;;  %v2789_v16 = vmax.f32 %v2787_v35, %v2788_v23  ;;  %v2794_v32 = vsel %vm6968_vm8, %v2355_v12, -inf  ;;  %v2801_v42 = vsel %vm6969_vm13, %v2354_v28, -inf }
 0x2ff   : > { %v2824_v8 = vmax.f32 %v2822_v21, %v2823_v11  ;;  %v2831_v5 = vmax.f32 %v2829_v58, %v2830_v4  ;;  %v2837_v46 = vrot.slane %v2836_v50, 4  ;;  %v2795_v47 = vrot.slane %v2794_v32, 4 }
 0x300   : > { %v2790_v27 = vrot.slane %v2789_v16, 2  ;;  %v2802_v62 = vrot.slane %v2801_v42, 4  ;;  %v2808_v18 = vsel %vm6964_vm2, %v2356_v14, -inf  ;;  %v2818_v39 = vrot.slane %v2817_v29, 2 }
 0x301   : > { %v2825_v49 = vrot.slane %v2824_v8, 2  ;;  %v2838_v36 = vmax.f32 %v2836_v50, %v2837_v46  ;;  %v2796_v59 = vmax.f32 %v2794_v32, %v2795_v47  ;;  %v2809_v44 = vrot.slane %v2808_v18, 4 }
 0x302   : > { %v2791_v61 = vmax.f32 %v2789_v16, %v2790_v27  ;;  %v2803_v51 = vmax.f32 %v2801_v42, %v2802_v62  ;;  %v2832_v41 = vrot.slane %v2831_v5, 2  ;;  %v2819_v37 = vmax.f32 %v2817_v29, %v2818_v39 }
 0x303   : > { %v2839_v34 = vrot.slane %v2838_v36, 2  ;;  %v2797_v24 = vrot.slane %v2796_v59, 2  ;;  %v2810_v17 = vmax.f32 %v2808_v18, %v2809_v44  ;;  %v2826_v31 = vmax.f32 %v2824_v8, %v2825_v49 }
 0x304   : > { %v2804_v10 = vrot.slane %v2803_v51, 2  ;;  %v2792_v54 = vrot.slane %v2791_v61, 1  ;;  %v2833_v20 = vmax.f32 %v2831_v5, %v2832_v41  ;;  %v2820_v26 = vrot.slane %v2819_v37, 1 }
 0x305   : > { %v2840_v6 = vmax.f32 %v2838_v36, %v2839_v34  ;;  %v2798_v22 = vmax.f32 %v2796_v59, %v2797_v24  ;;  %v2811_v9 = vrot.slane %v2810_v17, 2  ;;  %v2827_v57 = vrot.slane %v2826_v31, 1  ;;  %v4434_v24 = vpop.permute.xlu0 %4433 }
 0x306   : > { %v2805_v19 = vmax.f32 %v2803_v51, %v2804_v10  ;;  %v2793_v53 = vmax.f32 %v2791_v61, %v2792_v54  ;;  %v2834_v28 = vrot.slane %v2833_v20, 1  ;;  %vm6970_vm13 = vcmask 1042434  }
 0x307   : > { %v2841_v15 = vrot.slane %v2840_v6, 1  ;;  %v2799_v48 = vrot.slane %v2798_v22, 1  ;;  %v2812_v60 = vmax.f32 %v2810_v17, %v2811_v9  ;;  %v2821_v21 = vmax.f32 %v2819_v37, %v2820_v26 }
 0x308   : > { %v2806_v0 = vrot.slane %v2805_v19, 1  ;;  %v2828_v23 = vmax.f32 %v2826_v31, %v2827_v57  ;;  %vm6971_vm10 = vcmask 1044484   ;;  %v2835_v11 = vmax.f32 %v2833_v20, %v2834_v28 }
 0x309   : > { %v2800_v38 = vmax.f32 %v2798_v22, %v2799_v48  ;;  %v2813_v52 = vrot.slane %v2812_v60, 1  ;;  %v2842_v12 = vmax.f32 %v2840_v6, %v2841_v15  ;;  %vm6972_vm3 = vcmask 1045509   ;;  %v4439_v15 = vpop.permute.xlu1 %4438 }
 0x30a   : > { %v2807_v33 = vmax.f32 %v2805_v19, %v2806_v0  ;;  %vm6973_vm7 = vcmask 1046534   ;;  %vm6974_vm8 = vcmask 1047559   ;;  %vm6975_vm2 = vcmask 1045504  }
 0x30b   : > { %v2814_v35 = vmax.f32 %v2812_v60, %v2813_v52  ;;  %v3055_v25 = vsel %vm6970_vm13, %v2800_v38, %v2793_v53  ;;  %v3102_v14 = vsel %vm394_vm0, %v2842_v12, 0.0  ;;  %v4436_v31 = vunpack.i.h.bf16 %v4434_v24 }
 0x30c   : > { %v3056_v58 = vsel %vm3021_vm5, %v2807_v33, %v3055_v25  ;;  %v3135_v42 = vrot.slane %v3102_v14, 1  ;;  %v3156_v27 = vrot.slane %v3102_v14, 2  ;;  %v4435_v6 = vunpack.i.l.bf16 %v4434_v24 }
 0x30d   : > { %v3057_v29 = vsel %vm6971_vm10, %v2814_v35, %v3056_v58  ;;  %vm6976_vm13 = vcmask 130048   ;;  %v4440_v38 = vunpack.i.l.bf16 %v4439_v15  ;;  %v4449_v24 = vpop.permute.xlu1 %4448 }
 0x30e   : > { %v3058_v4 = vsel %vm6972_vm3, %v2821_v21, %v3057_v29  ;;  %vm6977_vm10 = vmmov %vm6976_vm13 }
 0x30f   : > { %v3059_v50 = vsel %vm6973_vm7, %v2828_v23, %v3058_v4  ;;  %vm6978_vm3 = vmmov %vm6977_vm10 }
 0x310   : > { %v3060_v16 = vsel %vm6974_vm8, %v2835_v11, %v3059_v50  ;;  %vm6979_vm7 = vmmov %vm6978_vm3  ;;  %v4444_v50 = vpop.permute.xlu0 %4443 }
 0x311   : > { %v6496_v32 = vsel %vm394_vm0, 0.0, %v3060_v16  ;;  %vm6980_vm8 = vmmov %vm6978_vm3 }
 0x312   : > { %v4477_v8 = vpack.i.bf16 %v6496_v32, %v6446_v7  ;;  %v3134_v5 = vrot.slane %v6496_v32, 1  ;;  %v3155_v46 = vrot.slane %v6496_v32, 2 }
 0x314   : > { %4478 = vrot.lane.b32.xlu1 %v4477_v8, %s4601_s28  ;;  %v6504_v47 = vsel %vm553_vm1, %v3134_v5, %v3135_v42  ;;  %v6507_v62 = vsel %vm6975_vm2, %v3155_v46, %v3156_v27  ;;  %vm6981_vm2 = vmmov %vm6978_vm3  ;;  %v4441_v46 = vunpack.i.h.bf16 %v4439_v15 }
 0x315   : > { %v4482_v18 = vpack.i.bf16 %v6504_v47, %v6456_v13  ;;  %v4487_v39 = vpack.i.bf16 %v6507_v62, %v6461_v3  ;;  %v3339_v26 = vsel %vm6981_vm2, %v5997_v56, %v4435_v6  ;;  %v4445_v6 = vunpack.i.l.bf16 %v4444_v50 }
 0x317   : > { %4483 = vrot.lane.b32.xlu0 %v4482_v18, %s4602_s14 }
 0x318   : > { %4488 = vrot.lane.b32.xlu1 %v4487_v39, %s6936_s23 }
 0x31b   : > { %v4233_v49 = vpop.f32.mrb[24].mxu0 }
 0x31c   : > { %v2034_v36 = vpop.f32.mrb[25].mxu0  ;;  %v2040_v61 = vadd.f32 %v6276_v30, %v4233_v49 }
 0x31d   : > { %v2035_v59 = vadd.f32 %v6276_v30, %v2034_v36 }
 0x31e   : > { %v2098_v44 = vmax.f32 %v2040_v61, 0.0 }
 0x31f   : > { %v2097_v13 = vmax.f32 %v2035_v59, 0.0 }
 0x320   : > { %v2145_v54 = vsel %vm6976_vm13, %v2098_v44, -inf  ;;  %vm6982_vm13 = vcmask 123904   ;;  %v4446_v44 = vunpack.i.h.bf16 %v4444_v50 }
 0x321   : > { %v2142_v19 = vsel %vm6978_vm3, %v2097_v13, -inf }
 0x330   : > { %v4236_v51 = vpop.f32.mrb[26].mxu0 }
 0x331   : > { %v2050_v41 = vadd.f32 %v6276_v30, %v4236_v51  ;;  %v2044_v34 = vpop.f32.mrb[27].mxu0  ;;  %v3348_v51 = vsel %vm3345_vm6, %v3339_v26, %v4440_v38 }
 0x332   : > { %v2045_v10 = vadd.f32 %v6276_v30, %v2044_v34  ;;  %v3340_v30 = vsel %vm6980_vm8, %v6192_v63, %v4436_v31 }
 0x333   : > { %v2100_v17 = vmax.f32 %v2050_v41, 0.0  ;;  %v3349_v31 = vsel %vm3345_vm6, %v3340_v30, %v4441_v46  ;;  %v3357_v30 = vsel %vm3354_vm11, %v3348_v51, %v4445_v6 }
 0x334   : > { %v2099_v37 = vmax.f32 %v2045_v10, 0.0 }
 0x335   : > { %v2146_v22 = vsel %vm6977_vm10, %v2100_v17, -inf  ;;  %vm6983_vm10 = vmmov %vm6982_vm13 }
 0x336   : > { %v2147_v9 = vmax.f32 %v2145_v54, %v2146_v22  ;;  %v2143_v20 = vsel %vm6979_vm7, %v2099_v37, -inf  ;;  %vm6984_vm3 = vmmov %vm6983_vm10 }
 0x337   : > { %v2144_v48 = vmax.f32 %v2142_v19, %v2143_v20  ;;  %vm6985_vm7 = vmmov %vm6984_vm3  ;;  %v4454_v19 = vpop.permute.xlu0 %4453 }
 0x338   : > { %v2391_v0 = vcombine.high %v2147_v9, %v2147_v9  ;;  %v2398_v60 = vrot.slane %v2147_v9, %v5632_v55  ;;  %vm6986_vm8 = vmmov %vm6984_vm3 }
 0x339   : > { %v2374_v57 = vcombine.high %v2144_v48, %v2144_v48  ;;  %v2381_v53 = vrot.slane %v2144_v48, %v5632_v55  ;;  %vm6987_vm2 = vmmov %vm6984_vm3 }
 0x33a   : > { %v2405_v33 = vrot.slane %v2391_v0, %v5632_v55  ;;  %v2406_v52 = vcombine.high %v2398_v60, %v2398_v60  ;;  %v2871_v28 = vsel %vm6982_vm13, %v2398_v60, -inf  ;;  %vm6988_vm13 = vmmov %vm6987_vm2  ;;  %v3358_v0 = vsel %vm3354_vm11, %v3349_v31, %v4446_v44 }
 0x33b   : > { %v2872_v12 = vrot.slane %v2871_v28, 4  ;;  %v2388_v35 = vrot.slane %v2374_v57, %v5632_v55  ;;  %v2389_v25 = vcombine.high %v2381_v53, %v2381_v53  ;;  %v2843_v21 = vsel %vm6983_vm10, %v2381_v53, -inf  ;;  %vm6989_vm10 = vmmov %vm6987_vm2 }
 0x33c   : > { %v2407_v58 = vcombine.high %v2405_v33, %v2405_v33  ;;  %v2878_v63 = vsel %vm6984_vm3, %v2406_v52, -inf  ;;  %v2885_v56 = vsel %vm6985_vm7, %v2405_v33, -inf  ;;  %v2844_v23 = vrot.slane %v2843_v21, 4 }
 0x33d   : > { %v2873_v29 = vmax.f32 %v2871_v28, %v2872_v12  ;;  %v2879_v11 = vrot.slane %v2878_v63, 4  ;;  %v2886_v4 = vrot.slane %v2885_v56, 4  ;;  %v2390_v14 = vcombine.high %v2388_v35, %v2388_v35 }
 0x33e   : > { %v2892_v16 = vsel %vm6986_vm8, %v2407_v58, -inf  ;;  %v2845_v42 = vmax.f32 %v2843_v21, %v2844_v23  ;;  %v2850_v8 = vsel %vm6987_vm2, %v2389_v25, -inf  ;;  %v2857_v5 = vsel %vm6988_vm13, %v2388_v35, -inf }
 0x33f   : > { %v2880_v27 = vmax.f32 %v2878_v63, %v2879_v11  ;;  %v2887_v18 = vmax.f32 %v2885_v56, %v2886_v4  ;;  %v2893_v39 = vrot.slane %v2892_v16, 4  ;;  %v2851_v36 = vrot.slane %v2850_v8, 4 }
 0x340   : > { %v2846_v49 = vrot.slane %v2845_v42, 2  ;;  %v2858_v61 = vrot.slane %v2857_v5, 4  ;;  %v2864_v59 = vsel %vm6989_vm10, %v2390_v14, -inf  ;;  %v2874_v41 = vrot.slane %v2873_v29, 2 }
 0x341   : > { %v2894_v34 = vmax.f32 %v2892_v16, %v2893_v39  ;;  %v2852_v10 = vmax.f32 %v2850_v8, %v2851_v36  ;;  %v2865_v37 = vrot.slane %v2864_v59, 4  ;;  %v2881_v54 = vrot.slane %v2880_v27, 2 }
 0x342   : > { %v2847_v13 = vmax.f32 %v2845_v42, %v2846_v49  ;;  %v2859_v17 = vmax.f32 %v2857_v5, %v2858_v61  ;;  %v2888_v9 = vrot.slane %v2887_v18, 2  ;;  %v4450_v60 = vunpack.i.l.bf16 %v4449_v24 }
 0x343   : > { %v2895_v22 = vrot.slane %v2894_v34, 2  ;;  %v2853_v20 = vrot.slane %v2852_v10, 2  ;;  %v2866_v48 = vmax.f32 %v2864_v59, %v2865_v37  ;;  %v2875_v26 = vmax.f32 %v2873_v29, %v2874_v41 }
 0x344   : > { %v2860_v15 = vrot.slane %v2859_v17, 2  ;;  %v2848_v53 = vrot.slane %v2847_v13, 1  ;;  %v4451_v12 = vunpack.i.h.bf16 %v4449_v24  ;;  %v4455_v35 = vunpack.i.l.bf16 %v4454_v19 }
 0x345   : > { %v2896_v57 = vmax.f32 %v2894_v34, %v2895_v22  ;;  %v2854_v38 = vmax.f32 %v2852_v10, %v2853_v20  ;;  %v2867_v52 = vrot.slane %v2866_v48, 2  ;;  %v2882_v25 = vmax.f32 %v2880_v27, %v2881_v54 }
 0x346   : > { %v2861_v33 = vmax.f32 %v2859_v17, %v2860_v15  ;;  %v2889_v21 = vmax.f32 %v2887_v18, %v2888_v9  ;;  %v3366_v23 = vsel %vm3363_vm4, %v3357_v30, %v4450_v60  ;;  %v2876_v11 = vrot.slane %v2875_v26, 1  ;;  %v4523_v30 = vld [vmem:[%s6826_s2] ss:$0 sm:$0xff] }
 0x347   : > { %v2855_v58 = vrot.slane %v2854_v38, 1  ;;  %v2868_v56 = vmax.f32 %v2866_v48, %v2867_v52  ;;  %v2897_v4 = vrot.slane %v2896_v57, 1  ;;  %v2849_v50 = vmax.f32 %v2847_v13, %v2848_v53 }
 0x348   : > { %v4459_v28 = vpop.permute.xlu1 %4458  ;;  %v2862_v63 = vrot.slane %v2861_v33, 1  ;;  %v3367_v46 = vsel %vm3363_vm4, %v3358_v0, %v4451_v12  ;;  %v4456_v39 = vunpack.i.h.bf16 %v4454_v19  ;;  %v2883_v49 = vrot.slane %v2882_v25, 1 }
 0x349   : > { %v4460_v29 = vunpack.i.l.bf16 %v4459_v28  ;;  %v2856_v16 = vmax.f32 %v2854_v38, %v2855_v58  ;;  %v2869_v8 = vrot.slane %v2868_v56, 1  ;;  %v2890_v36 = vrot.slane %v2889_v21, 1 }
 0x34a   : > { %v2863_v42 = vmax.f32 %v2861_v33, %v2862_v63  ;;  %vm6990_vm3 = vcmask 1042434   ;;  %v3375_v51 = vsel %vm3372_vm12, %v3366_v23, %v4455_v35  ;;  %v2898_v44 = vmax.f32 %v2896_v57, %v2897_v4 }
 0x34b   : > { %v4464_v14 = vpop.permute.xlu0 %4463  ;;  %v4239_v5 = vpop.f32.mrb[28].mxu0  ;;  %v2870_v61 = vmax.f32 %v2868_v56, %v2869_v8  ;;  %v3061_v59 = vsel %vm6990_vm3, %v2856_v16, %v2849_v50  ;;  %v4461_v34 = vunpack.i.h.bf16 %v4459_v28  ;;  %v3384_v24 = vsel %vm3381_vm15, %v3375_v51, %v4460_v29 }
 0x34c   : > { %v4465_v27 = vunpack.i.l.bf16 %v4464_v14  ;;  %v2054_v18 = vpop.f32.mrb[29].mxu0  ;;  %v3062_v41 = vsel %vm3021_vm5, %v2863_v42, %v3061_v59  ;;  %v2877_v13 = vmax.f32 %v2875_v26, %v2876_v11  ;;  %v4466_v10 = vunpack.i.h.bf16 %v4464_v14 }
 0x34d   : > { %v2884_v37 = vmax.f32 %v2882_v25, %v2883_v49  ;;  %vm6991_vm7 = vcmask 1044484   ;;  %v2891_v6 = vmax.f32 %v2889_v21, %v2890_v36  ;;  %vm6992_vm8 = vcmask 130048  }
 0x34e   : > { %v3393_v17 = vsel %vm3390_vm14, %v3384_v24, %v4465_v27  ;;  %v3063_v31 = vsel %vm6991_vm7, %v2870_v61, %v3062_v41  ;;  %v3376_v54 = vsel %vm3372_vm12, %v3367_v46, %v4456_v39  ;;  %vm6993_vm2 = vcmask 1045509   ;;  %vm6996_vm3 = vmmov %vm6992_vm8 }
 0x34f   : > { %3515 = vmatmul.mubr.f32.gmra.mrb[4].mxu1 %v3393_v17  ;;  %v3064_v22 = vsel %vm6993_vm2, %v2877_v13, %v3063_v31  ;;  %v3385_v19 = vsel %vm3381_vm15, %v3376_v54, %v4461_v34  ;;  %vm6994_vm13 = vcmask 1046534   ;;  %v3103_v20 = vsel %vm394_vm0, %v2898_v44, 0.0  ;;  %vm6999_vm2 = vmmov %vm6996_vm3 }
 0x350   : > { %4126 = vmatprep.mubr.msk.f32.mxu1 %vm6992_vm8, %v6461_v3  ;;  %v3065_v9 = vsel %vm6994_vm13, %v2884_v37, %v3064_v22  ;;  %v3394_v15 = vsel %vm3390_vm14, %v3385_v19, %v4466_v10  ;;  %vm6995_vm10 = vcmask 1047559   ;;  %v3138_v26 = vrot.slane %v3103_v20, 1  ;;  %vm6998_vm8 = vmmov %vm6996_vm3 }
 0x351   : > { %v3066_v48 = vsel %vm6995_vm10, %v2891_v6, %v3065_v9  ;;  %v3159_v38 = vrot.slane %v3103_v20, 2  ;;  %vm6997_vm7 = vcmask 1045504   ;;  %v2060_v12 = vadd.f32 %v4523_v30, %v4239_v5  ;;  %vm7000_vm13 = vmmov %vm6999_vm2 }
 0x352   : > { %v6561_v0 = vsel %vm394_vm0, 0.0, %v3066_v48  ;;  %v2055_v35 = vadd.f32 %v4523_v30, %v2054_v18  ;;  %vm7001_vm10 = vmmov %vm6999_vm2 }
 0x353   : > { %3520 = vmatmul.mubr.f32.gmra.mrb[6].mxu1 %v3394_v15  ;;  %v4492_v3 = vpack.i.bf16 %v6561_v0, %v6496_v32  ;;  %v3137_v60 = vrot.slane %v6561_v0, 1  ;;  %v3158_v57 = vrot.slane %v6561_v0, 2 }
 0x354   : > { %4127 = vmatprep.mubr.msk.f32.mxu1 %vm6996_vm3, %v6507_v62  ;;  %v2101_v63 = vmax.f32 %v2055_v35, 0.0  ;;  %vm7002_vm3 = vcmask 123904  }
 0x355   : > { %4493 = vrot.lane.b32.xlu0 %v4492_v3, %s4605_s29  ;;  %v6571_v53 = vsel %vm553_vm1, %v3137_v60, %v3138_v26  ;;  %v6576_v52 = vsel %vm6997_vm7, %v3158_v57, %v3159_v38  ;;  %vm7003_vm7 = vmmov %vm7002_vm3 }
 0x356   : > { %v4497_v33 = vpack.i.bf16 %v6571_v53, %v6504_v47  ;;  %v4507_v28 = vpack.i.bf16 %v6576_v52, %v6507_v62  ;;  %v2102_v47 = vmax.f32 %v2060_v12, 0.0  ;;  %v2148_v29 = vsel %vm7000_vm13, %v2101_v63, -inf }
 0x358   : > { %4498 = vrot.lane.b32.xlu1 %v4497_v33, %s4606_s27  ;;  %v2151_v4 = vsel %vm6998_vm8, %v2102_v47, -inf  ;;  %vm7004_vm8 = vmmov %vm7002_vm3 }
 0x359   : > { %4503 = vrot.lane.b32.xlu0 %v4497_v33, %s4600_s26 }
 0x35c   : > { %4508 = vrot.lane.b32.xlu1 %v4507_v28, %s4599_s21 }
 0x360   : > { %v4242_v25 = vpop.f32.mrb[30].mxu0 }
 0x361   : > { %v2070_v21 = vadd.f32 %v4523_v30, %v4242_v25  ;;  %v2064_v58 = vpop.f32.mrb[31].mxu0 }
 0x362   : > { %v2065_v56 = vadd.f32 %v4523_v30, %v2064_v58 }
 0x363   : > { %v2104_v23 = vmax.f32 %v2070_v21, 0.0 }
 0x364   : > { %v2103_v11 = vmax.f32 %v2065_v56, 0.0 }
 0x365   : > { %v2152_v62 = vsel %vm6999_vm2, %v2104_v23, -inf  ;;  %vm7005_vm2 = vmmov %vm7002_vm3 }
 0x366   : > { %v2153_v14 = vmax.f32 %v2151_v4, %v2152_v62  ;;  %v2149_v50 = vsel %vm7001_vm10, %v2103_v11, -inf  ;;  %vm7006_vm13 = vmmov %vm7005_vm2 }
 0x367   : > { %v2150_v16 = vmax.f32 %v2148_v29, %v2149_v50  ;;  %vm7007_vm10 = vmmov %vm7005_vm2 }
 0x368   : > { %v2425_v42 = vcombine.high %v2153_v14, %v2153_v14  ;;  %v2432_v8 = vrot.slane %v2153_v14, %v5632_v55 }
 0x369   : > { %v2408_v5 = vcombine.high %v2150_v16, %v2150_v16  ;;  %v2415_v46 = vrot.slane %v2150_v16, %v5632_v55 }
 0x36a   : > { %v2439_v39 = vrot.slane %v2425_v42, %v5632_v55  ;;  %v2440_v49 = vcombine.high %v2432_v8, %v2432_v8  ;;  %v2927_v27 = vsel %vm7002_vm3, %v2432_v8, -inf  ;;  %vm7008_vm3 = vmmov %vm7005_vm2 }
 0x36b   : > { %v2928_v18 = vrot.slane %v2927_v27, 4  ;;  %v2422_v36 = vrot.slane %v2408_v5, %v5632_v55  ;;  %v2423_v61 = vcombine.high %v2415_v46, %v2415_v46  ;;  %v2899_v59 = vsel %vm7003_vm7, %v2415_v46, -inf  ;;  %vm7009_vm7 = vmmov %vm7005_vm2 }
 0x36c   : > { %v2441_v51 = vcombine.high %v2439_v39, %v2439_v39  ;;  %v2934_v44 = vsel %vm7004_vm8, %v2440_v49, -inf  ;;  %v2941_v41 = vsel %vm7005_vm2, %v2439_v39, -inf  ;;  %v2900_v34 = vrot.slane %v2899_v59, 4 }
 0x36d   : > { %v2929_v24 = vmax.f32 %v2927_v27, %v2928_v18  ;;  %v2935_v13 = vrot.slane %v2934_v44, 4  ;;  %v2942_v10 = vrot.slane %v2941_v41, 4  ;;  %v2424_v17 = vcombine.high %v2422_v36, %v2422_v36 }
 0x36e   : > { %v2948_v37 = vsel %vm7006_vm13, %v2441_v51, -inf  ;;  %v2901_v31 = vmax.f32 %v2899_v59, %v2900_v34  ;;  %v2906_v6 = vsel %vm7007_vm10, %v2423_v61, -inf  ;;  %v2913_v54 = vsel %vm7008_vm3, %v2422_v36, -inf }
 0x36f   : > { %v2936_v22 = vmax.f32 %v2934_v44, %v2935_v13  ;;  %v2943_v19 = vmax.f32 %v2941_v41, %v2942_v10  ;;  %v2949_v9 = vrot.slane %v2948_v37, 4  ;;  %v2907_v15 = vrot.slane %v2906_v6, 4 }
 0x370   : > { %v2902_v20 = vrot.slane %v2901_v31, 2  ;;  %v2914_v48 = vrot.slane %v2913_v54, 4  ;;  %v2920_v3 = vsel %vm7009_vm7, %v2424_v17, -inf  ;;  %v2930_v60 = vrot.slane %v2929_v24, 2 }
 0x371   : > { %v2937_v26 = vrot.slane %v2936_v22, 2  ;;  %v2950_v57 = vmax.f32 %v2948_v37, %v2949_v9  ;;  %v2908_v33 = vmax.f32 %v2906_v6, %v2907_v15  ;;  %v2921_v30 = vrot.slane %v2920_v3, 4 }
 0x372   : > { %v2903_v38 = vmax.f32 %v2901_v31, %v2902_v20  ;;  %v2915_v28 = vmax.f32 %v2913_v54, %v2914_v48  ;;  %v2944_v12 = vrot.slane %v2943_v19, 2  ;;  %v2931_v58 = vmax.f32 %v2929_v24, %v2930_v60 }
 0x373   : > { %v2951_v35 = vrot.slane %v2950_v57, 2  ;;  %v2909_v25 = vrot.slane %v2908_v33, 2  ;;  %v2922_v21 = vmax.f32 %v2920_v3, %v2921_v30  ;;  %v2938_v63 = vmax.f32 %v2936_v22, %v2937_v26 }
 0x374   : > { %v2916_v47 = vrot.slane %v2915_v28, 2  ;;  %v2904_v23 = vrot.slane %v2903_v38, 1  ;;  %v2945_v29 = vmax.f32 %v2943_v19, %v2944_v12  ;;  %v2932_v8 = vrot.slane %v2931_v58, 1 }
 0x375   : > { %v2952_v56 = vmax.f32 %v2950_v57, %v2951_v35  ;;  %v2910_v11 = vmax.f32 %v2908_v33, %v2909_v25  ;;  %v2923_v62 = vrot.slane %v2922_v21, 2  ;;  %v2939_v5 = vrot.slane %v2938_v63, 1 }
 0x376   : > { %v2917_v4 = vmax.f32 %v2915_v28, %v2916_v47  ;;  %v2905_v46 = vmax.f32 %v2903_v38, %v2904_v23  ;;  %v2946_v18 = vrot.slane %v2945_v29, 1  ;;  %vm7010_vm8 = vcmask 1042434  }
 0x377   : > { %v2953_v14 = vrot.slane %v2952_v56, 1  ;;  %v2911_v50 = vrot.slane %v2910_v11, 1  ;;  %v2924_v42 = vmax.f32 %v2922_v21, %v2923_v62  ;;  %v2933_v51 = vmax.f32 %v2931_v58, %v2932_v8 }
 0x378   : > { %v2918_v16 = vrot.slane %v2917_v4, 1  ;;  %v2940_v41 = vmax.f32 %v2938_v63, %v2939_v5  ;;  %vm7011_vm2 = vcmask 1044484   ;;  %v2947_v24 = vmax.f32 %v2945_v29, %v2946_v18 }
 0x379   : > { %v2912_v39 = vmax.f32 %v2910_v11, %v2911_v50  ;;  %v2925_v27 = vrot.slane %v2924_v42, 1  ;;  %v2954_v36 = vmax.f32 %v2952_v56, %v2953_v14  ;;  %vm7012_vm13 = vcmask 1045509  }
 0x37a   : > { %v2919_v49 = vmax.f32 %v2917_v4, %v2918_v16  ;;  %vm7013_vm10 = vcmask 1046534   ;;  %vm7014_vm3 = vcmask 1047559   ;;  %vm7017_vm7 = vcmask 130048  }
 0x37b   : > { %v2926_v61 = vmax.f32 %v2924_v42, %v2925_v27  ;;  %v3067_v59 = vsel %vm7010_vm8, %v2912_v39, %v2905_v46  ;;  %v3104_v10 = vsel %vm394_vm0, %v2954_v36, 0.0  ;;  %v4469_v36 = vpop.permute.xlu1 %4468  ;;  %vm7018_vm8 = vmmov %vm7017_vm7 }
 0x37c   : > { %v3068_v44 = vsel %vm3021_vm5, %v2919_v49, %v3067_v59  ;;  %v3164_v6 = vrot.slane %v3104_v10, 1  ;;  %v3167_v9 = vrot.slane %v3104_v10, 2  ;;  %vm7015_vm5 = vcmask 1045504  }
 0x37d   : > { %v3069_v34 = vsel %vm7011_vm2, %v2926_v61, %v3068_v44  ;;  %v4474_v44 = vpop.permute.xlu0 %4473  ;;  %vm7019_vm2 = vmmov %vm7017_vm7 }
 0x37e   : > { %v3070_v13 = vsel %vm7012_vm13, %v2933_v51, %v3069_v34  ;;  %v4475_v10 = vunpack.i.l.bf16 %v4474_v44  ;;  %vm7020_vm13 = vmmov %vm7019_vm2 }
 0x37f   : > { %v3071_v17 = vsel %vm7013_vm10, %v2940_v41, %v3070_v13  ;;  %vm7021_vm10 = vmmov %vm7019_vm2 }
 0x380   : > { %v3072_v37 = vsel %vm7014_vm3, %v2947_v24, %v3071_v17  ;;  %v4470_v24 = vunpack.i.l.bf16 %v4469_v36  ;;  %vm7022_vm3 = vmmov %vm7019_vm2 }
 0x381   : > { %v3096_v31 = vsel %vm394_vm0, 0.0, %v3072_v37  ;;  %vm3553_vm0 = vcmask 31744  }
 0x382   : > { %v4512_v54 = vpack.i.bf16 %v3096_v31, %v6561_v0  ;;  %v3163_v22 = vrot.slane %v3096_v31, 1  ;;  %v3166_v19 = vrot.slane %v3096_v31, 2 }
 0x384   : > { %4513 = vrot.lane.b32.xlu0 %v4512_v54, %s4601_s28  ;;  %v3165_v20 = vsel %vm553_vm1, %v3163_v22, %v3164_v6  ;;  %v6614_v15 = vsel %vm7015_vm5, %v3166_v19, %v3167_v9  ;;  %vm3654_vm1 = vcmask 25600   ;;  %v4471_v6 = vunpack.i.h.bf16 %v4469_v36  ;;  %vm7023_vm5 = vmmov %vm7019_vm2 }
 0x385   : > { %v4517_v48 = vpack.i.bf16 %v3165_v20, %v6571_v53  ;;  %v6631_v53 = vld [vmem:[%s6828_s4] ss:$0 sm:$0xff]  ;;  %v3341_v54 = vsel %vm7017_vm7, %v6368_v43, %v4470_v24  ;;  %v4476_v22 = vunpack.i.h.bf16 %v4474_v44  ;;  %vm3832_vm7 = vcmask 162816  }
 0x386   : > { %v4479_v41 = vpop.permute.xlu1 %4478  ;;  %v3350_v19 = vsel %vm3345_vm6, %v3341_v54, %v4475_v10 }
 0x387   : > { %4518 = vrot.lane.b32.xlu1 %v4517_v48, %s4602_s14  ;;  %s4607_s14 = smov 4   ;;  %v4480_v17 = vunpack.i.l.bf16 %v4479_v41  ;;  %v4481_v9 = vunpack.i.h.bf16 %v4479_v41 }
 0x388   : > { %3277 = vrot.lane.b32.xlu0 %v6576_v52, %s6936_s23 }
 0x389   : > { %v4484_v13 = vpop.permute.xlu0 %4483 }
 0x38a   : > { %v4485_v37 = vunpack.i.l.bf16 %v4484_v13 }
 0x38b   : > { %3301 = vrot.lane.b32.xlu1 %v3096_v31, %s4605_s29  ;;  %v4489_v31 = vpop.permute.xlu1 %4488 }
 0x38c   : > { %3325 = vrot.lane.b32.xlu0 %v3165_v20, %s4606_s27  ;;  %v3359_v20 = vsel %vm3354_vm11, %v3350_v19, %v4480_v17  ;;  %v4490_v48 = vunpack.i.l.bf16 %v4489_v31 }
 0x38f   : > { %3279 = vrot.lane.b32.xlu1 %v6614_v15, %s6936_s23  ;;  %s7024_s23 = smov 24  }
 0x390   : > { %3303 = vrot.lane.b32.xlu0 %v6874_v40, %s4605_s29  ;;  %s4608_s29 = smov 8  }
 0x393   : > { %3327 = vrot.lane.b32.xlu1 %v4718_v1, %s4606_s27  ;;  %s7016_s27 = smov 12  }
 0x3a2   : > { %v3506_v3 = vpop.f32.mrb[0].mxu1 }
 0x3a3   : > { %v3507_v60 = vadd.f32 %v6631_v53, %v3506_v3  ;;  %v3508_v26 = vpop.f32.mrb[1].mxu1 }
 0x3a4   : > { %v3368_v26 = vsel %vm3363_vm4, %v3359_v20, %v4485_v37 }
 0x3a5   : > { %v3545_v38 = vmax.f32 %v3507_v60, 0.0  ;;  %v4486_v60 = vunpack.i.h.bf16 %v4484_v13 }
 0x3a6   : > { %v3511_v57 = vpop.f32.mrb[2].mxu1 }
 0x3a7   : > { %v3512_v33 = vadd.f32 %v6631_v53, %v3511_v57  ;;  %v3513_v28 = vpop.f32.mrb[3].mxu1  ;;  %v3554_v12 = vsel %vm3553_vm0, %v3545_v38, -inf  ;;  %v3342_v38 = vsel %vm7018_vm8, %v6446_v7, %v4471_v6  ;;  %vm3835_vm8 = vcmask 228352  }
 0x3a9   : > { %v3546_v30 = vmax.f32 %v3512_v33, 0.0  ;;  %v3351_v33 = vsel %vm3345_vm6, %v3342_v38, %v4476_v22 }
 0x3aa   : > { %v3360_v43 = vsel %vm3354_vm11, %v3351_v33, %v4481_v9 }
 0x3ab   : > { %v3555_v1 = vsel %vm3553_vm0, %v3546_v30, -inf  ;;  %v4491_v30 = vunpack.i.h.bf16 %v4489_v31 }
 0x3ac   : > { %v3556_v35 = vmax.f32 %v3554_v12, %v3555_v1  ;;  %v3377_v1 = vsel %vm3372_vm12, %v3368_v26, %v4490_v48 }
 0x3ae   : > { %v3570_v25 = vcombine.high %v3556_v35, %v3556_v35  ;;  %v6638_v47 = vrot.slane %v3556_v35, %v5632_v55  ;;  %v3369_v35 = vsel %vm3363_vm4, %v3360_v43, %v4486_v60 }
 0x3af   : > { %v3378_v7 = vsel %vm3372_vm12, %v3369_v35, %v4491_v30 }
 0x3b0   : > { %v3584_v21 = vrot.slane %v3570_v25, %v5632_v55  ;;  %v3585_v58 = vcombine.high %v6638_v47, %v6638_v47 }
 0x3b2   : > { %v3586_v63 = vcombine.high %v3584_v21, %v3584_v21  ;;  %v3662_v56 = vsel %vm3654_vm1, %v3585_v58, -inf  ;;  %v3669_v23 = vsel %vm3654_vm1, %v3584_v21, -inf }
 0x3b3   : > { %v3663_v11 = vrot.slane %v3662_v56, 4  ;;  %v3670_v4 = vrot.slane %v3669_v23, 4 }
 0x3b4   : > { %v3676_v62 = vsel %vm3654_vm1, %v3586_v63, -inf }
 0x3b5   : > { %v3664_v29 = vmax.f32 %v3662_v56, %v3663_v11  ;;  %v3671_v14 = vmax.f32 %v3669_v23, %v3670_v4  ;;  %v3677_v50 = vrot.slane %v3676_v62, 4 }
 0x3b7   : > { %v3665_v16 = vrot.slane %v3664_v29, 2  ;;  %v3672_v42 = vrot.slane %v3671_v14, 2  ;;  %v3678_v8 = vmax.f32 %v3676_v62, %v3677_v50 }
 0x3b9   : > { %v3666_v5 = vmax.f32 %v3664_v29, %v3665_v16  ;;  %v3673_v46 = vmax.f32 %v3671_v14, %v3672_v42  ;;  %v3679_v39 = vrot.slane %v3678_v8, 2 }
 0x3bb   : > { %v3667_v49 = vrot.slane %v3666_v5, 1  ;;  %v3674_v27 = vrot.slane %v3673_v46, 1  ;;  %v3680_v18 = vmax.f32 %v3678_v8, %v3679_v39 }
 0x3bd   : > { %v3668_v61 = vmax.f32 %v3666_v5, %v3667_v49  ;;  %v3675_v59 = vmax.f32 %v3673_v46, %v3674_v27  ;;  %v3681_v51 = vrot.slane %v3680_v18, 1 }
 0x3bf   : > { %3768 = vrot.lane.b32.xlu0 %v3668_v61, %s4607_s14  ;;  %3772 = vrot.lane.b32.xlu1 %v3675_v59, %s4608_s29  ;;  %v3682_v34 = vmax.f32 %v3680_v18, %v3681_v51 }
 0x3c3   : > { %3776 = vrot.lane.b32.xlu0 %v3682_v34, %s7016_s27  ;;  %s4615_s27 = smov 52  }
 0x3c7   : > { %v4494_v3 = vpop.permute.xlu0 %4493 }
 0x3c8   : > { %v4495_v57 = vunpack.i.l.bf16 %v4494_v3  ;;  %v4496_v25 = vunpack.i.h.bf16 %v4494_v3 }
 0x3ca   : > { %v4499_v28 = vpop.permute.xlu1 %4498  ;;  %v3386_v21 = vsel %vm3381_vm15, %v3377_v1, %v4495_v57  ;;  %v3387_v56 = vsel %vm3381_vm15, %v3378_v7, %v4496_v25 }
 0x3cb   : > { %v4500_v12 = vunpack.i.l.bf16 %v4499_v28  ;;  %v4501_v58 = vunpack.i.h.bf16 %v4499_v28  ;;  %v4504_v11 = vpop.permute.xlu0 %4503 }
 0x3cc   : > { %v4505_v62 = vunpack.i.l.bf16 %v4504_v11  ;;  %v4506_v42 = vunpack.i.h.bf16 %v4504_v11 }
 0x3cd   : > { %v3395_v63 = vsel %vm3390_vm14, %v3386_v21, %v4500_v12  ;;  %v3396_v23 = vsel %vm3390_vm14, %v3387_v56, %v4501_v58 }
 0x3ce   : > { %3525 = vmatmul.mubr.f32.gmra.mrb[8].mxu1 %v3395_v63  ;;  %v4509_v4 = vpop.permute.xlu1 %4508  ;;  %v3343_v16 = vsel %vm7021_vm10, %v6496_v32, %v4505_v62  ;;  %v3344_v59 = vsel %vm7022_vm3, %v6561_v0, %v4506_v42  ;;  %vm3847_vm10 = vcmask 457728   ;;  %vm3849_vm3 = vcmask 490496  }
 0x3cf   : > { %4128 = vmatprep.mubr.msk.f32.mxu1 %vm7019_vm2, %v6576_v52  ;;  %v4510_v29 = vunpack.i.l.bf16 %v4509_v4  ;;  %v4511_v39 = vunpack.i.h.bf16 %v4509_v4 }
 0x3d1   : > { %v3352_v8 = vsel %vm3345_vm6, %v3343_v16, %v4510_v29  ;;  %v3353_v44 = vsel %vm3345_vm6, %v3344_v59, %v4511_v39 }
 0x3d2   : > { %3530 = vmatmul.mubr.f32.gmra.mrb[10].mxu1 %v3396_v23 }
 0x3d3   : > { %4129 = vmatprep.mubr.msk.f32.mxu1 %vm7020_vm13, %v6614_v15  ;;  %vm3845_vm13 = vcmask 424960  }
 0x3f6   : > { %v4514_v14 = vpop.permute.xlu0 %4513 }
 0x3f7   : > { %v4515_v50 = vunpack.i.l.bf16 %v4514_v14  ;;  %v4516_v27 = vunpack.i.h.bf16 %v4514_v14 }
 0x3f9   : > { %v4519_v52 = vpop.permute.xlu1 %4518  ;;  %v3361_v49 = vsel %vm3354_vm11, %v3352_v8, %v4515_v50  ;;  %v3362_v34 = vsel %vm3354_vm11, %v3353_v44, %v4516_v27 }
 0x3fa   : > { %v4520_v5 = vunpack.i.l.bf16 %v4519_v52  ;;  %v3278_v46 = vpop.permute.xlu0 %3277  ;;  %v4521_v18 = vunpack.i.h.bf16 %v4519_v52 }
 0x3fc   : > { %v3370_v15 = vsel %vm3363_vm4, %v3361_v49, %v4520_v5  ;;  %v3371_v13 = vsel %vm3363_vm4, %v3362_v34, %v4521_v18 }
 0x3fd   : > { %v3379_v36 = vsel %vm3372_vm12, %v3370_v15, %v3278_v46  ;;  %v3302_v61 = vpop.permute.xlu1 %3301 }
 0x3fe   : > { %v3388_v32 = vsel %vm3381_vm15, %v3379_v36, %v3302_v61  ;;  %v3326_v51 = vpop.permute.xlu0 %3325 }
 0x3ff   : > { %v3397_v41 = vsel %vm3390_vm14, %v3388_v32, %v3326_v51 }
 0x400   : > { %3535 = vmatmul.mubr.f32.gmra.mrb[12].mxu1 %v3397_v41 }
 0x401   : > { %v3280_v24 = vpop.permute.xlu1 %3279  ;;  %4130 = vmatprep.mubr.msk.f32.mxu1 %vm7023_vm5, %v4724_v2 }
 0x402   : > { %v3380_v10 = vsel %vm3372_vm12, %v3371_v13, %v3280_v24  ;;  %v3304_v17 = vpop.permute.xlu0 %3303  ;;  %vm4614_vm12 = vmmov 0  }
 0x403   : > { %v3389_v0 = vsel %vm3381_vm15, %v3380_v10, %v3304_v17  ;;  %4270 = vmatprep.mubr.msk.f32.mxu0 %vm4614_vm12, %v6874_v40  ;;  %vm3828_vm15 = vcmask 64512  }
 0x405   : > { %v3328_v37 = vpop.permute.xlu1 %3327 }
 0x406   : > { %v3398_v31 = vsel %vm3390_vm14, %v3389_v0, %v3328_v37  ;;  %vm7025_vm14 = vmmov %vm7019_vm2  ;;  %vm3840_vm2 = vcmask 326656  }
 0x407   : > { %3540 = vmatmul.mubr.f32.gmra.mrb[14].mxu1 %v3398_v31 }
 0x408   : > { %4259 = vmatprep.mubr.msk.f32.mxu1 %vm4614_vm12, %v6874_v40 }
 0x422   : > { %v3516_v6 = vpop.f32.mrb[4].mxu1 }
 0x423   : > { %v3517_v54 = vadd.f32 %v6631_v53, %v3516_v6  ;;  %v3518_v22 = vpop.f32.mrb[5].mxu1 }
 0x425   : > { %v3547_v9 = vmax.f32 %v3517_v54, 0.0 }
 0x426   : > { %v3521_v19 = vpop.f32.mrb[6].mxu1 }
 0x427   : > { %v3522_v20 = vadd.f32 %v6631_v53, %v3521_v19  ;;  %v3523_v48 = vpop.f32.mrb[7].mxu1  ;;  %v3557_v2 = vsel %vm3553_vm0, %v3547_v9, -inf }
 0x429   : > { %v3548_v3 = vmax.f32 %v3522_v20, 0.0 }
 0x42b   : > { %v3558_v60 = vsel %vm3553_vm0, %v3548_v3, -inf }
 0x42c   : > { %v3559_v26 = vmax.f32 %v3557_v2, %v3558_v60 }
 0x42e   : > { %v3587_v57 = vcombine.high %v3559_v26, %v3559_v26  ;;  %v3594_v38 = vrot.slane %v3559_v26, %v5632_v55 }
 0x430   : > { %v3601_v33 = vrot.slane %v3587_v57, %v5632_v55  ;;  %v3602_v28 = vcombine.high %v3594_v38, %v3594_v38  ;;  %v3683_v43 = vsel %vm3654_vm1, %v3594_v38, -inf }
 0x431   : > { %v3684_v30 = vrot.slane %v3683_v43, 4 }
 0x432   : > { %v3603_v12 = vcombine.high %v3601_v33, %v3601_v33  ;;  %v3690_v1 = vsel %vm3654_vm1, %v3602_v28, -inf  ;;  %v3697_v35 = vsel %vm3654_vm1, %v3601_v33, -inf  ;;  %v3851_v33 = vld [vmem:[%s6829_s5] sm:$0xff]  ;;  %v3852_v28 = vld [vmem:[%s6829_s5 + $0x8] sm:$0xff] }
 0x433   : > { %v3685_v25 = vmax.f32 %v3683_v43, %v3684_v30  ;;  %v3691_v21 = vrot.slane %v3690_v1, 4  ;;  %v3698_v58 = vrot.slane %v3697_v35, 4 }
 0x434   : > { %v3704_v63 = vsel %vm3654_vm1, %v3603_v12, -inf }
 0x435   : > { %v3686_v7 = vrot.slane %v3685_v25, 2  ;;  %v3692_v56 = vmax.f32 %v3690_v1, %v3691_v21  ;;  %v3699_v23 = vmax.f32 %v3697_v35, %v3698_v58  ;;  %v3705_v11 = vrot.slane %v3704_v63, 4  ;;  %v3853_v35 = vld [vmem:[%s6829_s5 + $0x10] sm:$0xff] }
 0x436   : > { %v4311_v21 = vpack.c.bf16 %v3852_v28, %v3851_v33  ;;  %v3935_v33 = vld [vmem:[%s6831_s7 + $0x8] sm:$0xff]  ;;  %v3936_v28 = vld [vmem:[%s6831_s7 + $0x10] sm:$0xff] }
 0x437   : > { %v3687_v4 = vmax.f32 %v3685_v25, %v3686_v7  ;;  %v3693_v62 = vrot.slane %v3692_v56, 2  ;;  %v3700_v29 = vrot.slane %v3699_v23, 2  ;;  %v3706_v14 = vmax.f32 %v3704_v63, %v3705_v11  ;;  %v3854_v25 = vld [vmem:[%s6829_s5 + $0x18] sm:$0xff] }
 0x438   : > { %4312 = vmatpush3.bf16.msra.mxu1 %v4311_v21 }
 0x439   : > { %v3688_v50 = vrot.slane %v3687_v4, 1  ;;  %v3694_v16 = vmax.f32 %v3692_v56, %v3693_v62  ;;  %v3701_v52 = vmax.f32 %v3699_v23, %v3700_v29  ;;  %v3707_v42 = vrot.slane %v3706_v14, 2  ;;  %4313 = vmatprep.subr.bf16.mxu1 %v4604_v45 }
 0x43a   : > { %v4314_v23 = vpack.c.bf16 %v3854_v25, %v3853_v35 }
 0x43b   : > { %v3689_v8 = vmax.f32 %v3687_v4, %v3688_v50  ;;  %v3695_v5 = vrot.slane %v3694_v16, 1  ;;  %v3702_v46 = vrot.slane %v3701_v52, 1  ;;  %v3708_v39 = vmax.f32 %v3706_v14, %v3707_v42  ;;  %v3855_v14 = vld [vmem:[%s6829_s5 + $0x20] sm:$0xff]  ;;  %v3856_v50 = vld [vmem:[%s6829_s5 + $0x28] sm:$0xff] }
 0x43c   : > { %4315 = vmatpush3.bf16.msra.mxu1 %v4314_v23  ;;  %v4317_v42 = vpack.c.bf16 %v3856_v50, %v3855_v14 }
 0x43d   : > { %3780 = vrot.lane.b32.xlu1 %v3689_v8, %s4600_s26  ;;  %v3696_v49 = vmax.f32 %v3694_v16, %v3695_v5  ;;  %v3709_v27 = vrot.slane %v3708_v39, 1  ;;  %v3703_v15 = vmax.f32 %v3701_v52, %v3702_v46  ;;  %4316 = vmatprep.subr.bf16.mxu1 %v4604_v45  ;;  %v3857_v5 = vld [vmem:[%s6829_s5 + $0x30] sm:$0xff]  ;;  %v3858_v46 = vld [vmem:[%s6829_s5 + $0x38] sm:$0xff] }
 0x43f   : > { %3784 = vrot.lane.b32.xlu0 %v3696_v49, %s4609_s22  ;;  %v3710_v18 = vmax.f32 %v3708_v39, %v3709_v27  ;;  %s4612_s22 = smov 40   ;;  %v4320_v49 = vpack.c.bf16 %v3858_v46, %v3857_v5 }
 0x440   : > { %4318 = vmatpush3.bf16.msra.mxu1 %v4317_v42 }
 0x441   : > { %3788 = vrot.lane.b32.xlu1 %v3703_v15, %s7024_s23  ;;  %4319 = vmatprep.subr.bf16.mxu1 %v4604_v45 }
 0x443   : > { %3792 = vrot.lane.b32.xlu0 %v3710_v18, %s4610_s24  ;;  %s323_s24 = sand.u32 1, %s4578_s10  }
 0x444   : > { %4321 = vmatpush3.bf16.msra.mxu1 %v4320_v49  ;;  %s324_s16 = scalar_lea.vmem [#allocation2], %s323_s24 }
 0x445   : > { %s4027_s14 = sshll.u32 %s324_s16, 4  ;;  %s6784_s14 = int_to_ptr.vmem [resolvable:$true] %s4027_s14 }
 0x4a1   : > { %v3526_v36 = vpop.f32.mrb[8].mxu1 }
 0x4a2   : > { %v3527_v61 = vadd.f32 %v6631_v53, %v3526_v36  ;;  %v3528_v59 = vpop.f32.mrb[9].mxu1 }
 0x4a4   : > { %v3549_v51 = vmax.f32 %v3527_v61, 0.0 }
 0x4a5   : > { %v3531_v32 = vpop.f32.mrb[10].mxu1 }
 0x4a6   : > { %v3532_v44 = vadd.f32 %v6631_v53, %v3531_v32  ;;  %v3533_v41 = vpop.f32.mrb[11].mxu1  ;;  %v3560_v24 = vsel %vm3553_vm0, %v3549_v51, -inf }
 0x4a8   : > { %v3550_v34 = vmax.f32 %v3532_v44, 0.0 }
 0x4aa   : > { %v3561_v13 = vsel %vm3553_vm0, %v3550_v34, -inf }
 0x4ab   : > { %v3562_v10 = vmax.f32 %v3560_v24, %v3561_v13 }
 0x4ad   : > { %v3604_v17 = vcombine.high %v3562_v10, %v3562_v10  ;;  %v3611_v0 = vrot.slane %v3562_v10, %v5632_v55 }
 0x4af   : > { %v3618_v37 = vrot.slane %v3604_v17, %v5632_v55  ;;  %v3619_v31 = vcombine.high %v3611_v0, %v3611_v0  ;;  %v3711_v6 = vsel %vm3654_vm1, %v3611_v0, -inf }
 0x4b0   : > { %v3712_v54 = vrot.slane %v3711_v6, 4 }
 0x4b1   : > { %v3620_v22 = vcombine.high %v3618_v37, %v3618_v37  ;;  %v3718_v19 = vsel %vm3654_vm1, %v3619_v31, -inf  ;;  %v3725_v9 = vsel %vm3654_vm1, %v3618_v37, -inf }
 0x4b2   : > { %v3713_v20 = vmax.f32 %v3711_v6, %v3712_v54  ;;  %v3719_v48 = vrot.slane %v3718_v19, 4  ;;  %v3726_v3 = vrot.slane %v3725_v9, 4 }
 0x4b3   : > { %v3732_v2 = vsel %vm3654_vm1, %v3620_v22, -inf }
 0x4b4   : > { %v3714_v60 = vrot.slane %v3713_v20, 2  ;;  %v3720_v26 = vmax.f32 %v3718_v19, %v3719_v48  ;;  %v3727_v57 = vmax.f32 %v3725_v9, %v3726_v3  ;;  %v3733_v38 = vrot.slane %v3732_v2, 4 }
 0x4b6   : > { %v3715_v43 = vmax.f32 %v3713_v20, %v3714_v60  ;;  %v3721_v30 = vrot.slane %v3720_v26, 2  ;;  %v3728_v12 = vrot.slane %v3727_v57, 2  ;;  %v3734_v1 = vmax.f32 %v3732_v2, %v3733_v38  ;;  %v3934_v38 = vld [vmem:[%s6831_s7] sm:$0xff] }
 0x4b8   : > { %v3716_v58 = vrot.slane %v3715_v43, 1  ;;  %v3722_v63 = vmax.f32 %v3720_v26, %v3721_v30  ;;  %v3729_v7 = vmax.f32 %v3727_v57, %v3728_v12  ;;  %v3735_v56 = vrot.slane %v3734_v1, 2  ;;  %v3937_v30 = vld [vmem:[%s6831_s7 + $0x18] sm:$0xff] }
 0x4b9   : > { %v4326_v21 = vpack.c.bf16 %v3937_v30, %v3936_v28 }
 0x4ba   : > { %v3717_v11 = vmax.f32 %v3715_v43, %v3716_v58  ;;  %v3723_v4 = vrot.slane %v3722_v63, 1  ;;  %v3730_v62 = vrot.slane %v3729_v7, 1  ;;  %v3736_v29 = vmax.f32 %v3734_v1, %v3735_v56 }
 0x4bb   : > { %v4323_v43 = vpack.c.bf16 %v3935_v33, %v3934_v38 }
 0x4bc   : > { %3796 = vrot.lane.b32.xlu1 %v3717_v11, %s4599_s21  ;;  %v3724_v16 = vmax.f32 %v3722_v63, %v3723_v4  ;;  %v3737_v52 = vrot.slane %v3736_v29, 1  ;;  %v3731_v8 = vmax.f32 %v3729_v7, %v3730_v62  ;;  %s4613_s21 = smov 44   ;;  %v3655_v62 = vsel %vm3654_vm1, %v6638_v47, -inf }
 0x4bd   : > { %4324 = vmatpush3.bf16.msra.mxu0 %v4323_v43 }
 0x4be   : > { %3800 = vrot.lane.b32.xlu0 %v3724_v16, %s4611_s17  ;;  %v3738_v39 = vmax.f32 %v3736_v29, %v3737_v52  ;;  %4325 = vmatprep.subr.bf16.mxu0 %v4604_v45  ;;  %v3656_v29 = vrot.slane %v3655_v62, 4  ;;  %v3769_v52 = vpop.permute.xlu0 %3768  ;;  %s4133_s17 = sshll.u32 %s4690_s13, 4  ;;  %s4618_s13 = smov [#allocation2]  }
 0x4bf   : > { %s4528_s23 = sshll.u32 %s4618_s13, 4  ;;  %s4529_s23 = int_to_ptr.vmem [resolvable:$false] %s4528_s23 }
 0x4c0   : > { %3804 = vrot.lane.b32.xlu1 %v3731_v8, %s4612_s22  ;;  %s4616_s22 = smov 56   ;;  %v3657_v14 = vmax.f32 %v3655_v62, %v3656_v29  ;;  %v3773_v8 = vpop.permute.xlu1 %3772  ;;  %s4530_s26 = scalar_lea.vmem %s4529_s23, 32 }
 0x4c1   : > { %4327 = vmatpush3.bf16.msra.mxu0 %v4326_v21  ;;  %p4531_p0 = scmp.lt.s32.totalorder %s6784_s14, %s4529_s23 }
 0x4c2   : > { %3808 = vrot.lane.b32.xlu0 %v3738_v39, %s4613_s21  ;;  %s4617_s21 = smov 60   ;;  %v3658_v50 = vrot.slane %v3657_v14, 2  ;;  %v3777_v46 = vpop.permute.xlu0 %3776 }
 0x4c4   : > { %v3659_v45 = vmax.f32 %v3657_v14, %v3658_v50  ;;  %v3781_v39 = vpop.permute.xlu1 %3780 }
 0x4c6   : > { %v3660_v16 = vrot.slane %v3659_v45, 1  ;;  %v3785_v47 = vpop.permute.xlu0 %3784 }
 0x4c8   : > { %v3661_v42 = vmax.f32 %v3659_v45, %v3660_v16 }
 0x4ca   : > { %v3827_v5 = vsel %vm3553_vm0, %v3661_v42, %v3769_v52 }
 0x4cb   : > { %v3829_v49 = vsel %vm3828_vm15, %v3827_v5, %v3773_v8 }
 0x4d3   : > { %v3536_v27 = vpop.f32.mrb[12].mxu1 }
 0x4d4   : > { %v3538_v15 = vpop.f32.mrb[13].mxu1  ;;  %v3537_v18 = vadd.f32 %v6631_v53, %v3536_v27  ;;  %v3830_v27 = vsel %vm1571_vm9, %v3829_v49, %v3777_v46  ;;  %vm3842_vm9 = vcmask 359424  }
 0x4d5   : > { %v3831_v15 = vsel %vm7025_vm14, %v3830_v27, %v3781_v39 }
 0x4d6   : > { %v3551_v61 = vmax.f32 %v3537_v18, 0.0  ;;  %v3833_v18 = vsel %vm3832_vm7, %v3831_v15, %v3785_v47 }
 0x4d8   : > { %v3563_v44 = vsel %vm3553_vm0, %v3551_v61, -inf }
 0x4da   : > { %v3541_v36 = vpop.f32.mrb[14].mxu1 }
 0x4db   : > { %v3542_v59 = vadd.f32 %v6631_v53, %v3541_v36  ;;  %v3543_v32 = vpop.f32.mrb[15].mxu1  ;;  %v3789_v36 = vpop.permute.xlu1 %3788 }
 0x4dd   : > { %v3552_v51 = vmax.f32 %v3542_v59, 0.0  ;;  %v3793_v59 = vpop.permute.xlu0 %3792 }
 0x4df   : > { %v3564_v41 = vsel %vm3553_vm0, %v3552_v51, -inf  ;;  %vm3838_vm0 = vcmask 293888  }
 0x4e0   : > { %v3565_v34 = vmax.f32 %v3563_v44, %v3564_v41 }
 0x4e2   : > { %v3621_v24 = vcombine.high %v3565_v34, %v3565_v34  ;;  %v3628_v13 = vrot.slane %v3565_v34, %v5632_v55 }
 0x4e4   : > { %v3635_v10 = vrot.slane %v3621_v24, %v5632_v55  ;;  %v3636_v17 = vcombine.high %v3628_v13, %v3628_v13  ;;  %v3739_v0 = vsel %vm3654_vm1, %v3628_v13, -inf }
 0x4e5   : > { %v3740_v37 = vrot.slane %v3739_v0, 4 }
 0x4e6   : > { %v3637_v31 = vcombine.high %v3635_v10, %v3635_v10  ;;  %v3746_v6 = vsel %vm3654_vm1, %v3636_v17, -inf  ;;  %v3753_v53 = vsel %vm3654_vm1, %v3635_v10, -inf }
 0x4e7   : > { %v3741_v54 = vmax.f32 %v3739_v0, %v3740_v37  ;;  %v3747_v22 = vrot.slane %v3746_v6, 4  ;;  %v3754_v19 = vrot.slane %v3753_v53, 4 }
 0x4e8   : > { %v3760_v9 = vsel %vm3654_vm1, %v3637_v31, -inf  ;;  %vm7026_vm1 = vcmask 195584  }
 0x4e9   : > { %v3742_v20 = vrot.slane %v3741_v54, 2  ;;  %v3748_v48 = vmax.f32 %v3746_v6, %v3747_v22  ;;  %v3755_v3 = vmax.f32 %v3753_v53, %v3754_v19  ;;  %v3761_v2 = vrot.slane %v3760_v9, 4 }
 0x4ea   : > { %v3834_v61 = vsel %vm7026_vm1, %v3833_v18, %v3789_v36 }
 0x4eb   : > { %v3743_v60 = vmax.f32 %v3741_v54, %v3742_v20  ;;  %v3749_v55 = vrot.slane %v3748_v48, 2  ;;  %v3756_v26 = vrot.slane %v3755_v3, 2  ;;  %v3762_v57 = vmax.f32 %v3760_v9, %v3761_v2  ;;  %v3859_v9 = vld [vmem:[%s6830_s6] sm:$0x1] }
 0x4ec   : > { %v3836_v51 = vsel %vm3835_vm8, %v3834_v61, %v3793_v59 }
 0x4ed   : > { %v3744_v12 = vrot.slane %v3743_v60, 1  ;;  %v3750_v1 = vmax.f32 %v3748_v48, %v3749_v55  ;;  %v3757_v35 = vmax.f32 %v3755_v3, %v3756_v26  ;;  %v3763_v25 = vrot.slane %v3762_v57, 2 }
 0x4ef   : > { %v3745_v58 = vmax.f32 %v3743_v60, %v3744_v12  ;;  %v3751_v63 = vrot.slane %v3750_v1, 1  ;;  %v3758_v7 = vrot.slane %v3757_v35, 1  ;;  %v3764_v56 = vmax.f32 %v3762_v57, %v3763_v25  ;;  %v3938_v60 = vld [vmem:[%s6832_s8] sm:$0x1] }
 0x4f1   : > { %3812 = vrot.lane.b32.xlu1 %v3745_v58, %s4601_s28  ;;  %v3752_v40 = vmax.f32 %v3750_v1, %v3751_v63  ;;  %v3765_v23 = vrot.slane %v3764_v56, 1  ;;  %v3759_v11 = vmax.f32 %v3757_v35, %v3758_v7  ;;  %s4524_s28 = scalar_lea.vmem %s6784_s14, 16 }
 0x4f2   : > { %p4525_p11 = scmp.ne.s32.totalorder %s6784_s14, %s4524_s28  ;;  %p4532_p1 = scmp.lt.s32.totalorder %s4530_s26, %s4524_s28 }
 0x4f3   : > { %3816 = vrot.lane.b32.xlu0 %v3752_v40, %s4615_s27  ;;  %v3766_v4 = vmax.f32 %v3764_v56, %v3765_v23 }
 0x4f4   : > { %p4526_p12 = pnand %p4525_p11, %p4707_p5  ;;  %p4533_p2 = por %p4532_p1, %p4531_p0 }
 0x4f5   : > { %3820 = vrot.lane.b32.xlu1 %v3759_v11, %s4616_s22  ;;  %s6782_s22 = scalar_lea.hbm %s6833_s9, %s4133_s17 }
 0x4f6   : > { %p4527_p13 = pneg %p4526_p12 }
 0x4f7   : > { %3824 = vrot.lane.b32.xlu0 %v3766_v4, %s4617_s21  ;;  %s4015_s21 = scalar_lea.sflag [#allocation3], %s323_s24 }
 0x4f8   : > { %p4534_p3 = pnand %p4533_p2, %p4527_p13 }
 0x52e   : > { %v3797_v32 = vpop.permute.xlu1 %3796 }
 0x52f   : > { %v3837_v44 = vsel %vm3345_vm6, %v3836_v51, %v3797_v32 }
 0x530   : > { %v3801_v41 = vpop.permute.xlu0 %3800 }
 0x531   : > { %v3839_v34 = vsel %vm3838_vm0, %v3837_v44, %v3801_v41 }
 0x532   : > { %v3805_v24 = vpop.permute.xlu1 %3804 }
 0x533   : > { %v3841_v13 = vsel %vm3840_vm2, %v3839_v34, %v3805_v24 }
 0x534   : > { %v3809_v10 = vpop.permute.xlu0 %3808 }
 0x535   : > { %v3843_v17 = vsel %vm3842_vm9, %v3841_v13, %v3809_v10 }
 0x563   : > { %v3813_v0 = vpop.permute.xlu1 %3812 }
 0x564   : > { %v3844_v37 = vsel %vm3354_vm11, %v3843_v17, %v3813_v0  ;;  %vm4012_vm11 = vcmask 16384  }
 0x565   : > { %v3817_v31 = vpop.permute.xlu0 %3816 }
 0x566   : > { %v3846_v6 = vsel %vm3845_vm13, %v3844_v37, %v3817_v31 }
 0x567   : > { %v3821_v53 = vpop.permute.xlu1 %3820 }
 0x568   : > { %v3848_v54 = vsel %vm3847_vm10, %v3846_v6, %v3821_v53 }
 0x569   : > { %v3825_v22 = vpop.permute.xlu0 %3824 }
 0x56a   : > { %v3850_v19 = vsel %vm3849_vm3, %v3848_v54, %v3825_v22 }
 0x56b   : > { %4260 = vmatmul.mubr.msk.f32.vlgmr.msra.gmra.mrb[16].mxu1 %vm3363_vm4, %v3850_v19 }
 0x63e   : > { %v3929_v20 = vpop.f32.mrb[16].mxu1 }
 0x63f   : > { %v3930_v48 = vadd.f32 %v3929_v20, %v3859_v9  ;;  %v4261_v3 = vpop.f32.mrb[17].mxu1 }
 0x641   : > { %v3933_v2 = vmax.f32 %v3930_v48, 0.0 }
 0x643   : > { %4271 = vmatmul.mubr.msk.f32.vlgmr.msra.gmra.mrb[32].mxu0 %vm3345_vm6, %v3933_v2 }
 0x716   : > { %v4008_v55 = vpop.f32.mrb[32].mxu0 }
 0x717   : > { %v4009_v26 = vadd.f32 %v4008_v55, %v3938_v60  ;;  %v4272_v57 = vpop.f32.mrb[33].mxu0 }
 0x719   : > { %4013 = vst.msk [vmem:[%s324_s16] sm:$0x1] %vm4012_vm11, %v4009_v26 }
 0x71a   : > { %4537 = shalt.err (!%p4534_p3)
}
 0x71b   : > { %s4538_s24 = scalar_lea.hbm %s6782_s22, 16  ;;  %s4542_s16 = scalar_lea.hbm %s6833_s9, 32 }
 0x71c   : > { %p4539_p4 = scmp.ne.s32.totalorder %s6782_s22, %s4538_s24  ;;  %p4543_p9 = scmp.lt.u32.totalorder %s6782_s22, %s6833_s9 }
 0x71d   : > { %p4544_p10 = scmp.lt.u32.totalorder %s4542_s16, %s4538_s24  ;;  %p4546_p12 = scmp.lt.u32.totalorder %s4538_s24, %s6782_s22 }
 0x71e   : > { %p4540_p7 = pnand %p4539_p4, %p4707_p5 }
 0x71f   : > { %p4545_p11 = por %p4544_p10, %p4543_p9 }
 0x720   : > { %p4541_p8 = pneg %p4540_p7 }
 0x721   : > { %p4547_p13 = por %p4546_p12, %p4545_p11 }
 0x723   : > { %p4548_p0 = pnand %p4547_p13, %p4541_p8 }
 0x725   : > { %4551 = shalt.err (!%p4548_p0)
}
 0x726   : > { %4328 = dma.vmem_to_hbm [thread:$0]  (%p4707_p5), %s6784_s14, 16, %s6782_s22, %s4015_s21  }
 0x727 PF: > { %p4334_p1 = scmp.ge.s32.totalorder %s4586_s12, 2  ;;  %s4039_s28 = sand.u32 1, %s4574_s30  }
 0x728   : > { %s4040_s13 = scalar_lea.sflag [#allocation3], %s4039_s28 }
 0x729   : > { %p4331_p2 = pnand %p4334_p1, %p4711_p6 }
 0x72b   : > { %4569 = dma.done.wait (!%p4331_p2), %s4040_s13, 16  }
 0x72c   : > { %4571 = vsyncadd (!%p4331_p2), %s4040_s13, 4294967280  ;;  %p19_p3 = scmp.ge.s32.totalorder %s4694_s15, 4   ;;  %s7027_s30 = smov %s4578_s10 }
 0x72d   : > { %s7028_s10 = smov %s4582_s11  ;;  %s7029_s11 = smov %s4705_s18 }
 0x72e   : > { %s7030_s12 = smov %s4694_s15  ;;  %21 = sbr.rel (!%p19_p3) target bundleno = 3 (0x3), region = 91 }
 0x735   :  { %4044 = vsyncpa [#allocation3], 1 }
 0x736   :  { %4046 = vsyncpa [#allocation3 + $0x1], 1 }

</bundles_post_ra>
